<compile_context>
chip_gen: v6e
topology: v6e:2x2x1
jax: 0.10.0
libtpu: 0.0.40
codegen_flags: <defaults>
</compile_context>

<pallas_src>
import functools

import jax
import jax.numpy as jnp
from jax.experimental import pallas as pl
from jax.experimental.pallas import tpu as pltpu

IN_LAYERS = 3
OUT_LAYERS = 3
LN_EPS = 1e-5          # torch.nn.LayerNorm default
LANE = 128
SUBLANE = 8


def _round_up(x, m):
    return (x + m - 1) // m * m


def _vmem_capacity_bytes():
    try:
        cap = int(getattr(pltpu.get_tpu_info(), "vmem_capacity_bytes", 0))
        if cap > 0:
            return cap
    except Exception:
        pass
    return 128 << 20    # v5e/v6e default


def _bytes_of(arrs):
    return sum(int(a.size) * a.dtype.itemsize for a in arrs)


# ----------------------------------------------------------------------------
# Kernel bodies
# ----------------------------------------------------------------------------

def _layernorm_masked(h, gamma, beta, n_real):
    """Two-pass LayerNorm over the last axis. h may carry zero-padded trailing
    features (gamma/beta are zero there, so padded outputs stay exactly 0).
    Statistics use only the n_real real features."""
    n_pad = h.shape[-1]
    inv_n = 1.0 / float(n_real)
    mu = jnp.sum(h, axis=-1, keepdims=True) * inv_n
    if n_pad != n_real:
        col = jax.lax.broadcasted_iota(jnp.int32, (1, n_pad), 1)
        mask = (col < n_real).astype(h.dtype)
        d = h - mu * mask            # padded columns stay exactly zero
    else:
        d = h - mu
    var = jnp.maximum(jnp.sum(d * d, axis=-1, keepdims=True) * inv_n, 0.0)
    return d * jax.lax.rsqrt(var + LN_EPS) * gamma + beta


def _in_stage(h, w_in_ref, b_in_ref, g_in, be_in, w_pr_ref, b_pr_ref, real_h):
    """Hidden_In stack (residual cache accumulation + LN) + projection + ReLU."""
    wdt = w_in_ref.dtype
    cache_sum = jnp.zeros_like(h)
    for k in range(IN_LAYERS):
        cache_sum = cache_sum + h              # sum of all cached states
        y = jnp.dot(h.astype(wdt), w_in_ref[k],
                    preferred_element_type=jnp.float32)
        y = jnp.maximum(y + b_in_ref[k].astype(jnp.float32), 0.0) + cache_sum
        h = _layernorm_masked(y, g_in, be_in, real_h)
    f = jnp.dot(h.astype(wdt), w_pr_ref[...],
                preferred_element_type=jnp.float32)
    return jnp.maximum(f + b_pr_ref[...].astype(jnp.float32), 0.0)


def _out_stage(f, w_out_ref, b_out_ref, g_out, be_out, real_e):
    """Hidden_Out stack (residual cache accumulation + LN)."""
    wdt = w_out_ref.dtype
    cache_sum = jnp.zeros_like(f)
    for k in range(OUT_LAYERS):
        cache_sum = cache_sum + f
        y = jnp.dot(f.astype(wdt), w_out_ref[k],
                    preferred_element_type=jnp.float32)
        y = jnp.maximum(y + b_out_ref[k].astype(jnp.float32), 0.0) + cache_sum
        f = _layernorm_masked(y, g_out, be_out, real_e)
    return f


def _fused_kernel(x_ref, w_in_ref, b_in_ref, g_in_ref, be_in_ref,
                  w_pr_ref, b_pr_ref, w_out_ref, b_out_ref,
                  g_out_ref, be_out_ref, o_ref, *, real_h, real_e):
    h = x_ref[...].astype(jnp.float32)
    # Hoist LN params (JAX does not CSE the broadcasts inside the layer loops).
    g_in = g_in_ref[...].astype(jnp.float32)
    be_in = be_in_ref[...].astype(jnp.float32)
    g_out = g_out_ref[...].astype(jnp.float32)
    be_out = be_out_ref[...].astype(jnp.float32)
    f = _in_stage(h, w_in_ref, b_in_ref, g_in, be_in, w_pr_ref, b_pr_ref, real_h)
    f = _out_stage(f, w_out_ref, b_out_ref, g_out, be_out, real_e)
    o_ref[...] = f.astype(o_ref.dtype)


def _in_kernel(x_ref, w_in_ref, b_in_ref, g_in_ref, be_in_ref,
               w_pr_ref, b_pr_ref, o_ref, *, real_h):
    h = x_ref[...].astype(jnp.float32)
    g_in = g_in_ref[...].astype(jnp.float32)
    be_in = be_in_ref[...].astype(jnp.float32)
    f = _in_stage(h, w_in_ref, b_in_ref, g_in, be_in, w_pr_ref, b_pr_ref, real_h)
    o_ref[...] = f.astype(o_ref.dtype)


def _out_kernel(f_ref, w_out_ref, b_out_ref, g_out_ref, be_out_ref,
                o_ref, *, real_e):
    f = f_ref[...].astype(jnp.float32)
    g_out = g_out_ref[...].astype(jnp.float32)
    be_out = be_out_ref[...].astype(jnp.float32)
    f = _out_stage(f, w_out_ref, b_out_ref, g_out, be_out, real_e)
    o_ref[...] = f.astype(o_ref.dtype)


# ----------------------------------------------------------------------------
# Host-side wrappers
# ----------------------------------------------------------------------------

def prepare_params(params, weights_dtype=jnp.bfloat16):
    """One-time lane-dense padding + optional bf16 cast of all parameters so
    the per-call wrapper performs no weight-sized HBM work."""
    H = params["w_in"].shape[-1]
    E = params["w_pr"].shape[-1]
    Hp = _round_up(H, LANE)
    Ep = _round_up(E, LANE)
    wdt = jnp.float32 if weights_dtype is None else weights_dtype

    def pad2(a, r, c):
        pads = [(0, 0)] * (a.ndim - 2) + [(0, r - a.shape[-2]),
                                          (0, c - a.shape[-1])]
        return jnp.pad(a, pads)

    return {
        "H": H, "E": E, "Hp": Hp, "Ep": Ep,
        "io_dtype": jnp.float32 if weights_dtype is None else weights_dtype,
        "w_in": pad2(params["w_in"], Hp, Hp).astype(wdt),
        "b_in": pad2(params["b_in"], 1, Hp),
        "ln_in_g": pad2(params["ln_in_g"], 1, Hp),
        "ln_in_b": pad2(params["ln_in_b"], 1, Hp),
        "w_pr": pad2(params["w_pr"], Hp, Ep).astype(wdt),
        "b_pr": pad2(params["b_pr"], 1, Ep),
        "w_out": pad2(params["w_out"], Ep, Ep).astype(wdt),
        "b_out": pad2(params["b_out"], 1, Ep),
        "ln_out_g": pad2(params["ln_out_g"], 1, Ep),
        "ln_out_b": pad2(params["ln_out_b"], 1, Ep),
    }


def _run_stage(kernel, x2, resident, *, tm, in_cols, out_cols, out_dtype,
               vmem_limit, cost, x_buffers):
    """One token-tiled pallas_call: tiled x input + VMEM-resident params."""
    Np = x2.shape[0]
    n_tiles = Np // tm

    def build_specs(use_buf):
        x_kw = {}
        if use_buf and x_buffers != 2:
            x_kw["pipeline_mode"] = pl.Buffered(x_buffers)
        in_specs = [pl.BlockSpec((tm, in_cols), lambda i: (i, 0), **x_kw)]
        for a in resident:
            # Constant index_map => block never changes; single-buffer it.
            r_kw = {"pipeline_mode": pl.Buffered(1)} if use_buf else {}
            nd = a.ndim
            in_specs.append(
                pl.BlockSpec(a.shape, lambda i, _nd=nd: (0,) * _nd, **r_kw))
        out_spec = pl.BlockSpec((tm, out_cols), lambda i: (i, 0))
        return in_specs, out_spec

    last_err = None
    # Fall back to default buffering if this Pallas build rejects Buffered(1)/(3).
    for use_buf in (True, False):
        try:
            in_specs, out_spec = build_specs(use_buf)
            return pl.pallas_call(
                kernel,
                out_shape=jax.ShapeDtypeStruct((Np, out_cols), out_dtype),
                grid=(n_tiles,),
                in_specs=in_specs,
                out_specs=out_spec,
                compiler_params=pltpu.CompilerParams(
                    dimension_semantics=("parallel",),
                    vmem_limit_bytes=vmem_limit),
                cost_estimate=cost,
            )(x2, *resident)
        except Exception as e:      # pragma: no cover - buffering fallback
            last_err = e
    raise last_err


def elice21_encoder(x, prepped, *, tile_m=None, out_dtype=None,
                    force_split=False):
    """x: (B, S, H) -> (B, S, E). `prepped` comes from prepare_params()."""
    B, S, H = x.shape
    assert H == prepped["H"], "hidden size mismatch with prepared params"
    E, Hp, Ep = prepped["E"], prepped["Hp"], prepped["Ep"]
    io_dtype = prepped["io_dtype"]
    out_dtype = x.dtype if out_dtype is None else out_dtype
    N = B * S

    vmem_cap = _vmem_capacity_bytes()
    two_core_chip = vmem_cap < (100 << 20)       # v7x: 64 MiB VMEM, 2 TCs

    # Token tile: 512 rows on 128-MiB chips (v5e/v6e), 256 on v7x; never more
    # than the sublane-aligned token count.
    if tile_m is None:
        tile_m = 256 if two_core_chip else 512
    tm = _round_up(min(tile_m, _round_up(N, SUBLANE)), SUBLANE)
    if two_core_chip and _round_up(N, tm) == tm and tm > SUBLANE:
        # A single-tile grid would idle one of the two TensorCores.
        tm = _round_up((tm + 1) // 2, SUBLANE)
    Np = _round_up(N, tm)
    n_tiles = Np // tm

    x2 = jnp.pad(x.reshape(N, H), ((0, Np - N), (0, Hp - H))).astype(io_dtype)

    in_args = (prepped["w_in"], prepped["b_in"], prepped["ln_in_g"],
               prepped["ln_in_b"], prepped["w_pr"], prepped["b_pr"])
    out_args = (prepped["w_out"], prepped["b_out"], prepped["ln_out_g"],
                prepped["ln_out_b"])
    in_bytes, out_bytes = _bytes_of(in_args), _bytes_of(out_args)

    # Deeper x-input buffering on big-VMEM chips with small feature widths,
    # where the per-step tile DMA is not fully hidden behind the matmuls.
    x_buffers = 3 if (not two_core_chip and Hp <= 512 and Ep <= 512
                      and n_tiles >= 4) else 2

    io_item = jnp.dtype(io_dtype).itemsize
    out_item = jnp.dtype(out_dtype).itemsize
    temp_bytes = 6 * tm * max(Hp, Ep) * 4   # live f32 h/cache_sum/y/LN temps

    def limit(param_bytes, in_c, out_c, out_i):
        act = x_buffers * tm * in_c * io_item + 2 * tm * out_c * out_i
        need = int(1.25 * (param_bytes + act + temp_bytes))
        cap = int(0.85 * vmem_cap)
        return max(min(need, cap), min(32 << 20, cap))

    split = force_split or (in_bytes + out_bytes) > int(0.40 * vmem_cap)
    # TODO(synk): if even a single stage's weights exceed ~0.4*VMEM (very large
    # H/E on v7x), stream per-layer weights with pltpu.emit_pipeline instead of
    # keeping a whole stage resident.

    if not split:
        cost = pl.CostEstimate(
            flops=2 * Np * (IN_LAYERS * Hp * Hp + Hp * Ep + OUT_LAYERS * Ep * Ep),
            transcendentals=Np * (IN_LAYERS + OUT_LAYERS),
            bytes_accessed=Np * Hp * io_item + Np * Ep * out_item
            + in_bytes + out_bytes)
        out = _run_stage(
            functools.partial(_fused_kernel, real_h=H, real_e=E),
            x2, in_args + out_args, tm=tm, in_cols=Hp, out_cols=Ep,
            out_dtype=out_dtype,
            vmem_limit=limit(in_bytes + out_bytes, Hp, Ep, out_item),
            cost=cost, x_buffers=x_buffers)
    else:
        # Two calls: in-stack + projection, then out-stack; only ~half the
        # weights are VMEM-resident per call (v7x 64 MiB fallback).
        cost1 = pl.CostEstimate(
            flops=2 * Np * (IN_LAYERS * Hp * Hp + Hp * Ep),
            transcendentals=Np * IN_LAYERS,
            bytes_accessed=Np * (Hp + Ep) * io_item + in_bytes)
        f = _run_stage(
            functools.partial(_in_kernel, real_h=H),
            x2, in_args, tm=tm, in_cols=Hp, out_cols=Ep,
            out_dtype=io_dtype,
            vmem_limit=limit(in_bytes, Hp, Ep, io_item),
            cost=cost1, x_buffers=x_buffers)
        cost2 = pl.CostEstimate(
            flops=2 * Np * OUT_LAYERS * Ep * Ep,
            transcendentals=Np * OUT_LAYERS,
            bytes_accessed=Np * Ep * (io_item + out_item) + out_bytes)
        out = _run_stage(
            functools.partial(_out_kernel, real_e=E),
            f, out_args, tm=tm, in_cols=Ep, out_cols=Ep,
            out_dtype=out_dtype,
            vmem_limit=limit(out_bytes, Ep, Ep, out_item),
            cost=cost2, x_buffers=x_buffers)

    return out[:N, :E].reshape(B, S, E)


# ----------------------------------------------------------------------------
# Parameters + pure-JAX reference
# ----------------------------------------------------------------------------

def init_params(key, hidden_size, embedding_dim):
    ks = jax.random.split(key, 8)
    scale = 0.05
    return {
        # Linear weights stored pre-transposed: (in, out)
        "w_in": jax.random.normal(ks[0], (IN_LAYERS, hidden_size, hidden_size),
                                  jnp.float32) * scale,
        "b_in": jax.random.normal(ks[1], (IN_LAYERS, 1, hidden_size),
                                  jnp.float32) * scale,
        "ln_in_g": 1.0 + 0.1 * jax.random.normal(ks[2], (1, hidden_size), jnp.float32),
        "ln_in_b": 0.1 * jax.random.normal(ks[3], (1, hidden_size), jnp.float32),
        "w_pr": jax.random.normal(ks[4], (hidden_size, embedding_dim),
                                  jnp.float32) * scale,
        "b_pr": jax.random.normal(ks[5], (1, embedding_dim), jnp.float32) * scale,
        "w_out": jax.random.normal(ks[6], (OUT_LAYERS, embedding_dim, embedding_dim),
                                   jnp.float32) * scale,
        "b_out": jax.random.normal(ks[7], (OUT_LAYERS, 1, embedding_dim),
                                   jnp.float32) * scale,
        "ln_out_g": jnp.ones((1, embedding_dim), jnp.float32),
        "ln_out_b": jnp.zeros((1, embedding_dim), jnp.float32),
    }


def _layernorm_ref(h, gamma, beta):
    mu = jnp.mean(h, axis=-1, keepdims=True)
    d = h - mu
    var = jnp.mean(d * d, axis=-1, keepdims=True)
    return d * jax.lax.rsqrt(var + LN_EPS) * gamma + beta


def reference_forward(x, params):
    """Pure-JAX f32 reference matching the PyTorch forward (eval mode)."""
    B, S, H = x.shape
    h = x.reshape(B * S, H)
    cache_sum = jnp.zeros_like(h)
    for k in range(IN_LAYERS):
        cache_sum = cache_sum + h
        y = jnp.maximum(h @ params["w_in"][k] + params["b_in"][k], 0.0) + cache_sum
        h = _layernorm_ref(y, params["ln_in_g"], params["ln_in_b"])
    f = jnp.maximum(h @ params["w_pr"] + params["b_pr"], 0.0)
    cache_sum = jnp.zeros_like(f)
    for k in range(OUT_LAYERS):
        cache_sum = cache_sum + f
        y = jnp.maximum(f @ params["w_out"][k] + params["b_out"][k], 0.0) + cache_sum
        f = _layernorm_ref(y, params["ln_out_g"], params["ln_out_b"])
    return f.reshape(B, S, -1)


if __name__ == "__main__":
    B, S, HIDDEN, EMBED = 2, 8, 32, 64

    key = jax.random.PRNGKey(0)
    kx, kp = jax.random.split(key)
    x = jax.random.normal(kx, (B, S, HIDDEN), jnp.float32)
    params = init_params(kp, HIDDEN, EMBED)

    ref = reference_forward(x, params)

    # Exactness check: f32 weights, tight tolerance vs the f32 reference.
    prepped_f32 = prepare_params(params, weights_dtype=None)
    out_f32 = jax.block_until_ready(elice21_encoder(x, prepped_f32))
    assert out_f32.shape == (B, S, EMBED)
    assert jnp.allclose(out_f32, ref, atol=1e-4, rtol=1e-4), \
        "f32 fused kernel mismatch vs JAX reference"

    # Exercise the two-call (weight-split) fallback path explicitly.
    out_split = jax.block_until_ready(
        elice21_encoder(x, prepped_f32, force_split=True))
    assert jnp.allclose(out_split, ref, atol=1e-4, rtol=1e-4), \
        "split-stage kernel mismatch vs JAX reference"

    # Performance path: bf16 weights + bf16 activation IO, f32 accumulation/LN.
    prepped_bf16 = prepare_params(params, weights_dtype=jnp.bfloat16)
    out_bf16 = jax.block_until_ready(elice21_encoder(x, prepped_bf16))
    assert out_bf16.shape == (B, S, EMBED)
    assert jnp.allclose(out_bf16, ref, atol=1e-1, rtol=1e-1), \
        "bf16-weight kernel diverged from reference"

    print("KERNEL_OK")
</pallas_src>

<mosaic_0001>
module attributes {stable_mosaic.version = 11 : i64} {
  func.func @_fused_kernel(%arg0: i32, %arg1: memref<16x128xf32, #tpu.memory_space<vmem>>, %arg2: memref<3x128x128xf32, #tpu.memory_space<vmem>>, %arg3: memref<3x1x128xf32, #tpu.memory_space<vmem>>, %arg4: memref<1x128xf32, #tpu.memory_space<vmem>>, %arg5: memref<1x128xf32, #tpu.memory_space<vmem>>, %arg6: memref<128x128xf32, #tpu.memory_space<vmem>>, %arg7: memref<1x128xf32, #tpu.memory_space<vmem>>, %arg8: memref<3x128x128xf32, #tpu.memory_space<vmem>>, %arg9: memref<3x1x128xf32, #tpu.memory_space<vmem>>, %arg10: memref<1x128xf32, #tpu.memory_space<vmem>>, %arg11: memref<1x128xf32, #tpu.memory_space<vmem>>, %arg12: memref<16x128xf32, #tpu.memory_space<vmem>>) attributes {dimension_semantics = [#tpu.dimension_semantics<parallel>], iteration_bounds = array<i64: 1>, scalar_prefetch = 0 : i64, scratch_operands = 0 : i64, tpu.core_type = #tpu.core_type<tc>, window_params = [{transform_indices = @transform_0, window_bounds = array<i64: 16, 128>}, {pipeline_mode = #tpu.pipeline_mode<synchronous>, transform_indices = @transform_1, window_bounds = array<i64: 3, 128, 128>}, {pipeline_mode = #tpu.pipeline_mode<synchronous>, transform_indices = @transform_2, window_bounds = array<i64: 3, 1, 128>}, {pipeline_mode = #tpu.pipeline_mode<synchronous>, transform_indices = @transform_3, window_bounds = array<i64: 1, 128>}, {pipeline_mode = #tpu.pipeline_mode<synchronous>, transform_indices = @transform_4, window_bounds = array<i64: 1, 128>}, {pipeline_mode = #tpu.pipeline_mode<synchronous>, transform_indices = @transform_5, window_bounds = array<i64: 128, 128>}, {pipeline_mode = #tpu.pipeline_mode<synchronous>, transform_indices = @transform_6, window_bounds = array<i64: 1, 128>}, {pipeline_mode = #tpu.pipeline_mode<synchronous>, transform_indices = @transform_7, window_bounds = array<i64: 3, 128, 128>}, {pipeline_mode = #tpu.pipeline_mode<synchronous>, transform_indices = @transform_8, window_bounds = array<i64: 3, 1, 128>}, {pipeline_mode = #tpu.pipeline_mode<synchronous>, transform_indices = @transform_9, window_bounds = array<i64: 1, 128>}, {pipeline_mode = #tpu.pipeline_mode<synchronous>, transform_indices = @transform_10, window_bounds = array<i64: 1, 128>}, {transform_indices = @transform_11, window_bounds = array<i64: 16, 128>}]} {
    %c0 = arith.constant 0 : index
    %c0_0 = arith.constant 0 : index
    %0 = vector.load %arg1[%c0, %c0_0] : memref<16x128xf32, #tpu.memory_space<vmem>>, vector<16x128xf32>
    %c0_1 = arith.constant 0 : index
    %c0_2 = arith.constant 0 : index
    %1 = vector.load %arg4[%c0_1, %c0_2] : memref<1x128xf32, #tpu.memory_space<vmem>>, vector<1x128xf32>
    %c0_3 = arith.constant 0 : index
    %c0_4 = arith.constant 0 : index
    %2 = vector.load %arg5[%c0_3, %c0_4] : memref<1x128xf32, #tpu.memory_space<vmem>>, vector<1x128xf32>
    %c0_5 = arith.constant 0 : index
    %c0_6 = arith.constant 0 : index
    %3 = vector.load %arg10[%c0_5, %c0_6] : memref<1x128xf32, #tpu.memory_space<vmem>>, vector<1x128xf32>
    %c0_7 = arith.constant 0 : index
    %c0_8 = arith.constant 0 : index
    %4 = vector.load %arg11[%c0_7, %c0_8] : memref<1x128xf32, #tpu.memory_space<vmem>>, vector<1x128xf32>
    %cst = arith.constant 0.000000e+00 : f32
    %5 = vector.broadcast %cst : f32 to vector<16x128xf32>
    %6 = arith.addf %5, %0 : vector<16x128xf32>
    %c0_9 = arith.constant 0 : index
    %c0_10 = arith.constant 0 : index
    %c0_11 = arith.constant 0 : index
    %7 = vector.load %arg2[%c0_9, %c0_10, %c0_11] : memref<3x128x128xf32, #tpu.memory_space<vmem>>, vector<1x128x128xf32>
    %8 = vector.shape_cast %7 : vector<1x128x128xf32> to vector<128x128xf32>
    %cst_12 = arith.constant dense<0.000000e+00> : vector<16x128xf32>
    %9 = tpu.matmul %0, %8, %cst_12 {dimension_numbers = #tpu.dot_dimension_numbers<[1], [0], [0], [1], [0, 0, 1, 1], [], []>} : vector<16x128xf32>, vector<128x128xf32>, vector<16x128xf32> -> vector<16x128xf32>
    %c0_13 = arith.constant 0 : index
    %c0_14 = arith.constant 0 : index
    %c0_15 = arith.constant 0 : index
    %10 = vector.load %arg3[%c0_13, %c0_14, %c0_15] : memref<3x1x128xf32, #tpu.memory_space<vmem>>, vector<1x1x128xf32>
    %11 = vector.shape_cast %10 : vector<1x1x128xf32> to vector<1x128xf32>
    %12 = vector.broadcast %11 : vector<1x128xf32> to vector<16x128xf32>
    %13 = arith.addf %9, %12 : vector<16x128xf32>
    %cst_16 = arith.constant 0.000000e+00 : f32
    %14 = vector.broadcast %cst_16 : f32 to vector<16x128xf32>
    %15 = arith.maximumf %13, %14 : vector<16x128xf32>
    %16 = arith.addf %15, %6 : vector<16x128xf32>
    %cst_17 = arith.constant dense<0.000000e+00> : vector<16xf32>
    %17 = vector.multi_reduction <add>, %16, %cst_17 [1] : vector<16x128xf32> to vector<16xf32>
    %18 = vector.shape_cast %17 : vector<16xf32> to vector<16x1xf32>
    %cst_18 = arith.constant 3.125000e-02 : f32
    %19 = vector.broadcast %cst_18 : f32 to vector<16x1xf32>
    %20 = arith.mulf %18, %19 : vector<16x1xf32>
    %21 = tpu.iota {dimensions = array<i32: 1>} : vector<1x128xi32>
    %c32_i32 = arith.constant 32 : i32
    %22 = vector.broadcast %c32_i32 : i32 to vector<1x128xi32>
    %23 = arith.cmpi slt, %21, %22 : vector<1x128xi32>
    %24 = arith.extui %23 : vector<1x128xi1> to vector<1x128xi32>
    %25 = arith.sitofp %24 : vector<1x128xi32> to vector<1x128xf32>
    %26 = vector.broadcast %20 : vector<16x1xf32> to vector<16x128xf32>
    %27 = vector.broadcast %25 : vector<1x128xf32> to vector<16x128xf32>
    %28 = arith.mulf %26, %27 : vector<16x128xf32>
    %29 = arith.subf %16, %28 : vector<16x128xf32>
    %30 = arith.mulf %29, %29 : vector<16x128xf32>
    %cst_19 = arith.constant dense<0.000000e+00> : vector<16xf32>
    %31 = vector.multi_reduction <add>, %30, %cst_19 [1] : vector<16x128xf32> to vector<16xf32>
    %32 = vector.shape_cast %31 : vector<16xf32> to vector<16x1xf32>
    %cst_20 = arith.constant 3.125000e-02 : f32
    %33 = vector.broadcast %cst_20 : f32 to vector<16x1xf32>
    %34 = arith.mulf %32, %33 : vector<16x1xf32>
    %cst_21 = arith.constant 0.000000e+00 : f32
    %35 = vector.broadcast %cst_21 : f32 to vector<16x1xf32>
    %36 = arith.maximumf %34, %35 : vector<16x1xf32>
    %cst_22 = arith.constant 9.99999974E-6 : f32
    %37 = vector.broadcast %cst_22 : f32 to vector<16x1xf32>
    %38 = arith.addf %36, %37 : vector<16x1xf32>
    %39 = math.rsqrt %38 : vector<16x1xf32>
    %40 = vector.broadcast %39 : vector<16x1xf32> to vector<16x128xf32>
    %41 = arith.mulf %29, %40 : vector<16x128xf32>
    %42 = vector.broadcast %1 : vector<1x128xf32> to vector<16x128xf32>
    %43 = arith.mulf %41, %42 : vector<16x128xf32>
    %44 = vector.broadcast %2 : vector<1x128xf32> to vector<16x128xf32>
    %45 = arith.addf %43, %44 : vector<16x128xf32>
    %46 = arith.addf %6, %45 : vector<16x128xf32>
    %c1 = arith.constant 1 : index
    %c0_23 = arith.constant 0 : index
    %c0_24 = arith.constant 0 : index
    %47 = vector.load %arg2[%c1, %c0_23, %c0_24] : memref<3x128x128xf32, #tpu.memory_space<vmem>>, vector<1x128x128xf32>
    %48 = vector.shape_cast %47 : vector<1x128x128xf32> to vector<128x128xf32>
    %cst_25 = arith.constant dense<0.000000e+00> : vector<16x128xf32>
    %49 = tpu.matmul %45, %48, %cst_25 {dimension_numbers = #tpu.dot_dimension_numbers<[1], [0], [0], [1], [0, 0, 1, 1], [], []>} : vector<16x128xf32>, vector<128x128xf32>, vector<16x128xf32> -> vector<16x128xf32>
    %c1_26 = arith.constant 1 : index
    %c0_27 = arith.constant 0 : index
    %c0_28 = arith.constant 0 : index
    %50 = vector.load %arg3[%c1_26, %c0_27, %c0_28] : memref<3x1x128xf32, #tpu.memory_space<vmem>>, vector<1x1x128xf32>
    %51 = vector.shape_cast %50 : vector<1x1x128xf32> to vector<1x128xf32>
    %52 = vector.broadcast %51 : vector<1x128xf32> to vector<16x128xf32>
    %53 = arith.addf %49, %52 : vector<16x128xf32>
    %cst_29 = arith.constant 0.000000e+00 : f32
    %54 = vector.broadcast %cst_29 : f32 to vector<16x128xf32>
    %55 = arith.maximumf %53, %54 : vector<16x128xf32>
    %56 = arith.addf %55, %46 : vector<16x128xf32>
    %cst_30 = arith.constant dense<0.000000e+00> : vector<16xf32>
    %57 = vector.multi_reduction <add>, %56, %cst_30 [1] : vector<16x128xf32> to vector<16xf32>
    %58 = vector.shape_cast %57 : vector<16xf32> to vector<16x1xf32>
    %cst_31 = arith.constant 3.125000e-02 : f32
    %59 = vector.broadcast %cst_31 : f32 to vector<16x1xf32>
    %60 = arith.mulf %58, %59 : vector<16x1xf32>
    %61 = tpu.iota {dimensions = array<i32: 1>} : vector<1x128xi32>
    %c32_i32_32 = arith.constant 32 : i32
    %62 = vector.broadcast %c32_i32_32 : i32 to vector<1x128xi32>
    %63 = arith.cmpi slt, %61, %62 : vector<1x128xi32>
    %64 = arith.extui %63 : vector<1x128xi1> to vector<1x128xi32>
    %65 = arith.sitofp %64 : vector<1x128xi32> to vector<1x128xf32>
    %66 = vector.broadcast %60 : vector<16x1xf32> to vector<16x128xf32>
    %67 = vector.broadcast %65 : vector<1x128xf32> to vector<16x128xf32>
    %68 = arith.mulf %66, %67 : vector<16x128xf32>
    %69 = arith.subf %56, %68 : vector<16x128xf32>
    %70 = arith.mulf %69, %69 : vector<16x128xf32>
    %cst_33 = arith.constant dense<0.000000e+00> : vector<16xf32>
    %71 = vector.multi_reduction <add>, %70, %cst_33 [1] : vector<16x128xf32> to vector<16xf32>
    %72 = vector.shape_cast %71 : vector<16xf32> to vector<16x1xf32>
    %cst_34 = arith.constant 3.125000e-02 : f32
    %73 = vector.broadcast %cst_34 : f32 to vector<16x1xf32>
    %74 = arith.mulf %72, %73 : vector<16x1xf32>
    %cst_35 = arith.constant 0.000000e+00 : f32
    %75 = vector.broadcast %cst_35 : f32 to vector<16x1xf32>
    %76 = arith.maximumf %74, %75 : vector<16x1xf32>
    %cst_36 = arith.constant 9.99999974E-6 : f32
    %77 = vector.broadcast %cst_36 : f32 to vector<16x1xf32>
    %78 = arith.addf %76, %77 : vector<16x1xf32>
    %79 = math.rsqrt %78 : vector<16x1xf32>
    %80 = vector.broadcast %79 : vector<16x1xf32> to vector<16x128xf32>
    %81 = arith.mulf %69, %80 : vector<16x128xf32>
    %82 = vector.broadcast %1 : vector<1x128xf32> to vector<16x128xf32>
    %83 = arith.mulf %81, %82 : vector<16x128xf32>
    %84 = vector.broadcast %2 : vector<1x128xf32> to vector<16x128xf32>
    %85 = arith.addf %83, %84 : vector<16x128xf32>
    %86 = arith.addf %46, %85 : vector<16x128xf32>
    %c2 = arith.constant 2 : index
    %c0_37 = arith.constant 0 : index
    %c0_38 = arith.constant 0 : index
    %87 = vector.load %arg2[%c2, %c0_37, %c0_38] : memref<3x128x128xf32, #tpu.memory_space<vmem>>, vector<1x128x128xf32>
    %88 = vector.shape_cast %87 : vector<1x128x128xf32> to vector<128x128xf32>
    %cst_39 = arith.constant dense<0.000000e+00> : vector<16x128xf32>
    %89 = tpu.matmul %85, %88, %cst_39 {dimension_numbers = #tpu.dot_dimension_numbers<[1], [0], [0], [1], [0, 0, 1, 1], [], []>} : vector<16x128xf32>, vector<128x128xf32>, vector<16x128xf32> -> vector<16x128xf32>
    %c2_40 = arith.constant 2 : index
    %c0_41 = arith.constant 0 : index
    %c0_42 = arith.constant 0 : index
    %90 = vector.load %arg3[%c2_40, %c0_41, %c0_42] : memref<3x1x128xf32, #tpu.memory_space<vmem>>, vector<1x1x128xf32>
    %91 = vector.shape_cast %90 : vector<1x1x128xf32> to vector<1x128xf32>
    %92 = vector.broadcast %91 : vector<1x128xf32> to vector<16x128xf32>
    %93 = arith.addf %89, %92 : vector<16x128xf32>
    %cst_43 = arith.constant 0.000000e+00 : f32
    %94 = vector.broadcast %cst_43 : f32 to vector<16x128xf32>
    %95 = arith.maximumf %93, %94 : vector<16x128xf32>
    %96 = arith.addf %95, %86 : vector<16x128xf32>
    %cst_44 = arith.constant dense<0.000000e+00> : vector<16xf32>
    %97 = vector.multi_reduction <add>, %96, %cst_44 [1] : vector<16x128xf32> to vector<16xf32>
    %98 = vector.shape_cast %97 : vector<16xf32> to vector<16x1xf32>
    %cst_45 = arith.constant 3.125000e-02 : f32
    %99 = vector.broadcast %cst_45 : f32 to vector<16x1xf32>
    %100 = arith.mulf %98, %99 : vector<16x1xf32>
    %101 = tpu.iota {dimensions = array<i32: 1>} : vector<1x128xi32>
    %c32_i32_46 = arith.constant 32 : i32
    %102 = vector.broadcast %c32_i32_46 : i32 to vector<1x128xi32>
    %103 = arith.cmpi slt, %101, %102 : vector<1x128xi32>
    %104 = arith.extui %103 : vector<1x128xi1> to vector<1x128xi32>
    %105 = arith.sitofp %104 : vector<1x128xi32> to vector<1x128xf32>
    %106 = vector.broadcast %100 : vector<16x1xf32> to vector<16x128xf32>
    %107 = vector.broadcast %105 : vector<1x128xf32> to vector<16x128xf32>
    %108 = arith.mulf %106, %107 : vector<16x128xf32>
    %109 = arith.subf %96, %108 : vector<16x128xf32>
    %110 = arith.mulf %109, %109 : vector<16x128xf32>
    %cst_47 = arith.constant dense<0.000000e+00> : vector<16xf32>
    %111 = vector.multi_reduction <add>, %110, %cst_47 [1] : vector<16x128xf32> to vector<16xf32>
    %112 = vector.shape_cast %111 : vector<16xf32> to vector<16x1xf32>
    %cst_48 = arith.constant 3.125000e-02 : f32
    %113 = vector.broadcast %cst_48 : f32 to vector<16x1xf32>
    %114 = arith.mulf %112, %113 : vector<16x1xf32>
    %cst_49 = arith.constant 0.000000e+00 : f32
    %115 = vector.broadcast %cst_49 : f32 to vector<16x1xf32>
    %116 = arith.maximumf %114, %115 : vector<16x1xf32>
    %cst_50 = arith.constant 9.99999974E-6 : f32
    %117 = vector.broadcast %cst_50 : f32 to vector<16x1xf32>
    %118 = arith.addf %116, %117 : vector<16x1xf32>
    %119 = math.rsqrt %118 : vector<16x1xf32>
    %120 = vector.broadcast %119 : vector<16x1xf32> to vector<16x128xf32>
    %121 = arith.mulf %109, %120 : vector<16x128xf32>
    %122 = vector.broadcast %1 : vector<1x128xf32> to vector<16x128xf32>
    %123 = arith.mulf %121, %122 : vector<16x128xf32>
    %124 = vector.broadcast %2 : vector<1x128xf32> to vector<16x128xf32>
    %125 = arith.addf %123, %124 : vector<16x128xf32>
    %c0_51 = arith.constant 0 : index
    %c0_52 = arith.constant 0 : index
    %126 = vector.load %arg6[%c0_51, %c0_52] : memref<128x128xf32, #tpu.memory_space<vmem>>, vector<128x128xf32>
    %cst_53 = arith.constant dense<0.000000e+00> : vector<16x128xf32>
    %127 = tpu.matmul %125, %126, %cst_53 {dimension_numbers = #tpu.dot_dimension_numbers<[1], [0], [0], [1], [0, 0, 1, 1], [], []>} : vector<16x128xf32>, vector<128x128xf32>, vector<16x128xf32> -> vector<16x128xf32>
    %c0_54 = arith.constant 0 : index
    %c0_55 = arith.constant 0 : index
    %128 = vector.load %arg7[%c0_54, %c0_55] : memref<1x128xf32, #tpu.memory_space<vmem>>, vector<1x128xf32>
    %129 = vector.broadcast %128 : vector<1x128xf32> to vector<16x128xf32>
    %130 = arith.addf %127, %129 : vector<16x128xf32>
    %cst_56 = arith.constant 0.000000e+00 : f32
    %131 = vector.broadcast %cst_56 : f32 to vector<16x128xf32>
    %132 = arith.maximumf %130, %131 : vector<16x128xf32>
    %cst_57 = arith.constant 0.000000e+00 : f32
    %133 = vector.broadcast %cst_57 : f32 to vector<16x128xf32>
    %134 = arith.addf %133, %132 : vector<16x128xf32>
    %c0_58 = arith.constant 0 : index
    %c0_59 = arith.constant 0 : index
    %c0_60 = arith.constant 0 : index
    %135 = vector.load %arg8[%c0_58, %c0_59, %c0_60] : memref<3x128x128xf32, #tpu.memory_space<vmem>>, vector<1x128x128xf32>
    %136 = vector.shape_cast %135 : vector<1x128x128xf32> to vector<128x128xf32>
    %cst_61 = arith.constant dense<0.000000e+00> : vector<16x128xf32>
    %137 = tpu.matmul %132, %136, %cst_61 {dimension_numbers = #tpu.dot_dimension_numbers<[1], [0], [0], [1], [0, 0, 1, 1], [], []>} : vector<16x128xf32>, vector<128x128xf32>, vector<16x128xf32> -> vector<16x128xf32>
    %c0_62 = arith.constant 0 : index
    %c0_63 = arith.constant 0 : index
    %c0_64 = arith.constant 0 : index
    %138 = vector.load %arg9[%c0_62, %c0_63, %c0_64] : memref<3x1x128xf32, #tpu.memory_space<vmem>>, vector<1x1x128xf32>
    %139 = vector.shape_cast %138 : vector<1x1x128xf32> to vector<1x128xf32>
    %140 = vector.broadcast %139 : vector<1x128xf32> to vector<16x128xf32>
    %141 = arith.addf %137, %140 : vector<16x128xf32>
    %cst_65 = arith.constant 0.000000e+00 : f32
    %142 = vector.broadcast %cst_65 : f32 to vector<16x128xf32>
    %143 = arith.maximumf %141, %142 : vector<16x128xf32>
    %144 = arith.addf %143, %134 : vector<16x128xf32>
    %cst_66 = arith.constant dense<0.000000e+00> : vector<16xf32>
    %145 = vector.multi_reduction <add>, %144, %cst_66 [1] : vector<16x128xf32> to vector<16xf32>
    %146 = vector.shape_cast %145 : vector<16xf32> to vector<16x1xf32>
    %cst_67 = arith.constant 1.562500e-02 : f32
    %147 = vector.broadcast %cst_67 : f32 to vector<16x1xf32>
    %148 = arith.mulf %146, %147 : vector<16x1xf32>
    %149 = tpu.iota {dimensions = array<i32: 1>} : vector<1x128xi32>
    %c64_i32 = arith.constant 64 : i32
    %150 = vector.broadcast %c64_i32 : i32 to vector<1x128xi32>
    %151 = arith.cmpi slt, %149, %150 : vector<1x128xi32>
    %152 = arith.extui %151 : vector<1x128xi1> to vector<1x128xi32>
    %153 = arith.sitofp %152 : vector<1x128xi32> to vector<1x128xf32>
    %154 = vector.broadcast %148 : vector<16x1xf32> to vector<16x128xf32>
    %155 = vector.broadcast %153 : vector<1x128xf32> to vector<16x128xf32>
    %156 = arith.mulf %154, %155 : vector<16x128xf32>
    %157 = arith.subf %144, %156 : vector<16x128xf32>
    %158 = arith.mulf %157, %157 : vector<16x128xf32>
    %cst_68 = arith.constant dense<0.000000e+00> : vector<16xf32>
    %159 = vector.multi_reduction <add>, %158, %cst_68 [1] : vector<16x128xf32> to vector<16xf32>
    %160 = vector.shape_cast %159 : vector<16xf32> to vector<16x1xf32>
    %cst_69 = arith.constant 1.562500e-02 : f32
    %161 = vector.broadcast %cst_69 : f32 to vector<16x1xf32>
    %162 = arith.mulf %160, %161 : vector<16x1xf32>
    %cst_70 = arith.constant 0.000000e+00 : f32
    %163 = vector.broadcast %cst_70 : f32 to vector<16x1xf32>
    %164 = arith.maximumf %162, %163 : vector<16x1xf32>
    %cst_71 = arith.constant 9.99999974E-6 : f32
    %165 = vector.broadcast %cst_71 : f32 to vector<16x1xf32>
    %166 = arith.addf %164, %165 : vector<16x1xf32>
    %167 = math.rsqrt %166 : vector<16x1xf32>
    %168 = vector.broadcast %167 : vector<16x1xf32> to vector<16x128xf32>
    %169 = arith.mulf %157, %168 : vector<16x128xf32>
    %170 = vector.broadcast %3 : vector<1x128xf32> to vector<16x128xf32>
    %171 = arith.mulf %169, %170 : vector<16x128xf32>
    %172 = vector.broadcast %4 : vector<1x128xf32> to vector<16x128xf32>
    %173 = arith.addf %171, %172 : vector<16x128xf32>
    %174 = arith.addf %134, %173 : vector<16x128xf32>
    %c1_72 = arith.constant 1 : index
    %c0_73 = arith.constant 0 : index
    %c0_74 = arith.constant 0 : index
    %175 = vector.load %arg8[%c1_72, %c0_73, %c0_74] : memref<3x128x128xf32, #tpu.memory_space<vmem>>, vector<1x128x128xf32>
    %176 = vector.shape_cast %175 : vector<1x128x128xf32> to vector<128x128xf32>
    %cst_75 = arith.constant dense<0.000000e+00> : vector<16x128xf32>
    %177 = tpu.matmul %173, %176, %cst_75 {dimension_numbers = #tpu.dot_dimension_numbers<[1], [0], [0], [1], [0, 0, 1, 1], [], []>} : vector<16x128xf32>, vector<128x128xf32>, vector<16x128xf32> -> vector<16x128xf32>
    %c1_76 = arith.constant 1 : index
    %c0_77 = arith.constant 0 : index
    %c0_78 = arith.constant 0 : index
    %178 = vector.load %arg9[%c1_76, %c0_77, %c0_78] : memref<3x1x128xf32, #tpu.memory_space<vmem>>, vector<1x1x128xf32>
    %179 = vector.shape_cast %178 : vector<1x1x128xf32> to vector<1x128xf32>
    %180 = vector.broadcast %179 : vector<1x128xf32> to vector<16x128xf32>
    %181 = arith.addf %177, %180 : vector<16x128xf32>
    %cst_79 = arith.constant 0.000000e+00 : f32
    %182 = vector.broadcast %cst_79 : f32 to vector<16x128xf32>
    %183 = arith.maximumf %181, %182 : vector<16x128xf32>
    %184 = arith.addf %183, %174 : vector<16x128xf32>
    %cst_80 = arith.constant dense<0.000000e+00> : vector<16xf32>
    %185 = vector.multi_reduction <add>, %184, %cst_80 [1] : vector<16x128xf32> to vector<16xf32>
    %186 = vector.shape_cast %185 : vector<16xf32> to vector<16x1xf32>
    %cst_81 = arith.constant 1.562500e-02 : f32
    %187 = vector.broadcast %cst_81 : f32 to vector<16x1xf32>
    %188 = arith.mulf %186, %187 : vector<16x1xf32>
    %189 = tpu.iota {dimensions = array<i32: 1>} : vector<1x128xi32>
    %c64_i32_82 = arith.constant 64 : i32
    %190 = vector.broadcast %c64_i32_82 : i32 to vector<1x128xi32>
    %191 = arith.cmpi slt, %189, %190 : vector<1x128xi32>
    %192 = arith.extui %191 : vector<1x128xi1> to vector<1x128xi32>
    %193 = arith.sitofp %192 : vector<1x128xi32> to vector<1x128xf32>
    %194 = vector.broadcast %188 : vector<16x1xf32> to vector<16x128xf32>
    %195 = vector.broadcast %193 : vector<1x128xf32> to vector<16x128xf32>
    %196 = arith.mulf %194, %195 : vector<16x128xf32>
    %197 = arith.subf %184, %196 : vector<16x128xf32>
    %198 = arith.mulf %197, %197 : vector<16x128xf32>
    %cst_83 = arith.constant dense<0.000000e+00> : vector<16xf32>
    %199 = vector.multi_reduction <add>, %198, %cst_83 [1] : vector<16x128xf32> to vector<16xf32>
    %200 = vector.shape_cast %199 : vector<16xf32> to vector<16x1xf32>
    %cst_84 = arith.constant 1.562500e-02 : f32
    %201 = vector.broadcast %cst_84 : f32 to vector<16x1xf32>
    %202 = arith.mulf %200, %201 : vector<16x1xf32>
    %cst_85 = arith.constant 0.000000e+00 : f32
    %203 = vector.broadcast %cst_85 : f32 to vector<16x1xf32>
    %204 = arith.maximumf %202, %203 : vector<16x1xf32>
    %cst_86 = arith.constant 9.99999974E-6 : f32
    %205 = vector.broadcast %cst_86 : f32 to vector<16x1xf32>
    %206 = arith.addf %204, %205 : vector<16x1xf32>
    %207 = math.rsqrt %206 : vector<16x1xf32>
    %208 = vector.broadcast %207 : vector<16x1xf32> to vector<16x128xf32>
    %209 = arith.mulf %197, %208 : vector<16x128xf32>
    %210 = vector.broadcast %3 : vector<1x128xf32> to vector<16x128xf32>
    %211 = arith.mulf %209, %210 : vector<16x128xf32>
    %212 = vector.broadcast %4 : vector<1x128xf32> to vector<16x128xf32>
    %213 = arith.addf %211, %212 : vector<16x128xf32>
    %214 = arith.addf %174, %213 : vector<16x128xf32>
    %c2_87 = arith.constant 2 : index
    %c0_88 = arith.constant 0 : index
    %c0_89 = arith.constant 0 : index
    %215 = vector.load %arg8[%c2_87, %c0_88, %c0_89] : memref<3x128x128xf32, #tpu.memory_space<vmem>>, vector<1x128x128xf32>
    %216 = vector.shape_cast %215 : vector<1x128x128xf32> to vector<128x128xf32>
    %cst_90 = arith.constant dense<0.000000e+00> : vector<16x128xf32>
    %217 = tpu.matmul %213, %216, %cst_90 {dimension_numbers = #tpu.dot_dimension_numbers<[1], [0], [0], [1], [0, 0, 1, 1], [], []>} : vector<16x128xf32>, vector<128x128xf32>, vector<16x128xf32> -> vector<16x128xf32>
    %c2_91 = arith.constant 2 : index
    %c0_92 = arith.constant 0 : index
    %c0_93 = arith.constant 0 : index
    %218 = vector.load %arg9[%c2_91, %c0_92, %c0_93] : memref<3x1x128xf32, #tpu.memory_space<vmem>>, vector<1x1x128xf32>
    %219 = vector.shape_cast %218 : vector<1x1x128xf32> to vector<1x128xf32>
    %220 = vector.broadcast %219 : vector<1x128xf32> to vector<16x128xf32>
    %221 = arith.addf %217, %220 : vector<16x128xf32>
    %cst_94 = arith.constant 0.000000e+00 : f32
    %222 = vector.broadcast %cst_94 : f32 to vector<16x128xf32>
    %223 = arith.maximumf %221, %222 : vector<16x128xf32>
    %224 = arith.addf %223, %214 : vector<16x128xf32>
    %cst_95 = arith.constant dense<0.000000e+00> : vector<16xf32>
    %225 = vector.multi_reduction <add>, %224, %cst_95 [1] : vector<16x128xf32> to vector<16xf32>
    %226 = vector.shape_cast %225 : vector<16xf32> to vector<16x1xf32>
    %cst_96 = arith.constant 1.562500e-02 : f32
    %227 = vector.broadcast %cst_96 : f32 to vector<16x1xf32>
    %228 = arith.mulf %226, %227 : vector<16x1xf32>
    %229 = tpu.iota {dimensions = array<i32: 1>} : vector<1x128xi32>
    %c64_i32_97 = arith.constant 64 : i32
    %230 = vector.broadcast %c64_i32_97 : i32 to vector<1x128xi32>
    %231 = arith.cmpi slt, %229, %230 : vector<1x128xi32>
    %232 = arith.extui %231 : vector<1x128xi1> to vector<1x128xi32>
    %233 = arith.sitofp %232 : vector<1x128xi32> to vector<1x128xf32>
    %234 = vector.broadcast %228 : vector<16x1xf32> to vector<16x128xf32>
    %235 = vector.broadcast %233 : vector<1x128xf32> to vector<16x128xf32>
    %236 = arith.mulf %234, %235 : vector<16x128xf32>
    %237 = arith.subf %224, %236 : vector<16x128xf32>
    %238 = arith.mulf %237, %237 : vector<16x128xf32>
    %cst_98 = arith.constant dense<0.000000e+00> : vector<16xf32>
    %239 = vector.multi_reduction <add>, %238, %cst_98 [1] : vector<16x128xf32> to vector<16xf32>
    %240 = vector.shape_cast %239 : vector<16xf32> to vector<16x1xf32>
    %cst_99 = arith.constant 1.562500e-02 : f32
    %241 = vector.broadcast %cst_99 : f32 to vector<16x1xf32>
    %242 = arith.mulf %240, %241 : vector<16x1xf32>
    %cst_100 = arith.constant 0.000000e+00 : f32
    %243 = vector.broadcast %cst_100 : f32 to vector<16x1xf32>
    %244 = arith.maximumf %242, %243 : vector<16x1xf32>
    %cst_101 = arith.constant 9.99999974E-6 : f32
    %245 = vector.broadcast %cst_101 : f32 to vector<16x1xf32>
    %246 = arith.addf %244, %245 : vector<16x1xf32>
    %247 = math.rsqrt %246 : vector<16x1xf32>
    %248 = vector.broadcast %247 : vector<16x1xf32> to vector<16x128xf32>
    %249 = arith.mulf %237, %248 : vector<16x128xf32>
    %250 = vector.broadcast %3 : vector<1x128xf32> to vector<16x128xf32>
    %251 = arith.mulf %249, %250 : vector<16x128xf32>
    %252 = vector.broadcast %4 : vector<1x128xf32> to vector<16x128xf32>
    %253 = arith.addf %251, %252 : vector<16x128xf32>
    %c0_102 = arith.constant 0 : index
    %c0_103 = arith.constant 0 : index
    %254 = vector.load %arg12[%c0_102, %c0_103] : memref<16x128xf32, #tpu.memory_space<vmem>>, vector<16x128xf32>
    tpu.vector_store %arg12[%c0_102, %c0_103], %253 {strides = array<i32>} : memref<16x128xf32, #tpu.memory_space<vmem>>, vector<16x128xf32>,
    return
  }
  func.func @transform_0(%arg0: i32) -> (i32, i32) {
    %c0_i32 = arith.constant 0 : i32
    %c0_i32_0 = arith.constant 0 : i32
    return %arg0, %c0_i32 : i32, i32
  }
  func.func @transform_1(%arg0: i32) -> (i32, i32, i32) {
    %c0_i32 = arith.constant 0 : i32
    %c0_i32_0 = arith.constant 0 : i32
    %c0_i32_1 = arith.constant 0 : i32
    %c0_i32_2 = arith.constant 0 : i32
    return %c0_i32, %c0_i32_0, %c0_i32_1 : i32, i32, i32
  }
  func.func @transform_2(%arg0: i32) -> (i32, i32, i32) {
    %c0_i32 = arith.constant 0 : i32
    %c0_i32_0 = arith.constant 0 : i32
    %c0_i32_1 = arith.constant 0 : i32
    %c0_i32_2 = arith.constant 0 : i32
    return %c0_i32, %c0_i32_0, %c0_i32_1 : i32, i32, i32
  }
  func.func @transform_3(%arg0: i32) -> (i32, i32) {
    %c0_i32 = arith.constant 0 : i32
    %c0_i32_0 = arith.constant 0 : i32
    %c0_i32_1 = arith.constant 0 : i32
    return %c0_i32, %c0_i32_0 : i32, i32
  }
  func.func @transform_4(%arg0: i32) -> (i32, i32) {
    %c0_i32 = arith.constant 0 : i32
    %c0_i32_0 = arith.constant 0 : i32
    %c0_i32_1 = arith.constant 0 : i32
    return %c0_i32, %c0_i32_0 : i32, i32
  }
  func.func @transform_5(%arg0: i32) -> (i32, i32) {
    %c0_i32 = arith.constant 0 : i32
    %c0_i32_0 = arith.constant 0 : i32
    %c0_i32_1 = arith.constant 0 : i32
    return %c0_i32, %c0_i32_0 : i32, i32
  }
  func.func @transform_6(%arg0: i32) -> (i32, i32) {
    %c0_i32 = arith.constant 0 : i32
    %c0_i32_0 = arith.constant 0 : i32
    %c0_i32_1 = arith.constant 0 : i32
    return %c0_i32, %c0_i32_0 : i32, i32
  }
  func.func @transform_7(%arg0: i32) -> (i32, i32, i32) {
    %c0_i32 = arith.constant 0 : i32
    %c0_i32_0 = arith.constant 0 : i32
    %c0_i32_1 = arith.constant 0 : i32
    %c0_i32_2 = arith.constant 0 : i32
    return %c0_i32, %c0_i32_0, %c0_i32_1 : i32, i32, i32
  }
  func.func @transform_8(%arg0: i32) -> (i32, i32, i32) {
    %c0_i32 = arith.constant 0 : i32
    %c0_i32_0 = arith.constant 0 : i32
    %c0_i32_1 = arith.constant 0 : i32
    %c0_i32_2 = arith.constant 0 : i32
    return %c0_i32, %c0_i32_0, %c0_i32_1 : i32, i32, i32
  }
  func.func @transform_9(%arg0: i32) -> (i32, i32) {
    %c0_i32 = arith.constant 0 : i32
    %c0_i32_0 = arith.constant 0 : i32
    %c0_i32_1 = arith.constant 0 : i32
    return %c0_i32, %c0_i32_0 : i32, i32
  }
  func.func @transform_10(%arg0: i32) -> (i32, i32) {
    %c0_i32 = arith.constant 0 : i32
    %c0_i32_0 = arith.constant 0 : i32
    %c0_i32_1 = arith.constant 0 : i32
    return %c0_i32, %c0_i32_0 : i32, i32
  }
  func.func @transform_11(%arg0: i32) -> (i32, i32) {
    %c0_i32 = arith.constant 0 : i32
    %c0_i32_0 = arith.constant 0 : i32
    return %arg0, %c0_i32 : i32, i32
  }
}

module attributes {stable_mosaic.version = 11 : i64} {
  func.func @_fused_kernel(%arg0: i32, %arg1: memref<16x128xf32, #tpu.memory_space<vmem>>, %arg2: memref<3x128x128xf32, #tpu.memory_space<vmem>>, %arg3: memref<3x1x128xf32, #tpu.memory_space<vmem>>, %arg4: memref<1x128xf32, #tpu.memory_space<vmem>>, %arg5: memref<1x128xf32, #tpu.memory_space<vmem>>, %arg6: memref<128x128xf32, #tpu.memory_space<vmem>>, %arg7: memref<1x128xf32, #tpu.memory_space<vmem>>, %arg8: memref<3x128x128xf32, #tpu.memory_space<vmem>>, %arg9: memref<3x1x128xf32, #tpu.memory_space<vmem>>, %arg10: memref<1x128xf32, #tpu.memory_space<vmem>>, %arg11: memref<1x128xf32, #tpu.memory_space<vmem>>, %arg12: memref<16x128xf32, #tpu.memory_space<vmem>>) attributes {dimension_semantics = [#tpu.dimension_semantics<parallel>], iteration_bounds = array<i64: 1>, scalar_prefetch = 0 : i64, scratch_operands = 0 : i64, tpu.core_type = #tpu.core_type<tc>, window_params = [{transform_indices = @transform_0, window_bounds = array<i64: 16, 128>}, {pipeline_mode = #tpu.pipeline_mode<synchronous>, transform_indices = @transform_1, window_bounds = array<i64: 3, 128, 128>}, {pipeline_mode = #tpu.pipeline_mode<synchronous>, transform_indices = @transform_2, window_bounds = array<i64: 3, 1, 128>}, {pipeline_mode = #tpu.pipeline_mode<synchronous>, transform_indices = @transform_3, window_bounds = array<i64: 1, 128>}, {pipeline_mode = #tpu.pipeline_mode<synchronous>, transform_indices = @transform_4, window_bounds = array<i64: 1, 128>}, {pipeline_mode = #tpu.pipeline_mode<synchronous>, transform_indices = @transform_5, window_bounds = array<i64: 128, 128>}, {pipeline_mode = #tpu.pipeline_mode<synchronous>, transform_indices = @transform_6, window_bounds = array<i64: 1, 128>}, {pipeline_mode = #tpu.pipeline_mode<synchronous>, transform_indices = @transform_7, window_bounds = array<i64: 3, 128, 128>}, {pipeline_mode = #tpu.pipeline_mode<synchronous>, transform_indices = @transform_8, window_bounds = array<i64: 3, 1, 128>}, {pipeline_mode = #tpu.pipeline_mode<synchronous>, transform_indices = @transform_9, window_bounds = array<i64: 1, 128>}, {pipeline_mode = #tpu.pipeline_mode<synchronous>, transform_indices = @transform_10, window_bounds = array<i64: 1, 128>}, {transform_indices = @transform_11, window_bounds = array<i64: 16, 128>}]} {
    %c0 = arith.constant 0 : index
    %c0_0 = arith.constant 0 : index
    %0 = vector.load %arg1[%c0, %c0_0] : memref<16x128xf32, #tpu.memory_space<vmem>>, vector<16x128xf32>
    %c0_1 = arith.constant 0 : index
    %c0_2 = arith.constant 0 : index
    %1 = vector.load %arg4[%c0_1, %c0_2] : memref<1x128xf32, #tpu.memory_space<vmem>>, vector<1x128xf32>
    %c0_3 = arith.constant 0 : index
    %c0_4 = arith.constant 0 : index
    %2 = vector.load %arg5[%c0_3, %c0_4] : memref<1x128xf32, #tpu.memory_space<vmem>>, vector<1x128xf32>
    %c0_5 = arith.constant 0 : index
    %c0_6 = arith.constant 0 : index
    %3 = vector.load %arg10[%c0_5, %c0_6] : memref<1x128xf32, #tpu.memory_space<vmem>>, vector<1x128xf32>
    %c0_7 = arith.constant 0 : index
    %c0_8 = arith.constant 0 : index
    %4 = vector.load %arg11[%c0_7, %c0_8] : memref<1x128xf32, #tpu.memory_space<vmem>>, vector<1x128xf32>
    %cst = arith.constant 0.000000e+00 : f32
    %5 = vector.broadcast %cst : f32 to vector<16x128xf32>
    %6 = arith.addf %5, %0 : vector<16x128xf32>
    %c0_9 = arith.constant 0 : index
    %c0_10 = arith.constant 0 : index
    %c0_11 = arith.constant 0 : index
    %7 = vector.load %arg2[%c0_9, %c0_10, %c0_11] : memref<3x128x128xf32, #tpu.memory_space<vmem>>, vector<1x128x128xf32>
    %8 = vector.shape_cast %7 : vector<1x128x128xf32> to vector<128x128xf32>
    %cst_12 = arith.constant dense<0.000000e+00> : vector<16x128xf32>
    %9 = tpu.matmul %0, %8, %cst_12 {dimension_numbers = #tpu.dot_dimension_numbers<[1], [0], [0], [1], [0, 0, 1, 1], [], []>} : vector<16x128xf32>, vector<128x128xf32>, vector<16x128xf32> -> vector<16x128xf32>
    %c0_13 = arith.constant 0 : index
    %c0_14 = arith.constant 0 : index
    %c0_15 = arith.constant 0 : index
    %10 = vector.load %arg3[%c0_13, %c0_14, %c0_15] : memref<3x1x128xf32, #tpu.memory_space<vmem>>, vector<1x1x128xf32>
    %11 = vector.shape_cast %10 : vector<1x1x128xf32> to vector<1x128xf32>
    %12 = vector.broadcast %11 : vector<1x128xf32> to vector<16x128xf32>
    %13 = arith.addf %9, %12 : vector<16x128xf32>
    %cst_16 = arith.constant 0.000000e+00 : f32
    %14 = vector.broadcast %cst_16 : f32 to vector<16x128xf32>
    %15 = arith.maximumf %13, %14 : vector<16x128xf32>
    %16 = arith.addf %15, %6 : vector<16x128xf32>
    %cst_17 = arith.constant dense<0.000000e+00> : vector<16xf32>
    %17 = vector.multi_reduction <add>, %16, %cst_17 [1] : vector<16x128xf32> to vector<16xf32>
    %18 = vector.shape_cast %17 : vector<16xf32> to vector<16x1xf32>
    %cst_18 = arith.constant 3.125000e-02 : f32
    %19 = vector.broadcast %cst_18 : f32 to vector<16x1xf32>
    %20 = arith.mulf %18, %19 : vector<16x1xf32>
    %21 = tpu.iota {dimensions = array<i32: 1>} : vector<1x128xi32>
    %c32_i32 = arith.constant 32 : i32
    %22 = vector.broadcast %c32_i32 : i32 to vector<1x128xi32>
    %23 = arith.cmpi slt, %21, %22 : vector<1x128xi32>
    %24 = arith.extui %23 : vector<1x128xi1> to vector<1x128xi32>
    %25 = arith.sitofp %24 : vector<1x128xi32> to vector<1x128xf32>
    %26 = vector.broadcast %20 : vector<16x1xf32> to vector<16x128xf32>
    %27 = vector.broadcast %25 : vector<1x128xf32> to vector<16x128xf32>
    %28 = arith.mulf %26, %27 : vector<16x128xf32>
    %29 = arith.subf %16, %28 : vector<16x128xf32>
    %30 = arith.mulf %29, %29 : vector<16x128xf32>
    %cst_19 = arith.constant dense<0.000000e+00> : vector<16xf32>
    %31 = vector.multi_reduction <add>, %30, %cst_19 [1] : vector<16x128xf32> to vector<16xf32>
    %32 = vector.shape_cast %31 : vector<16xf32> to vector<16x1xf32>
    %cst_20 = arith.constant 3.125000e-02 : f32
    %33 = vector.broadcast %cst_20 : f32 to vector<16x1xf32>
    %34 = arith.mulf %32, %33 : vector<16x1xf32>
    %cst_21 = arith.constant 0.000000e+00 : f32
    %35 = vector.broadcast %cst_21 : f32 to vector<16x1xf32>
    %36 = arith.maximumf %34, %35 : vector<16x1xf32>
    %cst_22 = arith.constant 9.99999974E-6 : f32
    %37 = vector.broadcast %cst_22 : f32 to vector<16x1xf32>
    %38 = arith.addf %36, %37 : vector<16x1xf32>
    %39 = math.rsqrt %38 : vector<16x1xf32>
    %40 = vector.broadcast %39 : vector<16x1xf32> to vector<16x128xf32>
    %41 = arith.mulf %29, %40 : vector<16x128xf32>
    %42 = vector.broadcast %1 : vector<1x128xf32> to vector<16x128xf32>
    %43 = arith.mulf %41, %42 : vector<16x128xf32>
    %44 = vector.broadcast %2 : vector<1x128xf32> to vector<16x128xf32>
    %45 = arith.addf %43, %44 : vector<16x128xf32>
    %46 = arith.addf %6, %45 : vector<16x128xf32>
    %c1 = arith.constant 1 : index
    %c0_23 = arith.constant 0 : index
    %c0_24 = arith.constant 0 : index
    %47 = vector.load %arg2[%c1, %c0_23, %c0_24] : memref<3x128x128xf32, #tpu.memory_space<vmem>>, vector<1x128x128xf32>
    %48 = vector.shape_cast %47 : vector<1x128x128xf32> to vector<128x128xf32>
    %cst_25 = arith.constant dense<0.000000e+00> : vector<16x128xf32>
    %49 = tpu.matmul %45, %48, %cst_25 {dimension_numbers = #tpu.dot_dimension_numbers<[1], [0], [0], [1], [0, 0, 1, 1], [], []>} : vector<16x128xf32>, vector<128x128xf32>, vector<16x128xf32> -> vector<16x128xf32>
    %c1_26 = arith.constant 1 : index
    %c0_27 = arith.constant 0 : index
    %c0_28 = arith.constant 0 : index
    %50 = vector.load %arg3[%c1_26, %c0_27, %c0_28] : memref<3x1x128xf32, #tpu.memory_space<vmem>>, vector<1x1x128xf32>
    %51 = vector.shape_cast %50 : vector<1x1x128xf32> to vector<1x128xf32>
    %52 = vector.broadcast %51 : vector<1x128xf32> to vector<16x128xf32>
    %53 = arith.addf %49, %52 : vector<16x128xf32>
    %cst_29 = arith.constant 0.000000e+00 : f32
    %54 = vector.broadcast %cst_29 : f32 to vector<16x128xf32>
    %55 = arith.maximumf %53, %54 : vector<16x128xf32>
    %56 = arith.addf %55, %46 : vector<16x128xf32>
    %cst_30 = arith.constant dense<0.000000e+00> : vector<16xf32>
    %57 = vector.multi_reduction <add>, %56, %cst_30 [1] : vector<16x128xf32> to vector<16xf32>
    %58 = vector.shape_cast %57 : vector<16xf32> to vector<16x1xf32>
    %cst_31 = arith.constant 3.125000e-02 : f32
    %59 = vector.broadcast %cst_31 : f32 to vector<16x1xf32>
    %60 = arith.mulf %58, %59 : vector<16x1xf32>
    %61 = tpu.iota {dimensions = array<i32: 1>} : vector<1x128xi32>
    %c32_i32_32 = arith.constant 32 : i32
    %62 = vector.broadcast %c32_i32_32 : i32 to vector<1x128xi32>
    %63 = arith.cmpi slt, %61, %62 : vector<1x128xi32>
    %64 = arith.extui %63 : vector<1x128xi1> to vector<1x128xi32>
    %65 = arith.sitofp %64 : vector<1x128xi32> to vector<1x128xf32>
    %66 = vector.broadcast %60 : vector<16x1xf32> to vector<16x128xf32>
    %67 = vector.broadcast %65 : vector<1x128xf32> to vector<16x128xf32>
    %68 = arith.mulf %66, %67 : vector<16x128xf32>
    %69 = arith.subf %56, %68 : vector<16x128xf32>
    %70 = arith.mulf %69, %69 : vector<16x128xf32>
    %cst_33 = arith.constant dense<0.000000e+00> : vector<16xf32>
    %71 = vector.multi_reduction <add>, %70, %cst_33 [1] : vector<16x128xf32> to vector<16xf32>
    %72 = vector.shape_cast %71 : vector<16xf32> to vector<16x1xf32>
    %cst_34 = arith.constant 3.125000e-02 : f32
    %73 = vector.broadcast %cst_34 : f32 to vector<16x1xf32>
    %74 = arith.mulf %72, %73 : vector<16x1xf32>
    %cst_35 = arith.constant 0.000000e+00 : f32
    %75 = vector.broadcast %cst_35 : f32 to vector<16x1xf32>
    %76 = arith.maximumf %74, %75 : vector<16x1xf32>
    %cst_36 = arith.constant 9.99999974E-6 : f32
    %77 = vector.broadcast %cst_36 : f32 to vector<16x1xf32>
    %78 = arith.addf %76, %77 : vector<16x1xf32>
    %79 = math.rsqrt %78 : vector<16x1xf32>
    %80 = vector.broadcast %79 : vector<16x1xf32> to vector<16x128xf32>
    %81 = arith.mulf %69, %80 : vector<16x128xf32>
    %82 = vector.broadcast %1 : vector<1x128xf32> to vector<16x128xf32>
    %83 = arith.mulf %81, %82 : vector<16x128xf32>
    %84 = vector.broadcast %2 : vector<1x128xf32> to vector<16x128xf32>
    %85 = arith.addf %83, %84 : vector<16x128xf32>
    %86 = arith.addf %46, %85 : vector<16x128xf32>
    %c2 = arith.constant 2 : index
    %c0_37 = arith.constant 0 : index
    %c0_38 = arith.constant 0 : index
    %87 = vector.load %arg2[%c2, %c0_37, %c0_38] : memref<3x128x128xf32, #tpu.memory_space<vmem>>, vector<1x128x128xf32>
    %88 = vector.shape_cast %87 : vector<1x128x128xf32> to vector<128x128xf32>
    %cst_39 = arith.constant dense<0.000000e+00> : vector<16x128xf32>
    %89 = tpu.matmul %85, %88, %cst_39 {dimension_numbers = #tpu.dot_dimension_numbers<[1], [0], [0], [1], [0, 0, 1, 1], [], []>} : vector<16x128xf32>, vector<128x128xf32>, vector<16x128xf32> -> vector<16x128xf32>
    %c2_40 = arith.constant 2 : index
    %c0_41 = arith.constant 0 : index
    %c0_42 = arith.constant 0 : index
    %90 = vector.load %arg3[%c2_40, %c0_41, %c0_42] : memref<3x1x128xf32, #tpu.memory_space<vmem>>, vector<1x1x128xf32>
    %91 = vector.shape_cast %90 : vector<1x1x128xf32> to vector<1x128xf32>
    %92 = vector.broadcast %91 : vector<1x128xf32> to vector<16x128xf32>
    %93 = arith.addf %89, %92 : vector<16x128xf32>
    %cst_43 = arith.constant 0.000000e+00 : f32
    %94 = vector.broadcast %cst_43 : f32 to vector<16x128xf32>
    %95 = arith.maximumf %93, %94 : vector<16x128xf32>
    %96 = arith.addf %95, %86 : vector<16x128xf32>
    %cst_44 = arith.constant dense<0.000000e+00> : vector<16xf32>
    %97 = vector.multi_reduction <add>, %96, %cst_44 [1] : vector<16x128xf32> to vector<16xf32>
    %98 = vector.shape_cast %97 : vector<16xf32> to vector<16x1xf32>
    %cst_45 = arith.constant 3.125000e-02 : f32
    %99 = vector.broadcast %cst_45 : f32 to vector<16x1xf32>
    %100 = arith.mulf %98, %99 : vector<16x1xf32>
    %101 = tpu.iota {dimensions = array<i32: 1>} : vector<1x128xi32>
    %c32_i32_46 = arith.constant 32 : i32
    %102 = vector.broadcast %c32_i32_46 : i32 to vector<1x128xi32>
    %103 = arith.cmpi slt, %101, %102 : vector<1x128xi32>
    %104 = arith.extui %103 : vector<1x128xi1> to vector<1x128xi32>
    %105 = arith.sitofp %104 : vector<1x128xi32> to vector<1x128xf32>
    %106 = vector.broadcast %100 : vector<16x1xf32> to vector<16x128xf32>
    %107 = vector.broadcast %105 : vector<1x128xf32> to vector<16x128xf32>
    %108 = arith.mulf %106, %107 : vector<16x128xf32>
    %109 = arith.subf %96, %108 : vector<16x128xf32>
    %110 = arith.mulf %109, %109 : vector<16x128xf32>
    %cst_47 = arith.constant dense<0.000000e+00> : vector<16xf32>
    %111 = vector.multi_reduction <add>, %110, %cst_47 [1] : vector<16x128xf32> to vector<16xf32>
    %112 = vector.shape_cast %111 : vector<16xf32> to vector<16x1xf32>
    %cst_48 = arith.constant 3.125000e-02 : f32
    %113 = vector.broadcast %cst_48 : f32 to vector<16x1xf32>
    %114 = arith.mulf %112, %113 : vector<16x1xf32>
    %cst_49 = arith.constant 0.000000e+00 : f32
    %115 = vector.broadcast %cst_49 : f32 to vector<16x1xf32>
    %116 = arith.maximumf %114, %115 : vector<16x1xf32>
    %cst_50 = arith.constant 9.99999974E-6 : f32
    %117 = vector.broadcast %cst_50 : f32 to vector<16x1xf32>
    %118 = arith.addf %116, %117 : vector<16x1xf32>
    %119 = math.rsqrt %118 : vector<16x1xf32>
    %120 = vector.broadcast %119 : vector<16x1xf32> to vector<16x128xf32>
    %121 = arith.mulf %109, %120 : vector<16x128xf32>
    %122 = vector.broadcast %1 : vector<1x128xf32> to vector<16x128xf32>
    %123 = arith.mulf %121, %122 : vector<16x128xf32>
    %124 = vector.broadcast %2 : vector<1x128xf32> to vector<16x128xf32>
    %125 = arith.addf %123, %124 : vector<16x128xf32>
    %c0_51 = arith.constant 0 : index
    %c0_52 = arith.constant 0 : index
    %126 = vector.load %arg6[%c0_51, %c0_52] : memref<128x128xf32, #tpu.memory_space<vmem>>, vector<128x128xf32>
    %cst_53 = arith.constant dense<0.000000e+00> : vector<16x128xf32>
    %127 = tpu.matmul %125, %126, %cst_53 {dimension_numbers = #tpu.dot_dimension_numbers<[1], [0], [0], [1], [0, 0, 1, 1], [], []>} : vector<16x128xf32>, vector<128x128xf32>, vector<16x128xf32> -> vector<16x128xf32>
    %c0_54 = arith.constant 0 : index
    %c0_55 = arith.constant 0 : index
    %128 = vector.load %arg7[%c0_54, %c0_55] : memref<1x128xf32, #tpu.memory_space<vmem>>, vector<1x128xf32>
    %129 = vector.broadcast %128 : vector<1x128xf32> to vector<16x128xf32>
    %130 = arith.addf %127, %129 : vector<16x128xf32>
    %cst_56 = arith.constant 0.000000e+00 : f32
    %131 = vector.broadcast %cst_56 : f32 to vector<16x128xf32>
    %132 = arith.maximumf %130, %131 : vector<16x128xf32>
    %cst_57 = arith.constant 0.000000e+00 : f32
    %133 = vector.broadcast %cst_57 : f32 to vector<16x128xf32>
    %134 = arith.addf %133, %132 : vector<16x128xf32>
    %c0_58 = arith.constant 0 : index
    %c0_59 = arith.constant 0 : index
    %c0_60 = arith.constant 0 : index
    %135 = vector.load %arg8[%c0_58, %c0_59, %c0_60] : memref<3x128x128xf32, #tpu.memory_space<vmem>>, vector<1x128x128xf32>
    %136 = vector.shape_cast %135 : vector<1x128x128xf32> to vector<128x128xf32>
    %cst_61 = arith.constant dense<0.000000e+00> : vector<16x128xf32>
    %137 = tpu.matmul %132, %136, %cst_61 {dimension_numbers = #tpu.dot_dimension_numbers<[1], [0], [0], [1], [0, 0, 1, 1], [], []>} : vector<16x128xf32>, vector<128x128xf32>, vector<16x128xf32> -> vector<16x128xf32>
    %c0_62 = arith.constant 0 : index
    %c0_63 = arith.constant 0 : index
    %c0_64 = arith.constant 0 : index
    %138 = vector.load %arg9[%c0_62, %c0_63, %c0_64] : memref<3x1x128xf32, #tpu.memory_space<vmem>>, vector<1x1x128xf32>
    %139 = vector.shape_cast %138 : vector<1x1x128xf32> to vector<1x128xf32>
    %140 = vector.broadcast %139 : vector<1x128xf32> to vector<16x128xf32>
    %141 = arith.addf %137, %140 : vector<16x128xf32>
    %cst_65 = arith.constant 0.000000e+00 : f32
    %142 = vector.broadcast %cst_65 : f32 to vector<16x128xf32>
    %143 = arith.maximumf %141, %142 : vector<16x128xf32>
    %144 = arith.addf %143, %134 : vector<16x128xf32>
    %cst_66 = arith.constant dense<0.000000e+00> : vector<16xf32>
    %145 = vector.multi_reduction <add>, %144, %cst_66 [1] : vector<16x128xf32> to vector<16xf32>
    %146 = vector.shape_cast %145 : vector<16xf32> to vector<16x1xf32>
    %cst_67 = arith.constant 1.562500e-02 : f32
    %147 = vector.broadcast %cst_67 : f32 to vector<16x1xf32>
    %148 = arith.mulf %146, %147 : vector<16x1xf32>
    %149 = tpu.iota {dimensions = array<i32: 1>} : vector<1x128xi32>
    %c64_i32 = arith.constant 64 : i32
    %150 = vector.broadcast %c64_i32 : i32 to vector<1x128xi32>
    %151 = arith.cmpi slt, %149, %150 : vector<1x128xi32>
    %152 = arith.extui %151 : vector<1x128xi1> to vector<1x128xi32>
    %153 = arith.sitofp %152 : vector<1x128xi32> to vector<1x128xf32>
    %154 = vector.broadcast %148 : vector<16x1xf32> to vector<16x128xf32>
    %155 = vector.broadcast %153 : vector<1x128xf32> to vector<16x128xf32>
    %156 = arith.mulf %154, %155 : vector<16x128xf32>
    %157 = arith.subf %144, %156 : vector<16x128xf32>
    %158 = arith.mulf %157, %157 : vector<16x128xf32>
    %cst_68 = arith.constant dense<0.000000e+00> : vector<16xf32>
    %159 = vector.multi_reduction <add>, %158, %cst_68 [1] : vector<16x128xf32> to vector<16xf32>
    %160 = vector.shape_cast %159 : vector<16xf32> to vector<16x1xf32>
    %cst_69 = arith.constant 1.562500e-02 : f32
    %161 = vector.broadcast %cst_69 : f32 to vector<16x1xf32>
    %162 = arith.mulf %160, %161 : vector<16x1xf32>
    %cst_70 = arith.constant 0.000000e+00 : f32
    %163 = vector.broadcast %cst_70 : f32 to vector<16x1xf32>
    %164 = arith.maximumf %162, %163 : vector<16x1xf32>
    %cst_71 = arith.constant 9.99999974E-6 : f32
    %165 = vector.broadcast %cst_71 : f32 to vector<16x1xf32>
    %166 = arith.addf %164, %165 : vector<16x1xf32>
    %167 = math.rsqrt %166 : vector<16x1xf32>
    %168 = vector.broadcast %167 : vector<16x1xf32> to vector<16x128xf32>
    %169 = arith.mulf %157, %168 : vector<16x128xf32>
    %170 = vector.broadcast %3 : vector<1x128xf32> to vector<16x128xf32>
    %171 = arith.mulf %169, %170 : vector<16x128xf32>
    %172 = vector.broadcast %4 : vector<1x128xf32> to vector<16x128xf32>
    %173 = arith.addf %171, %172 : vector<16x128xf32>
    %174 = arith.addf %134, %173 : vector<16x128xf32>
    %c1_72 = arith.constant 1 : index
    %c0_73 = arith.constant 0 : index
    %c0_74 = arith.constant 0 : index
    %175 = vector.load %arg8[%c1_72, %c0_73, %c0_74] : memref<3x128x128xf32, #tpu.memory_space<vmem>>, vector<1x128x128xf32>
    %176 = vector.shape_cast %175 : vector<1x128x128xf32> to vector<128x128xf32>
    %cst_75 = arith.constant dense<0.000000e+00> : vector<16x128xf32>
    %177 = tpu.matmul %173, %176, %cst_75 {dimension_numbers = #tpu.dot_dimension_numbers<[1], [0], [0], [1], [0, 0, 1, 1], [], []>} : vector<16x128xf32>, vector<128x128xf32>, vector<16x128xf32> -> vector<16x128xf32>
    %c1_76 = arith.constant 1 : index
    %c0_77 = arith.constant 0 : index
    %c0_78 = arith.constant 0 : index
    %178 = vector.load %arg9[%c1_76, %c0_77, %c0_78] : memref<3x1x128xf32, #tpu.memory_space<vmem>>, vector<1x1x128xf32>
    %179 = vector.shape_cast %178 : vector<1x1x128xf32> to vector<1x128xf32>
    %180 = vector.broadcast %179 : vector<1x128xf32> to vector<16x128xf32>
    %181 = arith.addf %177, %180 : vector<16x128xf32>
    %cst_79 = arith.constant 0.000000e+00 : f32
    %182 = vector.broadcast %cst_79 : f32 to vector<16x128xf32>
    %183 = arith.maximumf %181, %182 : vector<16x128xf32>
    %184 = arith.addf %183, %174 : vector<16x128xf32>
    %cst_80 = arith.constant dense<0.000000e+00> : vector<16xf32>
    %185 = vector.multi_reduction <add>, %184, %cst_80 [1] : vector<16x128xf32> to vector<16xf32>
    %186 = vector.shape_cast %185 : vector<16xf32> to vector<16x1xf32>
    %cst_81 = arith.constant 1.562500e-02 : f32
    %187 = vector.broadcast %cst_81 : f32 to vector<16x1xf32>
    %188 = arith.mulf %186, %187 : vector<16x1xf32>
    %189 = tpu.iota {dimensions = array<i32: 1>} : vector<1x128xi32>
    %c64_i32_82 = arith.constant 64 : i32
    %190 = vector.broadcast %c64_i32_82 : i32 to vector<1x128xi32>
    %191 = arith.cmpi slt, %189, %190 : vector<1x128xi32>
    %192 = arith.extui %191 : vector<1x128xi1> to vector<1x128xi32>
    %193 = arith.sitofp %192 : vector<1x128xi32> to vector<1x128xf32>
    %194 = vector.broadcast %188 : vector<16x1xf32> to vector<16x128xf32>
    %195 = vector.broadcast %193 : vector<1x128xf32> to vector<16x128xf32>
    %196 = arith.mulf %194, %195 : vector<16x128xf32>
    %197 = arith.subf %184, %196 : vector<16x128xf32>
    %198 = arith.mulf %197, %197 : vector<16x128xf32>
    %cst_83 = arith.constant dense<0.000000e+00> : vector<16xf32>
    %199 = vector.multi_reduction <add>, %198, %cst_83 [1] : vector<16x128xf32> to vector<16xf32>
    %200 = vector.shape_cast %199 : vector<16xf32> to vector<16x1xf32>
    %cst_84 = arith.constant 1.562500e-02 : f32
    %201 = vector.broadcast %cst_84 : f32 to vector<16x1xf32>
    %202 = arith.mulf %200, %201 : vector<16x1xf32>
    %cst_85 = arith.constant 0.000000e+00 : f32
    %203 = vector.broadcast %cst_85 : f32 to vector<16x1xf32>
    %204 = arith.maximumf %202, %203 : vector<16x1xf32>
    %cst_86 = arith.constant 9.99999974E-6 : f32
    %205 = vector.broadcast %cst_86 : f32 to vector<16x1xf32>
    %206 = arith.addf %204, %205 : vector<16x1xf32>
    %207 = math.rsqrt %206 : vector<16x1xf32>
    %208 = vector.broadcast %207 : vector<16x1xf32> to vector<16x128xf32>
    %209 = arith.mulf %197, %208 : vector<16x128xf32>
    %210 = vector.broadcast %3 : vector<1x128xf32> to vector<16x128xf32>
    %211 = arith.mulf %209, %210 : vector<16x128xf32>
    %212 = vector.broadcast %4 : vector<1x128xf32> to vector<16x128xf32>
    %213 = arith.addf %211, %212 : vector<16x128xf32>
    %214 = arith.addf %174, %213 : vector<16x128xf32>
    %c2_87 = arith.constant 2 : index
    %c0_88 = arith.constant 0 : index
    %c0_89 = arith.constant 0 : index
    %215 = vector.load %arg8[%c2_87, %c0_88, %c0_89] : memref<3x128x128xf32, #tpu.memory_space<vmem>>, vector<1x128x128xf32>
    %216 = vector.shape_cast %215 : vector<1x128x128xf32> to vector<128x128xf32>
    %cst_90 = arith.constant dense<0.000000e+00> : vector<16x128xf32>
    %217 = tpu.matmul %213, %216, %cst_90 {dimension_numbers = #tpu.dot_dimension_numbers<[1], [0], [0], [1], [0, 0, 1, 1], [], []>} : vector<16x128xf32>, vector<128x128xf32>, vector<16x128xf32> -> vector<16x128xf32>
    %c2_91 = arith.constant 2 : index
    %c0_92 = arith.constant 0 : index
    %c0_93 = arith.constant 0 : index
    %218 = vector.load %arg9[%c2_91, %c0_92, %c0_93] : memref<3x1x128xf32, #tpu.memory_space<vmem>>, vector<1x1x128xf32>
    %219 = vector.shape_cast %218 : vector<1x1x128xf32> to vector<1x128xf32>
    %220 = vector.broadcast %219 : vector<1x128xf32> to vector<16x128xf32>
    %221 = arith.addf %217, %220 : vector<16x128xf32>
    %cst_94 = arith.constant 0.000000e+00 : f32
    %222 = vector.broadcast %cst_94 : f32 to vector<16x128xf32>
    %223 = arith.maximumf %221, %222 : vector<16x128xf32>
    %224 = arith.addf %223, %214 : vector<16x128xf32>
    %cst_95 = arith.constant dense<0.000000e+00> : vector<16xf32>
    %225 = vector.multi_reduction <add>, %224, %cst_95 [1] : vector<16x128xf32> to vector<16xf32>
    %226 = vector.shape_cast %225 : vector<16xf32> to vector<16x1xf32>
    %cst_96 = arith.constant 1.562500e-02 : f32
    %227 = vector.broadcast %cst_96 : f32 to vector<16x1xf32>
    %228 = arith.mulf %226, %227 : vector<16x1xf32>
    %229 = tpu.iota {dimensions = array<i32: 1>} : vector<1x128xi32>
    %c64_i32_97 = arith.constant 64 : i32
    %230 = vector.broadcast %c64_i32_97 : i32 to vector<1x128xi32>
    %231 = arith.cmpi slt, %229, %230 : vector<1x128xi32>
    %232 = arith.extui %231 : vector<1x128xi1> to vector<1x128xi32>
    %233 = arith.sitofp %232 : vector<1x128xi32> to vector<1x128xf32>
    %234 = vector.broadcast %228 : vector<16x1xf32> to vector<16x128xf32>
    %235 = vector.broadcast %233 : vector<1x128xf32> to vector<16x128xf32>
    %236 = arith.mulf %234, %235 : vector<16x128xf32>
    %237 = arith.subf %224, %236 : vector<16x128xf32>
    %238 = arith.mulf %237, %237 : vector<16x128xf32>
    %cst_98 = arith.constant dense<0.000000e+00> : vector<16xf32>
    %239 = vector.multi_reduction <add>, %238, %cst_98 [1] : vector<16x128xf32> to vector<16xf32>
    %240 = vector.shape_cast %239 : vector<16xf32> to vector<16x1xf32>
    %cst_99 = arith.constant 1.562500e-02 : f32
    %241 = vector.broadcast %cst_99 : f32 to vector<16x1xf32>
    %242 = arith.mulf %240, %241 : vector<16x1xf32>
    %cst_100 = arith.constant 0.000000e+00 : f32
    %243 = vector.broadcast %cst_100 : f32 to vector<16x1xf32>
    %244 = arith.maximumf %242, %243 : vector<16x1xf32>
    %cst_101 = arith.constant 9.99999974E-6 : f32
    %245 = vector.broadcast %cst_101 : f32 to vector<16x1xf32>
    %246 = arith.addf %244, %245 : vector<16x1xf32>
    %247 = math.rsqrt %246 : vector<16x1xf32>
    %248 = vector.broadcast %247 : vector<16x1xf32> to vector<16x128xf32>
    %249 = arith.mulf %237, %248 : vector<16x128xf32>
    %250 = vector.broadcast %3 : vector<1x128xf32> to vector<16x128xf32>
    %251 = arith.mulf %249, %250 : vector<16x128xf32>
    %252 = vector.broadcast %4 : vector<1x128xf32> to vector<16x128xf32>
    %253 = arith.addf %251, %252 : vector<16x128xf32>
    %c0_102 = arith.constant 0 : index
    %c0_103 = arith.constant 0 : index
    %254 = vector.load %arg12[%c0_102, %c0_103] : memref<16x128xf32, #tpu.memory_space<vmem>>, vector<16x128xf32>
    tpu.vector_store %arg12[%c0_102, %c0_103], %253 {strides = array<i32>} : memref<16x128xf32, #tpu.memory_space<vmem>>, vector<16x128xf32>,
    return
  }
  func.func @transform_0(%arg0: i32) -> (i32, i32) {
    %c0_i32 = arith.constant 0 : i32
    %c0_i32_0 = arith.constant 0 : i32
    return %arg0, %c0_i32 : i32, i32
  }
  func.func @transform_1(%arg0: i32) -> (i32, i32, i32) {
    %c0_i32 = arith.constant 0 : i32
    %c0_i32_0 = arith.constant 0 : i32
    %c0_i32_1 = arith.constant 0 : i32
    %c0_i32_2 = arith.constant 0 : i32
    return %c0_i32, %c0_i32_0, %c0_i32_1 : i32, i32, i32
  }
  func.func @transform_2(%arg0: i32) -> (i32, i32, i32) {
    %c0_i32 = arith.constant 0 : i32
    %c0_i32_0 = arith.constant 0 : i32
    %c0_i32_1 = arith.constant 0 : i32
    %c0_i32_2 = arith.constant 0 : i32
    return %c0_i32, %c0_i32_0, %c0_i32_1 : i32, i32, i32
  }
  func.func @transform_3(%arg0: i32) -> (i32, i32) {
    %c0_i32 = arith.constant 0 : i32
    %c0_i32_0 = arith.constant 0 : i32
    %c0_i32_1 = arith.constant 0 : i32
    return %c0_i32, %c0_i32_0 : i32, i32
  }
  func.func @transform_4(%arg0: i32) -> (i32, i32) {
    %c0_i32 = arith.constant 0 : i32
    %c0_i32_0 = arith.constant 0 : i32
    %c0_i32_1 = arith.constant 0 : i32
    return %c0_i32, %c0_i32_0 : i32, i32
  }
  func.func @transform_5(%arg0: i32) -> (i32, i32) {
    %c0_i32 = arith.constant 0 : i32
    %c0_i32_0 = arith.constant 0 : i32
    %c0_i32_1 = arith.constant 0 : i32
    return %c0_i32, %c0_i32_0 : i32, i32
  }
  func.func @transform_6(%arg0: i32) -> (i32, i32) {
    %c0_i32 = arith.constant 0 : i32
    %c0_i32_0 = arith.constant 0 : i32
    %c0_i32_1 = arith.constant 0 : i32
    return %c0_i32, %c0_i32_0 : i32, i32
  }
  func.func @transform_7(%arg0: i32) -> (i32, i32, i32) {
    %c0_i32 = arith.constant 0 : i32
    %c0_i32_0 = arith.constant 0 : i32
    %c0_i32_1 = arith.constant 0 : i32
    %c0_i32_2 = arith.constant 0 : i32
    return %c0_i32, %c0_i32_0, %c0_i32_1 : i32, i32, i32
  }
  func.func @transform_8(%arg0: i32) -> (i32, i32, i32) {
    %c0_i32 = arith.constant 0 : i32
    %c0_i32_0 = arith.constant 0 : i32
    %c0_i32_1 = arith.constant 0 : i32
    %c0_i32_2 = arith.constant 0 : i32
    return %c0_i32, %c0_i32_0, %c0_i32_1 : i32, i32, i32
  }
  func.func @transform_9(%arg0: i32) -> (i32, i32) {
    %c0_i32 = arith.constant 0 : i32
    %c0_i32_0 = arith.constant 0 : i32
    %c0_i32_1 = arith.constant 0 : i32
    return %c0_i32, %c0_i32_0 : i32, i32
  }
  func.func @transform_10(%arg0: i32) -> (i32, i32) {
    %c0_i32 = arith.constant 0 : i32
    %c0_i32_0 = arith.constant 0 : i32
    %c0_i32_1 = arith.constant 0 : i32
    return %c0_i32, %c0_i32_0 : i32, i32
  }
  func.func @transform_11(%arg0: i32) -> (i32, i32) {
    %c0_i32 = arith.constant 0 : i32
    %c0_i32_0 = arith.constant 0 : i32
    return %arg0, %c0_i32 : i32, i32
  }
}

</mosaic_0001>

<bundles_post_ra>
// kernel: tpu_custom_call.1
= control target key start
LH: loop header
LB: loop body
LE: loop exit
PB: predicated region body
PF: predicated region fallthrough
CT: control target
= control target key end

     0   :  { %16 = vsyncpa [#allocation3], 0  ;;  %s1867_s0 = inlined_call_operand.hbm [shape: f32[16,128], index: 0, kind: input, shape index: {}]   ;;  %s1868_s1 = inlined_call_operand.hbm [shape: f32[3,128,128], index: 1, kind: input, shape index: {}]   ;;  %s1869_s2 = inlined_call_operand.vmem [shape: f32[3,1,128], index: 2, kind: input, shape index: {}]   ;;  %s1870_s3 = inlined_call_operand.vmem [shape: f32[1,128], index: 3, kind: input, shape index: {}]   ;;  %s1871_s4 = inlined_call_operand.hbm [shape: f32[1,128], index: 4, kind: input, shape index: {}]   ;;  %s1872_s5 = inlined_call_operand.hbm [shape: f32[128,128], index: 5, kind: input, shape index: {}]   ;;  %s1873_s6 = inlined_call_operand.vmem [shape: f32[1,128], index: 6, kind: input, shape index: {}]   ;;  %s1874_s7 = inlined_call_operand.hbm [shape: f32[3,128,128], index: 7, kind: input, shape index: {}]   ;;  %s1875_s8 = inlined_call_operand.vmem [shape: f32[3,1,128], index: 8, kind: input, shape index: {}]   ;;  %s1876_s9 = inlined_call_operand.vmem [shape: f32[1,128], index: 9, kind: input, shape index: {}]   ;;  %s1877_s10 = inlined_call_operand.vmem [shape: f32[1,128], index: 10, kind: input, shape index: {}]   ;;  %s1878_s11 = inlined_call_operand.hbm [shape: f32[16,128], index: 11, kind: output, shape index: {}]  }
   0x1   :  { %17 = vsyncpa [#allocation6], 0 }
   0x2   :  { %18 = vsyncpa [#allocation9], 0 }
   0x3   :  { %19 = vsyncpa [#allocation4], 0  ;;  %s1625_s17 = smov [#allocation5]   ;;  %s1626_s19 = smov [#allocation8]  }
   0x4   :  { %s37_s18 = sshll.u32 %s1625_s17, 4  ;;  %s63_s20 = sshll.u32 %s1626_s19, 4  ;;  %s38_s18 = int_to_ptr.vmem [resolvable:$true] %s37_s18  ;;  %s64_s20 = int_to_ptr.vmem [resolvable:$true] %s63_s20 }
   0x5   :  { %s1505_s21 = scalar_lea.vmem %s38_s18, 6144  ;;  %p1510_p1 = scmp.lt.s32.totalorder %s38_s18, %s38_s18 }
   0x6   :  { %p1506_p0 = scmp.ne.s32.totalorder %s38_s18, %s1505_s21  ;;  %p1511_p2 = scmp.lt.s32.totalorder %s1505_s21, %s1505_s21 }
   0x8   :  { %p1512_p3 = por %p1511_p2, %p1510_p1 }
   0xa   :  { %p1513_p4 = pnand %p1512_p3, %p1506_p0 }
   0xc   :  { %1516 = shalt.err (!%p1513_p4)
}
   0xd   :  { %s1627_s22 = smov 128   ;;  %s1628_s23 = smov 8  }
   0xe   :  { %43 = dma.hbm_to_vmem [thread:$0]  %s1868_s1, 6144, %s38_s18, [#allocation6], %s1627_s22, %s1627_s22, %s1628_s23  }
   0xf   :  { %s1525_s26 = scalar_lea.vmem %s64_s20, 2048  ;;  %p1530_p6 = scmp.lt.s32.totalorder %s64_s20, %s64_s20 }
  0x10   :  { %p1526_p5 = scmp.ne.s32.totalorder %s64_s20, %s1525_s26  ;;  %p1531_p7 = scmp.lt.s32.totalorder %s1525_s26, %s1525_s26 }
  0x12   :  { %p1532_p8 = por %p1531_p7, %p1530_p6 }
  0x14   :  { %p1533_p9 = pnand %p1532_p8, %p1526_p5 }
  0x16   :  { %1536 = shalt.err (!%p1533_p9)
}
  0x17   :  { %69 = dma.hbm_to_vmem [thread:$0]  %s1872_s5, 2048, %s64_s20, [#allocation9], %s1627_s22, %s1627_s22, %s1628_s23  }
  0x18   :  { %s1629_s29 = smov [#allocation2]   ;;  %s1630_s12 = smov [#allocation7]  }
  0x19   :  { %s25_s30 = sshll.u32 %s1629_s29, 4  ;;  %s54_s13 = sshll.u32 %s1630_s12, 4  ;;  %s26_s30 = int_to_ptr.vmem [resolvable:$true] %s25_s30  ;;  %s55_s13 = int_to_ptr.vmem [resolvable:$true] %s54_s13 }
  0x1a   :  { %s1545_s1 = scalar_lea.vmem %s26_s30, 256  ;;  %p1550_p11 = scmp.lt.s32.totalorder %s26_s30, %s26_s30 }
  0x1b   :  { %p1546_p10 = scmp.ne.s32.totalorder %s26_s30, %s1545_s1  ;;  %p1551_p12 = scmp.lt.s32.totalorder %s1545_s1, %s1545_s1 }
  0x1d   :  { %p1552_p13 = por %p1551_p12, %p1550_p11 }
  0x1f   :  { %p1553_p0 = pnand %p1552_p13, %p1546_p10 }
  0x21   :  { %1556 = shalt.err (!%p1553_p0)
}
  0x22   :  { %31 = dma.hbm_to_vmem [thread:$0]  %s1867_s0, 256, %s26_s30, [#allocation3], %s1627_s22, %s1627_s22, %s1628_s23  }
  0x23   :  { %s1565_s5 = scalar_lea.vmem %s55_s13, 16  ;;  %s1569_s16 = scalar_lea.vmem %s55_s13, 32 }
  0x24   :  { %p1566_p1 = scmp.ne.s32.totalorder %s55_s13, %s1565_s5  ;;  %p1570_p2 = scmp.lt.s32.totalorder %s55_s13, %s55_s13 }
  0x25   :  { %p1571_p3 = scmp.lt.s32.totalorder %s1569_s16, %s1565_s5 }
  0x27   :  { %p1572_p4 = por %p1571_p3, %p1570_p2 }
  0x29   :  { %p1573_p5 = pnand %p1572_p4, %p1566_p1 }
  0x2b   :  { %1576 = shalt.err (!%p1573_p5)
}
  0x2c   :  { %57 = dma.hbm_to_vmem [thread:$0]  %s1871_s4, 16, %s55_s13, [#allocation6]  }
  0x2d   :  { %s1631_s19 = smov [#allocation10]  }
  0x2e   :  { %s77_s20 = sshll.u32 %s1631_s19, 4  ;;  %s78_s20 = int_to_ptr.vmem [resolvable:$true] %s77_s20 }
  0x2f   :  { %s1585_s21 = scalar_lea.vmem %s78_s20, 6144  ;;  %p1590_p7 = scmp.lt.s32.totalorder %s78_s20, %s78_s20 }
  0x30   :  { %p1586_p6 = scmp.ne.s32.totalorder %s78_s20, %s1585_s21  ;;  %p1591_p8 = scmp.lt.s32.totalorder %s1585_s21, %s1585_s21 }
  0x32   :  { %p1592_p9 = por %p1591_p8, %p1590_p7 }
  0x34   :  { %p1593_p10 = pnand %p1592_p9, %p1586_p6 }
  0x36   :  { %1596 = shalt.err (!%p1593_p10)
}
  0x37   :  { %83 = dma.hbm_to_vmem [thread:$0]  %s1874_s7, 6144, %s78_s20, [#allocation9], %s1627_s22, %s1627_s22, %s1628_s23  }
  0x38   :  { %1617 = dma.done.wait [#allocation3], 256  }
  0x39   :  { %1618 = vsyncadd [#allocation3], 4294967040 }
  0x3a   :  { %1619 = dma.done.wait [#allocation6], 6160  }
  0x3b   :  { %1620 = vsyncadd [#allocation6], 4294961136 }
  0x3c   :  { %1621 = dma.done.wait [#allocation9], 8192  }
  0x3d   :  { %1622 = vsyncadd [#allocation9], 4294959104  ;;  %v128_v0 = vld [vmem:[#allocation5 + $0x78] sm:$0xff]  ;;  %v127_v1 = vld [vmem:[#allocation5 + $0x70] sm:$0xff]  ;;  %v221_v28 = vlaneseq  ;;  %v1632_v30 = vmov 0.0  }
  0x3e   :  { %1219 = vmatprep.subr.mxu0 %v128_v0  ;;  %v126_v2 = vld [vmem:[#allocation5 + $0x68] sm:$0xff]  ;;  %v125_v3 = vld [vmem:[#allocation5 + $0x60] sm:$0xff]  ;;  %v1721_v4 = vld [vmem:[#allocation2] sm:$0xff] }
  0x3f   :  { %1220 = vmatpush3.msra.mxu0 %v128_v0  ;;  %v124_v5 = vld [vmem:[#allocation5 + $0x58] sm:$0xff]  ;;  %1251 = vmatprep.mubr.f32.mxu0 %v1721_v4  ;;  %v123_v6 = vld [vmem:[#allocation5 + $0x50] sm:$0xff]  ;;  %v122_v7 = vld [vmem:[#allocation5 + $0x48] sm:$0xff]  ;;  %v1732_v29 = vand.u32 127, %v221_v28 }
  0x40   :  { %1221 = vmatprep.subr.mxu0 %v127_v1  ;;  %v121_v8 = vld [vmem:[#allocation5 + $0x40] sm:$0xff]  ;;  %v120_v9 = vld [vmem:[#allocation5 + $0x38] sm:$0xff]  ;;  %v119_v10 = vld [vmem:[#allocation5 + $0x30] sm:$0xff] }
  0x41   :  { %1222 = vmatpush3.msra.mxu0 %v127_v1  ;;  %v118_v11 = vld [vmem:[#allocation5 + $0x28] sm:$0xff]  ;;  %v117_v12 = vld [vmem:[#allocation5 + $0x20] sm:$0xff]  ;;  %v116_v13 = vld [vmem:[#allocation5 + $0x18] sm:$0xff]  ;;  %vm223_vm0 = vcmp.lt.s32.totalorder %v1732_v29, 32  ;;  %vm744_vm1 = vcmp.lt.s32.totalorder %v1732_v29, 64 }
  0x42   :  { %1223 = vmatprep.subr.mxu0 %v126_v2  ;;  %v115_v14 = vld [vmem:[#allocation5 + $0x10] sm:$0xff]  ;;  %v114_v15 = vld [vmem:[#allocation5 + $0x8] sm:$0xff]  ;;  %v113_v16 = vld [vmem:[#allocation5] sm:$0xff]  ;;  %v1736_v31 = vsel %vm223_vm0, 1.0, %v1632_v30 }
  0x43   :  { %1224 = vmatpush3.msra.mxu0 %v126_v2  ;;  %v1724_v17 = vld [vmem:[#allocation2 + $0x8] sm:$0xff]  ;;  %v1076_v19 = vld [vmem:[%s1869_s2] ss:$0 sm:$0xff]  ;;  %v278_v43 = vld [vmem:[#allocation5 + $0xe8] sm:$0xff] }
  0x44   :  { %1225 = vmatprep.subr.mxu0 %v125_v3  ;;  %v280_v27 = vld [vmem:[#allocation5 + $0xf8] sm:$0xff]  ;;  %v279_v42 = vld [vmem:[#allocation5 + $0xf0] sm:$0xff]  ;;  %v277_v44 = vld [vmem:[#allocation5 + $0xe0] sm:$0xff] }
  0x45   :  { %1226 = vmatpush3.msra.mxu0 %v125_v3  ;;  %1254 = vmatprep.subr.mxu1 %v280_v27  ;;  %v276_v45 = vld [vmem:[#allocation5 + $0xd8] sm:$0xff]  ;;  %v275_v46 = vld [vmem:[#allocation5 + $0xd0] sm:$0xff]  ;;  %v274_v47 = vld [vmem:[#allocation5 + $0xc8] sm:$0xff] }
  0x46   :  { %1227 = vmatprep.subr.mxu0 %v124_v5  ;;  %1255 = vmatpush3.msra.mxu1 %v280_v27  ;;  %v273_v48 = vld [vmem:[#allocation5 + $0xc0] sm:$0xff]  ;;  %v272_v49 = vld [vmem:[#allocation5 + $0xb8] sm:$0xff]  ;;  %v271_v50 = vld [vmem:[#allocation5 + $0xb0] sm:$0xff] }
  0x47   :  { %1228 = vmatpush3.msra.mxu0 %v124_v5  ;;  %1256 = vmatprep.subr.mxu1 %v279_v42  ;;  %v270_v51 = vld [vmem:[#allocation5 + $0xa8] sm:$0xff]  ;;  %v269_v52 = vld [vmem:[#allocation5 + $0xa0] sm:$0xff]  ;;  %v268_v53 = vld [vmem:[#allocation5 + $0x98] sm:$0xff] }
  0x48   :  { %1229 = vmatprep.subr.mxu0 %v123_v6  ;;  %1257 = vmatpush3.msra.mxu1 %v279_v42  ;;  %v267_v54 = vld [vmem:[#allocation5 + $0x90] sm:$0xff]  ;;  %v266_v55 = vld [vmem:[#allocation5 + $0x88] sm:$0xff]  ;;  %v265_v56 = vld [vmem:[#allocation5 + $0x80] sm:$0xff] }
  0x49   :  { %1230 = vmatpush3.msra.mxu0 %v123_v6  ;;  %1258 = vmatprep.subr.mxu1 %v278_v43  ;;  %v1751_v2 = vld [vmem:[%s1870_s3] ss:$0 sm:$0xff]  ;;  %v1754_v5 = vld [vmem:[#allocation7] ss:$0 sm:$0xff]  ;;  %v798_v29 = vld [vmem:[#allocation10 + $0xe0] sm:$0xff] }
  0x4a   :  { %1231 = vmatprep.subr.mxu0 %v122_v7  ;;  %1259 = vmatpush3.msra.mxu1 %v278_v43  ;;  %v409_v42 = vld [vmem:[#allocation5 + $0x140] sm:$0xff]  ;;  %v408_v43 = vld [vmem:[#allocation5 + $0x138] sm:$0xff] }
  0x4b   :  { %1232 = vmatpush3.msra.mxu0 %v122_v7  ;;  %1260 = vmatprep.subr.mxu1 %v277_v44 }
  0x4c   :  { %1233 = vmatprep.subr.mxu0 %v121_v8  ;;  %1261 = vmatpush3.msra.mxu1 %v277_v44  ;;  %v407_v44 = vld [vmem:[#allocation5 + $0x130] sm:$0xff] }
  0x4d   :  { %1234 = vmatpush3.msra.mxu0 %v121_v8  ;;  %1262 = vmatprep.subr.mxu1 %v276_v45 }
  0x4e   :  { %1235 = vmatprep.subr.mxu0 %v120_v9  ;;  %1263 = vmatpush3.msra.mxu1 %v276_v45  ;;  %v406_v45 = vld [vmem:[#allocation5 + $0x128] sm:$0xff] }
  0x4f   :  { %1236 = vmatpush3.msra.mxu0 %v120_v9  ;;  %1264 = vmatprep.subr.mxu1 %v275_v46 }
  0x50   :  { %1237 = vmatprep.subr.mxu0 %v119_v10  ;;  %1265 = vmatpush3.msra.mxu1 %v275_v46  ;;  %v405_v46 = vld [vmem:[#allocation5 + $0x120] sm:$0xff] }
  0x51   :  { %1238 = vmatpush3.msra.mxu0 %v119_v10  ;;  %1266 = vmatprep.subr.mxu1 %v274_v47 }
  0x52   :  { %1239 = vmatprep.subr.mxu0 %v118_v11  ;;  %1267 = vmatpush3.msra.mxu1 %v274_v47  ;;  %v404_v47 = vld [vmem:[#allocation5 + $0x118] sm:$0xff] }
  0x53   :  { %1240 = vmatpush3.msra.mxu0 %v118_v11  ;;  %1268 = vmatprep.subr.mxu1 %v273_v48 }
  0x54   :  { %1241 = vmatprep.subr.mxu0 %v117_v12  ;;  %1269 = vmatpush3.msra.mxu1 %v273_v48  ;;  %v403_v48 = vld [vmem:[#allocation5 + $0x110] sm:$0xff] }
  0x55   :  { %1242 = vmatpush3.msra.mxu0 %v117_v12  ;;  %1270 = vmatprep.subr.mxu1 %v272_v49  ;;  %v1081_v12 = vld [vmem:[%s1869_s2 + $0x1] ss:$0 sm:$0xff] }
  0x56   :  { %1243 = vmatprep.subr.mxu0 %v116_v13  ;;  %1271 = vmatpush3.msra.mxu1 %v272_v49  ;;  %v402_v49 = vld [vmem:[#allocation5 + $0x108] sm:$0xff] }
  0x57   :  { %1244 = vmatpush3.msra.mxu0 %v116_v13  ;;  %1272 = vmatprep.subr.mxu1 %v271_v50 }
  0x58   :  { %1245 = vmatprep.subr.mxu0 %v115_v14  ;;  %1273 = vmatpush3.msra.mxu1 %v271_v50  ;;  %v401_v50 = vld [vmem:[#allocation5 + $0x100] sm:$0xff] }
  0x59   :  { %1246 = vmatpush3.msra.mxu0 %v115_v14  ;;  %1274 = vmatprep.subr.mxu1 %v270_v51 }
  0x5a   :  { %1247 = vmatprep.subr.mxu0 %v114_v15  ;;  %1275 = vmatpush3.msra.mxu1 %v270_v51 }
  0x5b   :  { %1248 = vmatpush3.msra.mxu0 %v114_v15  ;;  %1276 = vmatprep.subr.mxu1 %v269_v52 }
  0x5c   :  { %1249 = vmatprep.subr.mxu0 %v113_v16  ;;  %1277 = vmatpush3.msra.mxu1 %v269_v52 }
  0x5d   :  { %1250 = vmatpush3.msra.mxu0 %v113_v16  ;;  %1278 = vmatprep.subr.mxu1 %v268_v53 }
  0x5e   :  { %1252 = vmatmul.mubr.f32.vlgmr.msra.gmra.mxu0 %v1724_v17  ;;  %1279 = vmatpush3.msra.mxu1 %v268_v53 }
  0x5f   :  { %1280 = vmatprep.subr.mxu1 %v267_v54 }
  0x60   :  { %1281 = vmatpush3.msra.mxu1 %v267_v54 }
  0x61   :  { %1282 = vmatprep.subr.mxu1 %v266_v55 }
  0x62   :  { %1283 = vmatpush3.msra.mxu1 %v266_v55 }
  0x63   :  { %1284 = vmatprep.subr.mxu1 %v265_v56 }
  0x64   :  { %1285 = vmatpush3.msra.mxu1 %v265_v56 }
 0x11e   :  { %v1253_v18 = vpop.f32.mrf.mxu0 }
 0x11f   :  { %v208_v21 = vadd.f32 %v1253_v18, %v1076_v19 }
 0x120   :  { %v202_v20 = vpop.f32.mrf.mxu0 }
 0x121   :  { %v203_v22 = vadd.f32 %v1076_v19, %v202_v20  ;;  %v212_v24 = vmax.f32 %v208_v21, 0.0 }
 0x123   :  { %v211_v23 = vmax.f32 %v203_v22, 0.0  ;;  %v214_v26 = vadd.f32 %v212_v24, %v1724_v17  ;;  %v416_v24 = vld [vmem:[#allocation5 + $0x178] sm:$0xff] }
 0x124   :  { %1289 = vmatprep.subr.mxu0 %v416_v24 }
 0x125   :  { %v213_v25 = vadd.f32 %v211_v23, %v1721_v4  ;;  %1290 = vmatpush3.msra.mxu0 %v416_v24 }
 0x127   :  { %215 = vadd.xlane.f32.xlu0 %v213_v25 }
 0x12b   :  { %217 = vadd.xlane.f32.xlu0 %v214_v26 }
 0x1b0   :  { %v216_v32 = vpop.xlane.xlu0 %215 }
 0x1b1   :  { %v219_v33 = vmul.f32 0.03125, %v216_v32 }
 0x1b3   :  { %v226_v34 = vmul.f32 %v1736_v31, %v219_v33 }
 0x1b4   :  { %v218_v35 = vpop.xlane.xlu0 %217 }
 0x1b5   :  { %v220_v36 = vmul.f32 0.03125, %v218_v35  ;;  %v1739_v37 = vsub.f32 %v213_v25, %v226_v34  ;;  %v415_v25 = vld [vmem:[#allocation5 + $0x170] sm:$0xff] }
 0x1b6   :  { %1291 = vmatprep.subr.mxu0 %v415_v25 }
 0x1b7   :  { %v227_v38 = vmul.f32 %v1736_v31, %v220_v36  ;;  %v230_v39 = vmul.f32 %v1739_v37, %v1739_v37  ;;  %1292 = vmatpush3.msra.mxu0 %v415_v25 }
 0x1b9   :  { %232 = vadd.xlane.f32.xlu1 %v230_v39  ;;  %v1744_v40 = vsub.f32 %v214_v26, %v227_v38  ;;  %v413_v38 = vld [vmem:[#allocation5 + $0x160] sm:$0xff]  ;;  %v412_v39 = vld [vmem:[#allocation5 + $0x158] sm:$0xff] }
 0x1bb   :  { %v231_v41 = vmul.f32 %v1744_v40, %v1744_v40 }
 0x1bd   :  { %234 = vadd.xlane.f32.xlu1 %v231_v41  ;;  %v410_v41 = vld [vmem:[#allocation5 + $0x148] sm:$0xff] }
 0x242   :  { %v233_v57 = vpop.xlane.xlu1 %232 }
 0x243   :  { %v236_v58 = vmul.f32 0.03125, %v233_v57 }
 0x245   :  { %v238_v59 = vmax.f32 %v236_v58, 0.0 }
 0x246   :  { %v235_v60 = vpop.xlane.xlu1 %234 }
 0x247   :  { %v240_v61 = vadd.f32 1e-05, %v238_v59  ;;  %v237_v62 = vmul.f32 0.03125, %v235_v60 }
 0x249   :  { %1473 = vrsqrt.f32 %v240_v61  ;;  %v239_v63 = vmax.f32 %v237_v62, 0.0 }
 0x24b   :  { %v241_v0 = vadd.f32 1e-05, %v239_v63 }
 0x24d   :  { %1475 = vrsqrt.f32 %v241_v0 }
 0x256   :  { %v1474_v1 = vpop.eup %1473 }
 0x257   :  { %v244_v3 = vmul.f32 %v1474_v1, %v1739_v37  ;;  %v414_v37 = vld [vmem:[#allocation5 + $0x168] sm:$0xff] }
 0x258   :  { %1293 = vmatprep.subr.mxu0 %v414_v37 }
 0x259   :  { %v252_v6 = vmul.f32 %v1751_v2, %v244_v3  ;;  %1294 = vmatpush3.msra.mxu0 %v414_v37  ;;  %v540_v37 = vld [vmem:[#allocation8 + $0x30] sm:$0xff] }
 0x25a   :  { %v1476_v7 = vpop.eup %1475  ;;  %1295 = vmatprep.subr.mxu0 %v413_v38 }
 0x25b   :  { %v260_v8 = vadd.f32 %v1754_v5, %v252_v6  ;;  %v245_v9 = vmul.f32 %v1476_v7, %v1744_v40  ;;  %1296 = vmatpush3.msra.mxu0 %v413_v38  ;;  %v411_v40 = vld [vmem:[#allocation5 + $0x150] sm:$0xff] }
 0x25c   :  { %1297 = vmatprep.subr.mxu0 %v412_v39  ;;  %v1083_v6 = vld [vmem:[%s1869_s2 + $0x2] ss:$0 sm:$0xff]  ;;  %v539_v38 = vld [vmem:[#allocation8 + $0x28] sm:$0xff] }
 0x25d   :  { %1286 = vmatprep.mubr.f32.mxu1 %v260_v8  ;;  %v253_v10 = vmul.f32 %v1751_v2, %v245_v9  ;;  %v1769_v22 = vadd.f32 %v260_v8, %v1721_v4  ;;  %1298 = vmatpush3.msra.mxu0 %v412_v39  ;;  %v538_v39 = vld [vmem:[#allocation8 + $0x20] sm:$0xff] }
 0x25e   :  { %1299 = vmatprep.subr.mxu0 %v411_v40 }
 0x25f   :  { %v261_v11 = vadd.f32 %v1754_v5, %v253_v10  ;;  %1300 = vmatpush3.msra.mxu0 %v411_v40  ;;  %v537_v40 = vld [vmem:[#allocation8 + $0x18] sm:$0xff] }
 0x260   :  { %1301 = vmatprep.subr.mxu0 %v410_v41 }
 0x261   :  { %1287 = vmatmul.mubr.f32.vlgmr.msra.gmra.mxu1 %v261_v11  ;;  %v1765_v19 = vadd.f32 %v261_v11, %v1724_v17  ;;  %1302 = vmatpush3.msra.mxu0 %v410_v41  ;;  %v536_v41 = vld [vmem:[#allocation8 + $0x10] sm:$0xff] }
 0x262   :  { %1303 = vmatprep.subr.mxu0 %v409_v42 }
 0x263   :  { %1304 = vmatpush3.msra.mxu0 %v409_v42  ;;  %v535_v42 = vld [vmem:[#allocation8 + $0x8] sm:$0xff] }
 0x264   :  { %1305 = vmatprep.subr.mxu0 %v408_v43 }
 0x265   :  { %1306 = vmatpush3.msra.mxu0 %v408_v43  ;;  %v534_v43 = vld [vmem:[#allocation8] sm:$0xff] }
 0x266   :  { %1307 = vmatprep.subr.mxu0 %v407_v44 }
 0x267   :  { %1308 = vmatpush3.msra.mxu0 %v407_v44  ;;  %v651_v44 = vld [vmem:[#allocation10 + $0x78] sm:$0xff] }
 0x268   :  { %1309 = vmatprep.subr.mxu0 %v406_v45 }
 0x269   :  { %1310 = vmatpush3.msra.mxu0 %v406_v45  ;;  %v650_v45 = vld [vmem:[#allocation10 + $0x70] sm:$0xff] }
 0x26a   :  { %1311 = vmatprep.subr.mxu0 %v405_v46 }
 0x26b   :  { %1312 = vmatpush3.msra.mxu0 %v405_v46  ;;  %v649_v46 = vld [vmem:[#allocation10 + $0x68] sm:$0xff] }
 0x26c   :  { %1313 = vmatprep.subr.mxu0 %v404_v47 }
 0x26d   :  { %1314 = vmatpush3.msra.mxu0 %v404_v47  ;;  %v648_v47 = vld [vmem:[#allocation10 + $0x60] sm:$0xff] }
 0x26e   :  { %1315 = vmatprep.subr.mxu0 %v403_v48 }
 0x26f   :  { %1316 = vmatpush3.msra.mxu0 %v403_v48  ;;  %v647_v48 = vld [vmem:[#allocation10 + $0x58] sm:$0xff] }
 0x270   :  { %1317 = vmatprep.subr.mxu0 %v402_v49 }
 0x271   :  { %1318 = vmatpush3.msra.mxu0 %v402_v49  ;;  %v646_v49 = vld [vmem:[#allocation10 + $0x50] sm:$0xff] }
 0x272   :  { %1319 = vmatprep.subr.mxu0 %v401_v50 }
 0x273   :  { %1320 = vmatpush3.msra.mxu0 %v401_v50  ;;  %v645_v50 = vld [vmem:[#allocation10 + $0x48] sm:$0xff] }
 0x274   :  { %1359 = vmatprep.subr.mxu0 %v651_v44 }
 0x321   :  { %v1288_v13 = vpop.f32.mrf.mxu1 }
 0x322   :  { %v361_v14 = vadd.f32 %v1288_v13, %v1081_v12 }
 0x323   :  { %v355_v15 = vpop.f32.mrf.mxu1 }
 0x324   :  { %v365_v16 = vmax.f32 %v361_v14, 0.0  ;;  %v356_v18 = vadd.f32 %v1081_v12, %v355_v15 }
 0x326   :  { %v364_v20 = vmax.f32 %v356_v18, 0.0  ;;  %v367_v21 = vadd.f32 %v365_v16, %v1765_v19  ;;  %v549_v18 = vld [vmem:[#allocation8 + $0x78] sm:$0xff] }
 0x327   :  { %1324 = vmatprep.subr.mxu1 %v549_v18 }
 0x328   :  { %370 = vadd.xlane.f32.xlu1 %v367_v21  ;;  %v366_v23 = vadd.f32 %v364_v20, %v1769_v22  ;;  %v548_v20 = vld [vmem:[#allocation8 + $0x70] sm:$0xff]  ;;  %1325 = vmatpush3.msra.mxu1 %v549_v18 }
 0x329   :  { %1326 = vmatprep.subr.mxu1 %v548_v20 }
 0x32a   :  { %368 = vadd.xlane.f32.xlu0 %v366_v23  ;;  %1327 = vmatpush3.msra.mxu1 %v548_v20 }
 0x3b1   :  { %v371_v26 = vpop.xlane.xlu1 %370 }
 0x3b2   :  { %v373_v27 = vmul.f32 0.03125, %v371_v26 }
 0x3b3   :  { %v369_v17 = vpop.xlane.xlu0 %368 }
 0x3b4   :  { %v375_v28 = vmul.f32 %v1736_v31, %v373_v27  ;;  %v372_v32 = vmul.f32 0.03125, %v369_v17 }
 0x3b6   :  { %v374_v33 = vmul.f32 %v1736_v31, %v372_v32  ;;  %v377_v4 = vsub.f32 %v367_v21, %v375_v28  ;;  %v547_v32 = vld [vmem:[#allocation8 + $0x68] sm:$0xff] }
 0x3b7   :  { %1328 = vmatprep.subr.mxu1 %v547_v32 }
 0x3b8   :  { %v379_v34 = vmul.f32 %v377_v4, %v377_v4  ;;  %v376_v35 = vsub.f32 %v366_v23, %v374_v33  ;;  %1329 = vmatpush3.msra.mxu1 %v547_v32  ;;  %v546_v33 = vld [vmem:[#allocation8 + $0x60] sm:$0xff]  ;;  %v801_v32 = vld [vmem:[#allocation10 + $0xf8] sm:$0xff] }
 0x3b9   :  { %1330 = vmatprep.subr.mxu1 %v546_v33 }
 0x3ba   :  { %382 = vadd.xlane.f32.xlu1 %v379_v34  ;;  %v378_v36 = vmul.f32 %v376_v35, %v376_v35  ;;  %1331 = vmatpush3.msra.mxu1 %v546_v33  ;;  %v543_v34 = vld [vmem:[#allocation8 + $0x48] sm:$0xff]  ;;  %v800_v33 = vld [vmem:[#allocation10 + $0xf0] sm:$0xff] }
 0x3bc   :  { %380 = vadd.xlane.f32.xlu0 %v378_v36  ;;  %v541_v36 = vld [vmem:[#allocation8 + $0x38] sm:$0xff] }
 0x443   :  { %v383_v51 = vpop.xlane.xlu1 %382 }
 0x444   :  { %v385_v52 = vmul.f32 0.03125, %v383_v51  ;;  %v644_v51 = vld [vmem:[#allocation10 + $0x40] sm:$0xff] }
 0x445   :  { %v381_v53 = vpop.xlane.xlu0 %380 }
 0x446   :  { %v387_v54 = vmax.f32 %v385_v52, 0.0  ;;  %v384_v55 = vmul.f32 0.03125, %v381_v53  ;;  %v643_v52 = vld [vmem:[#allocation10 + $0x38] sm:$0xff]  ;;  %v642_v53 = vld [vmem:[#allocation10 + $0x30] sm:$0xff] }
 0x448   :  { %v389_v56 = vadd.f32 1e-05, %v387_v54  ;;  %v386_v57 = vmax.f32 %v384_v55, 0.0  ;;  %v641_v54 = vld [vmem:[#allocation10 + $0x28] sm:$0xff]  ;;  %v640_v55 = vld [vmem:[#allocation10 + $0x20] sm:$0xff] }
 0x44a   :  { %1477 = vrsqrt.f32 %v389_v56  ;;  %v388_v58 = vadd.f32 1e-05, %v386_v57 }
 0x44c   :  { %1479 = vrsqrt.f32 %v388_v58 }
 0x457   :  { %v1478_v59 = vpop.eup %1477 }
 0x458   :  { %v393_v60 = vmul.f32 %v1478_v59, %v377_v4  ;;  %v545_v4 = vld [vmem:[#allocation8 + $0x58] sm:$0xff] }
 0x459   :  { %v1480_v61 = vpop.eup %1479  ;;  %1332 = vmatprep.subr.mxu1 %v545_v4 }
 0x45a   :  { %v392_v62 = vmul.f32 %v1480_v61, %v376_v35  ;;  %v395_v63 = vmul.f32 %v1751_v2, %v393_v60  ;;  %1333 = vmatpush3.msra.mxu1 %v545_v4  ;;  %v542_v35 = vld [vmem:[#allocation8 + $0x40] sm:$0xff]  ;;  %v1815_v4 = vsel %vm744_vm1, 1.0, %v1632_v30  ;;  %v797_v30 = vld [vmem:[#allocation10 + $0xd8] sm:$0xff] }
 0x45c   :  { %v394_v0 = vmul.f32 %v1751_v2, %v392_v62  ;;  %v397_v3 = vadd.f32 %v1754_v5, %v395_v63 }
 0x45e   :  { %v396_v1 = vadd.f32 %v1754_v5, %v394_v0  ;;  %v399_v12 = vadd.f32 %v397_v3, %v1765_v19 }
 0x460   :  { %1321 = vmatprep.mubr.f32.mxu0 %v396_v1  ;;  %v398_v15 = vadd.f32 %v396_v1, %v1769_v22 }
 0x461   :  { %1322 = vmatmul.mubr.f32.vlgmr.msra.gmra.mxu0 %v397_v3 }
 0x462   :  { %1360 = vmatpush3.msra.mxu0 %v651_v44  ;;  %v796_v44 = vld [vmem:[#allocation10 + $0xd0] sm:$0xff] }
 0x463   :  { %1361 = vmatprep.subr.mxu0 %v650_v45 }
 0x464   :  { %1362 = vmatpush3.msra.mxu0 %v650_v45  ;;  %v795_v45 = vld [vmem:[#allocation10 + $0xc8] sm:$0xff] }
 0x465   :  { %1363 = vmatprep.subr.mxu0 %v649_v46 }
 0x466   :  { %1364 = vmatpush3.msra.mxu0 %v649_v46  ;;  %v794_v46 = vld [vmem:[#allocation10 + $0xc0] sm:$0xff] }
 0x467   :  { %1365 = vmatprep.subr.mxu0 %v648_v47 }
 0x468   :  { %1366 = vmatpush3.msra.mxu0 %v648_v47  ;;  %v793_v47 = vld [vmem:[#allocation10 + $0xb8] sm:$0xff] }
 0x469   :  { %1367 = vmatprep.subr.mxu0 %v647_v48 }
 0x46a   :  { %1368 = vmatpush3.msra.mxu0 %v647_v48  ;;  %v792_v48 = vld [vmem:[#allocation10 + $0xb0] sm:$0xff] }
 0x46b   :  { %1369 = vmatprep.subr.mxu0 %v646_v49 }
 0x46c   :  { %1370 = vmatpush3.msra.mxu0 %v646_v49  ;;  %v791_v49 = vld [vmem:[#allocation10 + $0xa8] sm:$0xff] }
 0x46d   :  { %1371 = vmatprep.subr.mxu0 %v645_v50 }
 0x46e   :  { %1372 = vmatpush3.msra.mxu0 %v645_v50  ;;  %v790_v50 = vld [vmem:[#allocation10 + $0xa0] sm:$0xff] }
 0x46f   :  { %1373 = vmatprep.subr.mxu0 %v644_v51 }
 0x470   :  { %1374 = vmatpush3.msra.mxu0 %v644_v51  ;;  %v789_v51 = vld [vmem:[#allocation10 + $0x98] sm:$0xff] }
 0x471   :  { %1375 = vmatprep.subr.mxu0 %v643_v52 }
 0x472   :  { %1376 = vmatpush3.msra.mxu0 %v643_v52  ;;  %v788_v52 = vld [vmem:[#allocation10 + $0x90] sm:$0xff] }
 0x473   :  { %1377 = vmatprep.subr.mxu0 %v642_v53 }
 0x474   :  { %1378 = vmatpush3.msra.mxu0 %v642_v53  ;;  %v787_v53 = vld [vmem:[#allocation10 + $0x88] sm:$0xff] }
 0x475   :  { %1379 = vmatprep.subr.mxu0 %v641_v54 }
 0x476   :  { %1380 = vmatpush3.msra.mxu0 %v641_v54  ;;  %v786_v54 = vld [vmem:[#allocation10 + $0x80] sm:$0xff] }
 0x477   :  { %1381 = vmatprep.subr.mxu0 %v640_v55 }
 0x478   :  { %1382 = vmatpush3.msra.mxu0 %v640_v55 }
 0x521   :  { %v1323_v7 = vpop.f32.mrf.mxu0 }
 0x522   :  { %v497_v8 = vadd.f32 %v1323_v7, %v1083_v6 }
 0x523   :  { %v491_v9 = vpop.f32.mrf.mxu0 }
 0x524   :  { %v501_v10 = vmax.f32 %v497_v8, 0.0  ;;  %v492_v11 = vadd.f32 %v1083_v6, %v491_v9 }
 0x526   :  { %v500_v13 = vmax.f32 %v492_v11, 0.0  ;;  %v503_v14 = vadd.f32 %v501_v10, %v399_v12  ;;  %v639_v11 = vld [vmem:[#allocation10 + $0x18] sm:$0xff]  ;;  %v638_v12 = vld [vmem:[#allocation10 + $0x10] sm:$0xff] }
 0x527   :  { %1383 = vmatprep.subr.mxu0 %v639_v11 }
 0x528   :  { %506 = vadd.xlane.f32.xlu1 %v503_v14  ;;  %v502_v16 = vadd.f32 %v500_v13, %v398_v15  ;;  %1384 = vmatpush3.msra.mxu0 %v639_v11  ;;  %v637_v13 = vld [vmem:[#allocation10 + $0x8] sm:$0xff] }
 0x529   :  { %1385 = vmatprep.subr.mxu0 %v638_v12 }
 0x52a   :  { %504 = vadd.xlane.f32.xlu0 %v502_v16  ;;  %1386 = vmatpush3.msra.mxu0 %v638_v12  ;;  %v1090_v12 = vld [vmem:[%s1875_s8 + $0x1] ss:$0 sm:$0xff] }
 0x52b   :  { %1387 = vmatprep.subr.mxu0 %v637_v13 }
 0x52c   :  { %1388 = vmatpush3.msra.mxu0 %v637_v13 }
 0x5b1   :  { %v507_v21 = vpop.xlane.xlu1 %506 }
 0x5b2   :  { %v509_v23 = vmul.f32 0.03125, %v507_v21 }
 0x5b3   :  { %v505_v24 = vpop.xlane.xlu0 %504 }
 0x5b4   :  { %v511_v25 = vmul.f32 %v1736_v31, %v509_v23  ;;  %v508_v26 = vmul.f32 0.03125, %v505_v24  ;;  %v1085_v23 = vld [vmem:[%s1875_s8] ss:$0 sm:$0xff] }
 0x5b6   :  { %v510_v19 = vmul.f32 %v1736_v31, %v508_v26  ;;  %v1785_v27 = vsub.f32 %v503_v14, %v511_v25  ;;  %v544_v31 = vld [vmem:[#allocation8 + $0x50] sm:$0xff]  ;;  %v636_v14 = vld [vmem:[#allocation10] sm:$0xff] }
 0x5b7   :  { %1334 = vmatprep.subr.mxu1 %v544_v31  ;;  %1389 = vmatprep.subr.mxu0 %v636_v14 }
 0x5b8   :  { %v515_v22 = vmul.f32 %v1785_v27, %v1785_v27  ;;  %v1789_v17 = vsub.f32 %v502_v16, %v510_v19  ;;  %1335 = vmatpush3.msra.mxu1 %v544_v31  ;;  %1390 = vmatpush3.msra.mxu0 %v636_v14 }
 0x5b9   :  { %1336 = vmatprep.subr.mxu1 %v543_v34 }
 0x5ba   :  { %518 = vadd.xlane.f32.xlu1 %v515_v22  ;;  %v514_v28 = vmul.f32 %v1789_v17, %v1789_v17  ;;  %1337 = vmatpush3.msra.mxu1 %v543_v34 }
 0x5bb   :  { %1338 = vmatprep.subr.mxu1 %v542_v35 }
 0x5bc   :  { %516 = vadd.xlane.f32.xlu0 %v514_v28  ;;  %1339 = vmatpush3.msra.mxu1 %v542_v35 }
 0x5bd   :  { %1340 = vmatprep.subr.mxu1 %v541_v36 }
 0x5be   :  { %1341 = vmatpush3.msra.mxu1 %v541_v36 }
 0x5bf   :  { %1342 = vmatprep.subr.mxu1 %v540_v37 }
 0x5c0   :  { %1343 = vmatpush3.msra.mxu1 %v540_v37 }
 0x5c1   :  { %1344 = vmatprep.subr.mxu1 %v539_v38 }
 0x5c2   :  { %1345 = vmatpush3.msra.mxu1 %v539_v38 }
 0x5c3   :  { %1346 = vmatprep.subr.mxu1 %v538_v39 }
 0x5c4   :  { %1347 = vmatpush3.msra.mxu1 %v538_v39 }
 0x5c5   :  { %1348 = vmatprep.subr.mxu1 %v537_v40 }
 0x5c6   :  { %1349 = vmatpush3.msra.mxu1 %v537_v40 }
 0x5c7   :  { %1350 = vmatprep.subr.mxu1 %v536_v41 }
 0x5c8   :  { %1351 = vmatpush3.msra.mxu1 %v536_v41 }
 0x5c9   :  { %1352 = vmatprep.subr.mxu1 %v535_v42 }
 0x5ca   :  { %1353 = vmatpush3.msra.mxu1 %v535_v42 }
 0x5cb   :  { %1354 = vmatprep.subr.mxu1 %v534_v43 }
 0x5cc   :  { %1355 = vmatpush3.msra.mxu1 %v534_v43  ;;  %v799_v43 = vld [vmem:[#allocation10 + $0xe8] sm:$0xff] }
 0x5cd   :  { %1394 = vmatprep.subr.mxu1 %v801_v32 }
 0x643   :  { %v519_v56 = vpop.xlane.xlu1 %518 }
 0x644   :  { %v521_v57 = vmul.f32 0.03125, %v519_v56 }
 0x645   :  { %v517_v58 = vpop.xlane.xlu0 %516 }
 0x646   :  { %v523_v59 = vmax.f32 %v521_v57, 0.0  ;;  %v520_v60 = vmul.f32 0.03125, %v517_v58 }
 0x648   :  { %v525_v61 = vadd.f32 1e-05, %v523_v59  ;;  %v522_v62 = vmax.f32 %v520_v60, 0.0 }
 0x64a   :  { %1481 = vrsqrt.f32 %v525_v61  ;;  %v524_v63 = vadd.f32 1e-05, %v522_v62 }
 0x64c   :  { %1483 = vrsqrt.f32 %v524_v63 }
 0x657   :  { %v1482_v0 = vpop.eup %1481 }
 0x658   :  { %v529_v1 = vmul.f32 %v1482_v0, %v1785_v27  ;;  %v1822_v0 = vld [vmem:[%s1876_s9] ss:$0 sm:$0xff] }
 0x659   :  { %v1484_v3 = vpop.eup %1483 }
 0x65a   :  { %v528_v6 = vmul.f32 %v1484_v3, %v1789_v17  ;;  %v531_v7 = vmul.f32 %v1751_v2, %v529_v1 }
 0x65c   :  { %v530_v8 = vmul.f32 %v1751_v2, %v528_v6  ;;  %v533_v10 = vadd.f32 %v1754_v5, %v531_v7  ;;  %v1084_v2 = vld [vmem:[%s1873_s6] ss:$0 sm:$0xff] }
 0x65e   :  { %v532_v9 = vadd.f32 %v1754_v5, %v530_v8  ;;  %v1828_v8 = vld [vmem:[%s1877_s10] ss:$0 sm:$0xff] }
 0x660   :  { %1356 = vmatprep.mubr.f32.mxu1 %v532_v9 }
 0x661   :  { %1357 = vmatmul.mubr.f32.vlgmr.msra.gmra.mxu1 %v533_v10 }
 0x662   :  { %1395 = vmatpush3.msra.mxu1 %v801_v32 }
 0x663   :  { %1396 = vmatprep.subr.mxu1 %v800_v33 }
 0x664   :  { %1397 = vmatpush3.msra.mxu1 %v800_v33 }
 0x665   :  { %1398 = vmatprep.subr.mxu1 %v799_v43 }
 0x666   :  { %1399 = vmatpush3.msra.mxu1 %v799_v43  ;;  %v927_v43 = vld [vmem:[#allocation10 + $0x128] sm:$0xff] }
 0x667   :  { %1400 = vmatprep.subr.mxu1 %v798_v29 }
 0x668   :  { %1401 = vmatpush3.msra.mxu1 %v798_v29  ;;  %v926_v29 = vld [vmem:[#allocation10 + $0x120] sm:$0xff] }
 0x669   :  { %1402 = vmatprep.subr.mxu1 %v797_v30 }
 0x66a   :  { %1403 = vmatpush3.msra.mxu1 %v797_v30  ;;  %v925_v30 = vld [vmem:[#allocation10 + $0x118] sm:$0xff] }
 0x66b   :  { %1404 = vmatprep.subr.mxu1 %v796_v44 }
 0x66c   :  { %1405 = vmatpush3.msra.mxu1 %v796_v44  ;;  %v924_v44 = vld [vmem:[#allocation10 + $0x110] sm:$0xff] }
 0x66d   :  { %1406 = vmatprep.subr.mxu1 %v795_v45 }
 0x66e   :  { %1407 = vmatpush3.msra.mxu1 %v795_v45  ;;  %v923_v45 = vld [vmem:[#allocation10 + $0x108] sm:$0xff] }
 0x66f   :  { %1408 = vmatprep.subr.mxu1 %v794_v46 }
 0x670   :  { %1409 = vmatpush3.msra.mxu1 %v794_v46  ;;  %v922_v46 = vld [vmem:[#allocation10 + $0x100] sm:$0xff] }
 0x671   :  { %1410 = vmatprep.subr.mxu1 %v793_v47 }
 0x672   :  { %1411 = vmatpush3.msra.mxu1 %v793_v47 }
 0x673   :  { %1412 = vmatprep.subr.mxu1 %v792_v48 }
 0x674   :  { %1413 = vmatpush3.msra.mxu1 %v792_v48 }
 0x675   :  { %1414 = vmatprep.subr.mxu1 %v791_v49 }
 0x676   :  { %1415 = vmatpush3.msra.mxu1 %v791_v49 }
 0x677   :  { %1416 = vmatprep.subr.mxu1 %v790_v50 }
 0x678   :  { %1417 = vmatpush3.msra.mxu1 %v790_v50 }
 0x679   :  { %1418 = vmatprep.subr.mxu1 %v789_v51 }
 0x67a   :  { %1419 = vmatpush3.msra.mxu1 %v789_v51 }
 0x67b   :  { %1420 = vmatprep.subr.mxu1 %v788_v52 }
 0x67c   :  { %1421 = vmatpush3.msra.mxu1 %v788_v52 }
 0x67d   :  { %1422 = vmatprep.subr.mxu1 %v787_v53 }
 0x67e   :  { %1423 = vmatpush3.msra.mxu1 %v787_v53 }
 0x67f   :  { %1424 = vmatprep.subr.mxu1 %v786_v54 }
 0x680   :  { %1425 = vmatpush3.msra.mxu1 %v786_v54 }
 0x721   :  { %v1358_v15 = vpop.f32.mrf.mxu1 }
 0x722   :  { %v629_v5 = vadd.f32 %v1358_v15, %v1084_v2 }
 0x723   :  { %v623_v16 = vpop.f32.mrf.mxu1 }
 0x724   :  { %v624_v18 = vadd.f32 %v1084_v2, %v623_v16  ;;  %v1804_v21 = vmax.f32 %v629_v5, 0.0 }
 0x726   :  { %v1802_v20 = vmax.f32 %v624_v18, 0.0 }
 0x728   :  { %1391 = vmatprep.mubr.f32.mxu0 %v1802_v20 }
 0x729   :  { %1392 = vmatmul.mubr.f32.vlgmr.msra.gmra.mxu0 %v1804_v21 }
 0x7e9   :  { %v1393_v24 = vpop.f32.mrf.mxu0 }
 0x7ea   :  { %v731_v25 = vadd.f32 %v1393_v24, %v1085_v23 }
 0x7eb   :  { %v725_v26 = vpop.f32.mrf.mxu0 }
 0x7ec   :  { %v735_v19 = vmax.f32 %v731_v25, 0.0  ;;  %v726_v27 = vadd.f32 %v1085_v23, %v725_v26  ;;  %v937_v26 = vld [vmem:[#allocation10 + $0x178] sm:$0xff] }
 0x7ed   :  { %1429 = vmatprep.subr.mxu0 %v937_v26 }
 0x7ee   :  { %v734_v22 = vmax.f32 %v726_v27, 0.0  ;;  %v737_v17 = vadd.f32 %v735_v19, %v1804_v21  ;;  %v936_v19 = vld [vmem:[#allocation10 + $0x170] sm:$0xff]  ;;  %1430 = vmatpush3.msra.mxu0 %v937_v26 }
 0x7ef   :  { %1431 = vmatprep.subr.mxu0 %v936_v19 }
 0x7f0   :  { %740 = vadd.xlane.f32.xlu1 %v737_v17  ;;  %v736_v28 = vadd.f32 %v734_v22, %v1802_v20  ;;  %1432 = vmatpush3.msra.mxu0 %v936_v19 }
 0x7f2   :  { %738 = vadd.xlane.f32.xlu0 %v736_v28 }
 0x879   :  { %v741_v31 = vpop.xlane.xlu1 %740 }
 0x87a   :  { %v743_v34 = vmul.f32 0.015625, %v741_v31 }
 0x87b   :  { %v739_v35 = vpop.xlane.xlu0 %738 }
 0x87c   :  { %v748_v36 = vmul.f32 %v1815_v4, %v743_v34  ;;  %v742_v37 = vmul.f32 0.015625, %v739_v35  ;;  %v935_v35 = vld [vmem:[#allocation10 + $0x168] sm:$0xff] }
 0x87d   :  { %1433 = vmatprep.subr.mxu0 %v935_v35 }
 0x87e   :  { %v747_v38 = vmul.f32 %v1815_v4, %v742_v37  ;;  %v750_v39 = vsub.f32 %v737_v17, %v748_v36  ;;  %1434 = vmatpush3.msra.mxu0 %v935_v35  ;;  %v934_v36 = vld [vmem:[#allocation10 + $0x160] sm:$0xff]  ;;  %v933_v37 = vld [vmem:[#allocation10 + $0x158] sm:$0xff] }
 0x87f   :  { %1435 = vmatprep.subr.mxu0 %v934_v36 }
 0x880   :  { %v752_v40 = vmul.f32 %v750_v39, %v750_v39  ;;  %v749_v41 = vsub.f32 %v736_v28, %v747_v38  ;;  %1436 = vmatpush3.msra.mxu0 %v934_v36  ;;  %v932_v38 = vld [vmem:[#allocation10 + $0x150] sm:$0xff] }
 0x881   :  { %1437 = vmatprep.subr.mxu0 %v933_v37 }
 0x882   :  { %755 = vadd.xlane.f32.xlu1 %v752_v40  ;;  %v751_v42 = vmul.f32 %v749_v41, %v749_v41  ;;  %1438 = vmatpush3.msra.mxu0 %v933_v37  ;;  %v930_v40 = vld [vmem:[#allocation10 + $0x140] sm:$0xff] }
 0x883   :  { %1439 = vmatprep.subr.mxu0 %v932_v38 }
 0x884   :  { %753 = vadd.xlane.f32.xlu0 %v751_v42  ;;  %1440 = vmatpush3.msra.mxu0 %v932_v38  ;;  %v928_v42 = vld [vmem:[#allocation10 + $0x130] sm:$0xff] }
 0x90b   :  { %v756_v55 = vpop.xlane.xlu1 %755 }
 0x90c   :  { %v758_v56 = vmul.f32 0.015625, %v756_v55 }
 0x90d   :  { %v754_v57 = vpop.xlane.xlu0 %753 }
 0x90e   :  { %v760_v58 = vmax.f32 %v758_v56, 0.0  ;;  %v757_v59 = vmul.f32 0.015625, %v754_v57 }
 0x910   :  { %v762_v60 = vadd.f32 1e-05, %v760_v58  ;;  %v759_v61 = vmax.f32 %v757_v59, 0.0 }
 0x912   :  { %1485 = vrsqrt.f32 %v762_v60  ;;  %v761_v62 = vadd.f32 1e-05, %v759_v61 }
 0x914   :  { %1487 = vrsqrt.f32 %v761_v62 }
 0x91f   :  { %v1486_v63 = vpop.eup %1485 }
 0x920   :  { %v766_v1 = vmul.f32 %v1486_v63, %v750_v39  ;;  %v931_v39 = vld [vmem:[#allocation10 + $0x148] sm:$0xff]  ;;  %v1092_v63 = vld [vmem:[%s1875_s8 + $0x2] ss:$0 sm:$0xff]  ;;  %s1633_s8 = smov [#allocation11]  }
 0x921   :  { %v1488_v3 = vpop.eup %1487  ;;  %1441 = vmatprep.subr.mxu0 %v931_v39  ;;  %s1062_s17 = sshll.u32 %s1633_s8, 4  ;;  %s1063_s17 = int_to_ptr.vmem [resolvable:$true] %s1062_s17 }
 0x922   :  { %v765_v6 = vmul.f32 %v1488_v3, %v749_v41  ;;  %v774_v7 = vmul.f32 %v1822_v0, %v766_v1  ;;  %1442 = vmatpush3.msra.mxu0 %v931_v39  ;;  %v929_v41 = vld [vmem:[#allocation10 + $0x138] sm:$0xff]  ;;  %s1597_s18 = scalar_lea.vmem %s1063_s17, 256  ;;  %p1602_p12 = scmp.lt.s32.totalorder %s1063_s17, %s1063_s17 }
 0x923   :  { %1443 = vmatprep.subr.mxu0 %v930_v40  ;;  %p1598_p11 = scmp.ne.s32.totalorder %s1063_s17, %s1597_s18  ;;  %p1603_p13 = scmp.lt.s32.totalorder %s1597_s18, %s1597_s18 }
 0x924   :  { %v773_v9 = vmul.f32 %v1822_v0, %v765_v6  ;;  %v782_v11 = vadd.f32 %v1828_v8, %v774_v7  ;;  %1444 = vmatpush3.msra.mxu0 %v930_v40 }
 0x925   :  { %1445 = vmatprep.subr.mxu0 %v929_v41  ;;  %p1604_p0 = por %p1603_p13, %p1602_p12 }
 0x926   :  { %v781_v10 = vadd.f32 %v1828_v8, %v773_v9  ;;  %v1837_v16 = vadd.f32 %v782_v11, %v1804_v21  ;;  %1446 = vmatpush3.msra.mxu0 %v929_v41 }
 0x927   :  { %1447 = vmatprep.subr.mxu0 %v928_v42  ;;  %p1605_p1 = pnand %p1604_p0, %p1598_p11 }
 0x928   :  { %1426 = vmatprep.mubr.f32.mxu1 %v781_v10  ;;  %v1841_v24 = vadd.f32 %v781_v10, %v1802_v20  ;;  %1448 = vmatpush3.msra.mxu0 %v928_v42 }
 0x929   :  { %1427 = vmatmul.mubr.f32.vlgmr.msra.gmra.mxu1 %v782_v11  ;;  %1449 = vmatprep.subr.mxu0 %v927_v43 }
 0x92a   :  { %1450 = vmatpush3.msra.mxu0 %v927_v43 }
 0x92b   :  { %1451 = vmatprep.subr.mxu0 %v926_v29 }
 0x92c   :  { %1452 = vmatpush3.msra.mxu0 %v926_v29 }
 0x92d   :  { %1453 = vmatprep.subr.mxu0 %v925_v30 }
 0x92e   :  { %1454 = vmatpush3.msra.mxu0 %v925_v30 }
 0x92f   :  { %1455 = vmatprep.subr.mxu0 %v924_v44 }
 0x930   :  { %1456 = vmatpush3.msra.mxu0 %v924_v44 }
 0x931   :  { %1457 = vmatprep.subr.mxu0 %v923_v45 }
 0x932   :  { %1458 = vmatpush3.msra.mxu0 %v923_v45 }
 0x933   :  { %1459 = vmatprep.subr.mxu0 %v922_v46 }
 0x934   :  { %1460 = vmatpush3.msra.mxu0 %v922_v46 }
 0x9e9   :  { %v1428_v13 = vpop.f32.mrf.mxu1 }
 0x9ea   :  { %v882_v14 = vadd.f32 %v1428_v13, %v1090_v12 }
 0x9eb   :  { %v876_v2 = vpop.f32.mrf.mxu1 }
 0x9ec   :  { %v886_v15 = vmax.f32 %v882_v14, 0.0  ;;  %v877_v5 = vadd.f32 %v1090_v12, %v876_v2 }
 0x9ee   :  { %v885_v18 = vmax.f32 %v877_v5, 0.0  ;;  %v888_v23 = vadd.f32 %v886_v15, %v1837_v16 }
 0x9f0   :  { %891 = vadd.xlane.f32.xlu1 %v888_v23  ;;  %v887_v25 = vadd.f32 %v885_v18, %v1841_v24 }
 0x9f2   :  { %889 = vadd.xlane.f32.xlu0 %v887_v25 }
 0xa79   :  { %v892_v27 = vpop.xlane.xlu1 %891 }
 0xa7a   :  { %v894_v22 = vmul.f32 0.015625, %v892_v27 }
 0xa7b   :  { %v890_v21 = vpop.xlane.xlu0 %889 }
 0xa7c   :  { %v896_v17 = vmul.f32 %v1815_v4, %v894_v22  ;;  %v893_v28 = vmul.f32 0.015625, %v890_v21 }
 0xa7e   :  { %v895_v32 = vmul.f32 %v1815_v4, %v893_v28  ;;  %v898_v20 = vsub.f32 %v888_v23, %v896_v17 }
 0xa80   :  { %v900_v33 = vmul.f32 %v898_v20, %v898_v20  ;;  %v897_v31 = vsub.f32 %v887_v25, %v895_v32 }
 0xa82   :  { %903 = vadd.xlane.f32.xlu1 %v900_v33  ;;  %v899_v34 = vmul.f32 %v897_v31, %v897_v31 }
 0xa84   :  { %901 = vadd.xlane.f32.xlu0 %v899_v34 }
 0xb0b   :  { %v904_v47 = vpop.xlane.xlu1 %903 }
 0xb0c   :  { %v906_v48 = vmul.f32 0.015625, %v904_v47 }
 0xb0d   :  { %v902_v49 = vpop.xlane.xlu0 %901 }
 0xb0e   :  { %v908_v50 = vmax.f32 %v906_v48, 0.0  ;;  %v905_v51 = vmul.f32 0.015625, %v902_v49 }
 0xb10   :  { %v910_v52 = vadd.f32 1e-05, %v908_v50  ;;  %v907_v53 = vmax.f32 %v905_v51, 0.0 }
 0xb12   :  { %1489 = vrsqrt.f32 %v910_v52  ;;  %v909_v54 = vadd.f32 1e-05, %v907_v53 }
 0xb14   :  { %1491 = vrsqrt.f32 %v909_v54 }
 0xb1f   :  { %v1490_v55 = vpop.eup %1489 }
 0xb20   :  { %v914_v56 = vmul.f32 %v1490_v55, %v898_v20 }
 0xb21   :  { %v1492_v57 = vpop.eup %1491 }
 0xb22   :  { %v913_v58 = vmul.f32 %v1492_v57, %v897_v31  ;;  %v916_v59 = vmul.f32 %v1822_v0, %v914_v56 }
 0xb24   :  { %v915_v60 = vmul.f32 %v1822_v0, %v913_v58  ;;  %v918_v62 = vadd.f32 %v1828_v8, %v916_v59 }
 0xb26   :  { %v917_v61 = vadd.f32 %v1828_v8, %v915_v60  ;;  %v920_v10 = vadd.f32 %v918_v62, %v1837_v16 }
 0xb28   :  { %1461 = vmatprep.mubr.f32.mxu0 %v917_v61  ;;  %v919_v13 = vadd.f32 %v917_v61, %v1841_v24 }
 0xb29   :  { %1462 = vmatmul.mubr.f32.vlgmr.msra.gmra.mxu0 %v918_v62 }
 0xbe9   :  { %v1463_v1 = vpop.f32.mrf.mxu0 }
 0xbea   :  { %v1018_v3 = vadd.f32 %v1463_v1, %v1092_v63 }
 0xbeb   :  { %v1012_v6 = vpop.f32.mrf.mxu0 }
 0xbec   :  { %v1022_v7 = vmax.f32 %v1018_v3, 0.0  ;;  %v1013_v9 = vadd.f32 %v1092_v63, %v1012_v6 }
 0xbee   :  { %v1021_v11 = vmax.f32 %v1013_v9, 0.0  ;;  %v1024_v12 = vadd.f32 %v1022_v7, %v920_v10 }
 0xbf0   :  { %1027 = vadd.xlane.f32.xlu1 %v1024_v12  ;;  %v1023_v14 = vadd.f32 %v1021_v11, %v919_v13 }
 0xbf2   :  { %1025 = vadd.xlane.f32.xlu0 %v1023_v14 }
 0xc79   :  { %v1028_v2 = vpop.xlane.xlu1 %1027 }
 0xc7a   :  { %v1030_v15 = vmul.f32 0.015625, %v1028_v2 }
 0xc7b   :  { %v1026_v5 = vpop.xlane.xlu0 %1025 }
 0xc7c   :  { %v1032_v18 = vmul.f32 %v1815_v4, %v1030_v15  ;;  %v1029_v23 = vmul.f32 0.015625, %v1026_v5 }
 0xc7e   :  { %v1031_v25 = vmul.f32 %v1815_v4, %v1029_v23  ;;  %v1034_v26 = vsub.f32 %v1024_v12, %v1032_v18 }
 0xc80   :  { %v1036_v19 = vmul.f32 %v1034_v26, %v1034_v26  ;;  %v1033_v27 = vsub.f32 %v1023_v14, %v1031_v25 }
 0xc82   :  { %1039 = vadd.xlane.f32.xlu1 %v1036_v19  ;;  %v1035_v16 = vmul.f32 %v1033_v27, %v1033_v27 }
 0xc84   :  { %1037 = vadd.xlane.f32.xlu0 %v1035_v16 }
 0xd0b   :  { %v1040_v22 = vpop.xlane.xlu1 %1039 }
 0xd0c   :  { %v1042_v21 = vmul.f32 0.015625, %v1040_v22 }
 0xd0d   :  { %v1038_v24 = vpop.xlane.xlu0 %1037 }
 0xd0e   :  { %v1044_v17 = vmax.f32 %v1042_v21, 0.0  ;;  %v1041_v28 = vmul.f32 0.015625, %v1038_v24 }
 0xd10   :  { %v1046_v32 = vadd.f32 1e-05, %v1044_v17  ;;  %v1043_v20 = vmax.f32 %v1041_v28, 0.0 }
 0xd12   :  { %1493 = vrsqrt.f32 %v1046_v32  ;;  %v1045_v33 = vadd.f32 1e-05, %v1043_v20 }
 0xd14   :  { %1495 = vrsqrt.f32 %v1045_v33 }
 0xd1f   :  { %v1494_v31 = vpop.eup %1493 }
 0xd20   :  { %v1050_v34 = vmul.f32 %v1494_v31, %v1034_v26 }
 0xd21   :  { %v1496_v35 = vpop.eup %1495 }
 0xd22   :  { %v1049_v4 = vmul.f32 %v1496_v35, %v1033_v27  ;;  %v1052_v36 = vmul.f32 %v1822_v0, %v1050_v34 }
 0xd24   :  { %v1051_v37 = vmul.f32 %v1822_v0, %v1049_v4  ;;  %v1054_v38 = vadd.f32 %v1828_v8, %v1052_v36 }
 0xd26   :  { %v1053_v39 = vadd.f32 %v1828_v8, %v1051_v37  ;;  %1056 = vst [vmem:[#allocation11 + $0x8] sm:$0xff] %v1054_v38 }
 0xd28   :  { %1055 = vst [vmem:[#allocation11] sm:$0xff] %v1053_v39 }
 0xd29   :  { %1608 = shalt.err (!%p1605_p1)
}
 0xd2a   :  { %1068 = dma.vmem_to_hbm [thread:$0]  %s1063_s17, 256, %s1878_s11, [#allocation4], %s1627_s22, %s1627_s22, %s1628_s23  }
 0xd2b   :  { %1623 = dma.done.wait [#allocation4], 256  }
 0xd2c   :  { %1624 = vsyncadd [#allocation4], 4294967040 }
 0xd2d   :  { %1072 = vsyncpa [#allocation3], 1 }
 0xd2e   :  { %1073 = vsyncpa [#allocation6], 1 }
 0xd2f   :  { %1074 = vsyncpa [#allocation9], 1 }
 0xd30   :  { %1075 = vsyncpa [#allocation4], 1 }

// kernel: tpu_custom_call.1
= control target key start
LH: loop header
LB: loop body
LE: loop exit
PB: predicated region body
PF: predicated region fallthrough
CT: control target
= control target key end

     0   :  { %16 = vsyncpa [#allocation3], 0  ;;  %s1867_s0 = inlined_call_operand.hbm [shape: f32[16,128], index: 0, kind: input, shape index: {}]   ;;  %s1868_s1 = inlined_call_operand.hbm [shape: f32[3,128,128], index: 1, kind: input, shape index: {}]   ;;  %s1869_s2 = inlined_call_operand.vmem [shape: f32[3,1,128], index: 2, kind: input, shape index: {}]   ;;  %s1870_s3 = inlined_call_operand.vmem [shape: f32[1,128], index: 3, kind: input, shape index: {}]   ;;  %s1871_s4 = inlined_call_operand.hbm [shape: f32[1,128], index: 4, kind: input, shape index: {}]   ;;  %s1872_s5 = inlined_call_operand.hbm [shape: f32[128,128], index: 5, kind: input, shape index: {}]   ;;  %s1873_s6 = inlined_call_operand.vmem [shape: f32[1,128], index: 6, kind: input, shape index: {}]   ;;  %s1874_s7 = inlined_call_operand.hbm [shape: f32[3,128,128], index: 7, kind: input, shape index: {}]   ;;  %s1875_s8 = inlined_call_operand.vmem [shape: f32[3,1,128], index: 8, kind: input, shape index: {}]   ;;  %s1876_s9 = inlined_call_operand.vmem [shape: f32[1,128], index: 9, kind: input, shape index: {}]   ;;  %s1877_s10 = inlined_call_operand.vmem [shape: f32[1,128], index: 10, kind: input, shape index: {}]   ;;  %s1878_s11 = inlined_call_operand.hbm [shape: f32[16,128], index: 11, kind: output, shape index: {}]  }
   0x1   :  { %17 = vsyncpa [#allocation6], 0 }
   0x2   :  { %18 = vsyncpa [#allocation9], 0 }
   0x3   :  { %19 = vsyncpa [#allocation4], 0  ;;  %s1625_s17 = smov [#allocation5]   ;;  %s1626_s19 = smov [#allocation8]  }
   0x4   :  { %s37_s18 = sshll.u32 %s1625_s17, 4  ;;  %s63_s20 = sshll.u32 %s1626_s19, 4  ;;  %s38_s18 = int_to_ptr.vmem [resolvable:$true] %s37_s18  ;;  %s64_s20 = int_to_ptr.vmem [resolvable:$true] %s63_s20 }
   0x5   :  { %s1505_s21 = scalar_lea.vmem %s38_s18, 6144  ;;  %p1510_p1 = scmp.lt.s32.totalorder %s38_s18, %s38_s18 }
   0x6   :  { %p1506_p0 = scmp.ne.s32.totalorder %s38_s18, %s1505_s21  ;;  %p1511_p2 = scmp.lt.s32.totalorder %s1505_s21, %s1505_s21 }
   0x8   :  { %p1512_p3 = por %p1511_p2, %p1510_p1 }
   0xa   :  { %p1513_p4 = pnand %p1512_p3, %p1506_p0 }
   0xc   :  { %1516 = shalt.err (!%p1513_p4)
}
   0xd   :  { %s1627_s22 = smov 128   ;;  %s1628_s23 = smov 8  }
   0xe   :  { %43 = dma.hbm_to_vmem [thread:$0]  %s1868_s1, 6144, %s38_s18, [#allocation6], %s1627_s22, %s1627_s22, %s1628_s23  }
   0xf   :  { %s1525_s26 = scalar_lea.vmem %s64_s20, 2048  ;;  %p1530_p6 = scmp.lt.s32.totalorder %s64_s20, %s64_s20 }
  0x10   :  { %p1526_p5 = scmp.ne.s32.totalorder %s64_s20, %s1525_s26  ;;  %p1531_p7 = scmp.lt.s32.totalorder %s1525_s26, %s1525_s26 }
  0x12   :  { %p1532_p8 = por %p1531_p7, %p1530_p6 }
  0x14   :  { %p1533_p9 = pnand %p1532_p8, %p1526_p5 }
  0x16   :  { %1536 = shalt.err (!%p1533_p9)
}
  0x17   :  { %69 = dma.hbm_to_vmem [thread:$0]  %s1872_s5, 2048, %s64_s20, [#allocation9], %s1627_s22, %s1627_s22, %s1628_s23  }
  0x18   :  { %s1629_s29 = smov [#allocation2]   ;;  %s1630_s12 = smov [#allocation7]  }
  0x19   :  { %s25_s30 = sshll.u32 %s1629_s29, 4  ;;  %s54_s13 = sshll.u32 %s1630_s12, 4  ;;  %s26_s30 = int_to_ptr.vmem [resolvable:$true] %s25_s30  ;;  %s55_s13 = int_to_ptr.vmem [resolvable:$true] %s54_s13 }
  0x1a   :  { %s1545_s1 = scalar_lea.vmem %s26_s30, 256  ;;  %p1550_p11 = scmp.lt.s32.totalorder %s26_s30, %s26_s30 }
  0x1b   :  { %p1546_p10 = scmp.ne.s32.totalorder %s26_s30, %s1545_s1  ;;  %p1551_p12 = scmp.lt.s32.totalorder %s1545_s1, %s1545_s1 }
  0x1d   :  { %p1552_p13 = por %p1551_p12, %p1550_p11 }
  0x1f   :  { %p1553_p0 = pnand %p1552_p13, %p1546_p10 }
  0x21   :  { %1556 = shalt.err (!%p1553_p0)
}
  0x22   :  { %31 = dma.hbm_to_vmem [thread:$0]  %s1867_s0, 256, %s26_s30, [#allocation3], %s1627_s22, %s1627_s22, %s1628_s23  }
  0x23   :  { %s1565_s5 = scalar_lea.vmem %s55_s13, 16  ;;  %s1569_s16 = scalar_lea.vmem %s55_s13, 32 }
  0x24   :  { %p1566_p1 = scmp.ne.s32.totalorder %s55_s13, %s1565_s5  ;;  %p1570_p2 = scmp.lt.s32.totalorder %s55_s13, %s55_s13 }
  0x25   :  { %p1571_p3 = scmp.lt.s32.totalorder %s1569_s16, %s1565_s5 }
  0x27   :  { %p1572_p4 = por %p1571_p3, %p1570_p2 }
  0x29   :  { %p1573_p5 = pnand %p1572_p4, %p1566_p1 }
  0x2b   :  { %1576 = shalt.err (!%p1573_p5)
}
  0x2c   :  { %57 = dma.hbm_to_vmem [thread:$0]  %s1871_s4, 16, %s55_s13, [#allocation6]  }
  0x2d   :  { %s1631_s19 = smov [#allocation10]  }
  0x2e   :  { %s77_s20 = sshll.u32 %s1631_s19, 4  ;;  %s78_s20 = int_to_ptr.vmem [resolvable:$true] %s77_s20 }
  0x2f   :  { %s1585_s21 = scalar_lea.vmem %s78_s20, 6144  ;;  %p1590_p7 = scmp.lt.s32.totalorder %s78_s20, %s78_s20 }
  0x30   :  { %p1586_p6 = scmp.ne.s32.totalorder %s78_s20, %s1585_s21  ;;  %p1591_p8 = scmp.lt.s32.totalorder %s1585_s21, %s1585_s21 }
  0x32   :  { %p1592_p9 = por %p1591_p8, %p1590_p7 }
  0x34   :  { %p1593_p10 = pnand %p1592_p9, %p1586_p6 }
  0x36   :  { %1596 = shalt.err (!%p1593_p10)
}
  0x37   :  { %83 = dma.hbm_to_vmem [thread:$0]  %s1874_s7, 6144, %s78_s20, [#allocation9], %s1627_s22, %s1627_s22, %s1628_s23  }
  0x38   :  { %1617 = dma.done.wait [#allocation3], 256  }
  0x39   :  { %1618 = vsyncadd [#allocation3], 4294967040 }
  0x3a   :  { %1619 = dma.done.wait [#allocation6], 6160  }
  0x3b   :  { %1620 = vsyncadd [#allocation6], 4294961136 }
  0x3c   :  { %1621 = dma.done.wait [#allocation9], 8192  }
  0x3d   :  { %1622 = vsyncadd [#allocation9], 4294959104  ;;  %v128_v0 = vld [vmem:[#allocation5 + $0x78] sm:$0xff]  ;;  %v127_v1 = vld [vmem:[#allocation5 + $0x70] sm:$0xff]  ;;  %v221_v28 = vlaneseq  ;;  %v1632_v30 = vmov 0.0  }
  0x3e   :  { %1219 = vmatprep.subr.mxu0 %v128_v0  ;;  %v126_v2 = vld [vmem:[#allocation5 + $0x68] sm:$0xff]  ;;  %v125_v3 = vld [vmem:[#allocation5 + $0x60] sm:$0xff]  ;;  %v1721_v4 = vld [vmem:[#allocation2] sm:$0xff] }
  0x3f   :  { %1220 = vmatpush3.msra.mxu0 %v128_v0  ;;  %v124_v5 = vld [vmem:[#allocation5 + $0x58] sm:$0xff]  ;;  %1251 = vmatprep.mubr.f32.mxu0 %v1721_v4  ;;  %v123_v6 = vld [vmem:[#allocation5 + $0x50] sm:$0xff]  ;;  %v122_v7 = vld [vmem:[#allocation5 + $0x48] sm:$0xff]  ;;  %v1732_v29 = vand.u32 127, %v221_v28 }
  0x40   :  { %1221 = vmatprep.subr.mxu0 %v127_v1  ;;  %v121_v8 = vld [vmem:[#allocation5 + $0x40] sm:$0xff]  ;;  %v120_v9 = vld [vmem:[#allocation5 + $0x38] sm:$0xff]  ;;  %v119_v10 = vld [vmem:[#allocation5 + $0x30] sm:$0xff] }
  0x41   :  { %1222 = vmatpush3.msra.mxu0 %v127_v1  ;;  %v118_v11 = vld [vmem:[#allocation5 + $0x28] sm:$0xff]  ;;  %v117_v12 = vld [vmem:[#allocation5 + $0x20] sm:$0xff]  ;;  %v116_v13 = vld [vmem:[#allocation5 + $0x18] sm:$0xff]  ;;  %vm223_vm0 = vcmp.lt.s32.totalorder %v1732_v29, 32  ;;  %vm744_vm1 = vcmp.lt.s32.totalorder %v1732_v29, 64 }
  0x42   :  { %1223 = vmatprep.subr.mxu0 %v126_v2  ;;  %v115_v14 = vld [vmem:[#allocation5 + $0x10] sm:$0xff]  ;;  %v114_v15 = vld [vmem:[#allocation5 + $0x8] sm:$0xff]  ;;  %v113_v16 = vld [vmem:[#allocation5] sm:$0xff]  ;;  %v1736_v31 = vsel %vm223_vm0, 1.0, %v1632_v30 }
  0x43   :  { %1224 = vmatpush3.msra.mxu0 %v126_v2  ;;  %v1724_v17 = vld [vmem:[#allocation2 + $0x8] sm:$0xff]  ;;  %v1076_v19 = vld [vmem:[%s1869_s2] ss:$0 sm:$0xff]  ;;  %v278_v43 = vld [vmem:[#allocation5 + $0xe8] sm:$0xff] }
  0x44   :  { %1225 = vmatprep.subr.mxu0 %v125_v3  ;;  %v280_v27 = vld [vmem:[#allocation5 + $0xf8] sm:$0xff]  ;;  %v279_v42 = vld [vmem:[#allocation5 + $0xf0] sm:$0xff]  ;;  %v277_v44 = vld [vmem:[#allocation5 + $0xe0] sm:$0xff] }
  0x45   :  { %1226 = vmatpush3.msra.mxu0 %v125_v3  ;;  %1254 = vmatprep.subr.mxu1 %v280_v27  ;;  %v276_v45 = vld [vmem:[#allocation5 + $0xd8] sm:$0xff]  ;;  %v275_v46 = vld [vmem:[#allocation5 + $0xd0] sm:$0xff]  ;;  %v274_v47 = vld [vmem:[#allocation5 + $0xc8] sm:$0xff] }
  0x46   :  { %1227 = vmatprep.subr.mxu0 %v124_v5  ;;  %1255 = vmatpush3.msra.mxu1 %v280_v27  ;;  %v273_v48 = vld [vmem:[#allocation5 + $0xc0] sm:$0xff]  ;;  %v272_v49 = vld [vmem:[#allocation5 + $0xb8] sm:$0xff]  ;;  %v271_v50 = vld [vmem:[#allocation5 + $0xb0] sm:$0xff] }
  0x47   :  { %1228 = vmatpush3.msra.mxu0 %v124_v5  ;;  %1256 = vmatprep.subr.mxu1 %v279_v42  ;;  %v270_v51 = vld [vmem:[#allocation5 + $0xa8] sm:$0xff]  ;;  %v269_v52 = vld [vmem:[#allocation5 + $0xa0] sm:$0xff]  ;;  %v268_v53 = vld [vmem:[#allocation5 + $0x98] sm:$0xff] }
  0x48   :  { %1229 = vmatprep.subr.mxu0 %v123_v6  ;;  %1257 = vmatpush3.msra.mxu1 %v279_v42  ;;  %v267_v54 = vld [vmem:[#allocation5 + $0x90] sm:$0xff]  ;;  %v266_v55 = vld [vmem:[#allocation5 + $0x88] sm:$0xff]  ;;  %v265_v56 = vld [vmem:[#allocation5 + $0x80] sm:$0xff] }
  0x49   :  { %1230 = vmatpush3.msra.mxu0 %v123_v6  ;;  %1258 = vmatprep.subr.mxu1 %v278_v43  ;;  %v1751_v2 = vld [vmem:[%s1870_s3] ss:$0 sm:$0xff]  ;;  %v1754_v5 = vld [vmem:[#allocation7] ss:$0 sm:$0xff]  ;;  %v798_v29 = vld [vmem:[#allocation10 + $0xe0] sm:$0xff] }
  0x4a   :  { %1231 = vmatprep.subr.mxu0 %v122_v7  ;;  %1259 = vmatpush3.msra.mxu1 %v278_v43  ;;  %v409_v42 = vld [vmem:[#allocation5 + $0x140] sm:$0xff]  ;;  %v408_v43 = vld [vmem:[#allocation5 + $0x138] sm:$0xff] }
  0x4b   :  { %1232 = vmatpush3.msra.mxu0 %v122_v7  ;;  %1260 = vmatprep.subr.mxu1 %v277_v44 }
  0x4c   :  { %1233 = vmatprep.subr.mxu0 %v121_v8  ;;  %1261 = vmatpush3.msra.mxu1 %v277_v44  ;;  %v407_v44 = vld [vmem:[#allocation5 + $0x130] sm:$0xff] }
  0x4d   :  { %1234 = vmatpush3.msra.mxu0 %v121_v8  ;;  %1262 = vmatprep.subr.mxu1 %v276_v45 }
  0x4e   :  { %1235 = vmatprep.subr.mxu0 %v120_v9  ;;  %1263 = vmatpush3.msra.mxu1 %v276_v45  ;;  %v406_v45 = vld [vmem:[#allocation5 + $0x128] sm:$0xff] }
  0x4f   :  { %1236 = vmatpush3.msra.mxu0 %v120_v9  ;;  %1264 = vmatprep.subr.mxu1 %v275_v46 }
  0x50   :  { %1237 = vmatprep.subr.mxu0 %v119_v10  ;;  %1265 = vmatpush3.msra.mxu1 %v275_v46  ;;  %v405_v46 = vld [vmem:[#allocation5 + $0x120] sm:$0xff] }
  0x51   :  { %1238 = vmatpush3.msra.mxu0 %v119_v10  ;;  %1266 = vmatprep.subr.mxu1 %v274_v47 }
  0x52   :  { %1239 = vmatprep.subr.mxu0 %v118_v11  ;;  %1267 = vmatpush3.msra.mxu1 %v274_v47  ;;  %v404_v47 = vld [vmem:[#allocation5 + $0x118] sm:$0xff] }
  0x53   :  { %1240 = vmatpush3.msra.mxu0 %v118_v11  ;;  %1268 = vmatprep.subr.mxu1 %v273_v48 }
  0x54   :  { %1241 = vmatprep.subr.mxu0 %v117_v12  ;;  %1269 = vmatpush3.msra.mxu1 %v273_v48  ;;  %v403_v48 = vld [vmem:[#allocation5 + $0x110] sm:$0xff] }
  0x55   :  { %1242 = vmatpush3.msra.mxu0 %v117_v12  ;;  %1270 = vmatprep.subr.mxu1 %v272_v49  ;;  %v1081_v12 = vld [vmem:[%s1869_s2 + $0x1] ss:$0 sm:$0xff] }
  0x56   :  { %1243 = vmatprep.subr.mxu0 %v116_v13  ;;  %1271 = vmatpush3.msra.mxu1 %v272_v49  ;;  %v402_v49 = vld [vmem:[#allocation5 + $0x108] sm:$0xff] }
  0x57   :  { %1244 = vmatpush3.msra.mxu0 %v116_v13  ;;  %1272 = vmatprep.subr.mxu1 %v271_v50 }
  0x58   :  { %1245 = vmatprep.subr.mxu0 %v115_v14  ;;  %1273 = vmatpush3.msra.mxu1 %v271_v50  ;;  %v401_v50 = vld [vmem:[#allocation5 + $0x100] sm:$0xff] }
  0x59   :  { %1246 = vmatpush3.msra.mxu0 %v115_v14  ;;  %1274 = vmatprep.subr.mxu1 %v270_v51 }
  0x5a   :  { %1247 = vmatprep.subr.mxu0 %v114_v15  ;;  %1275 = vmatpush3.msra.mxu1 %v270_v51 }
  0x5b   :  { %1248 = vmatpush3.msra.mxu0 %v114_v15  ;;  %1276 = vmatprep.subr.mxu1 %v269_v52 }
  0x5c   :  { %1249 = vmatprep.subr.mxu0 %v113_v16  ;;  %1277 = vmatpush3.msra.mxu1 %v269_v52 }
  0x5d   :  { %1250 = vmatpush3.msra.mxu0 %v113_v16  ;;  %1278 = vmatprep.subr.mxu1 %v268_v53 }
  0x5e   :  { %1252 = vmatmul.mubr.f32.vlgmr.msra.gmra.mxu0 %v1724_v17  ;;  %1279 = vmatpush3.msra.mxu1 %v268_v53 }
  0x5f   :  { %1280 = vmatprep.subr.mxu1 %v267_v54 }
  0x60   :  { %1281 = vmatpush3.msra.mxu1 %v267_v54 }
  0x61   :  { %1282 = vmatprep.subr.mxu1 %v266_v55 }
  0x62   :  { %1283 = vmatpush3.msra.mxu1 %v266_v55 }
  0x63   :  { %1284 = vmatprep.subr.mxu1 %v265_v56 }
  0x64   :  { %1285 = vmatpush3.msra.mxu1 %v265_v56 }
 0x11e   :  { %v1253_v18 = vpop.f32.mrf.mxu0 }
 0x11f   :  { %v208_v21 = vadd.f32 %v1253_v18, %v1076_v19 }
 0x120   :  { %v202_v20 = vpop.f32.mrf.mxu0 }
 0x121   :  { %v203_v22 = vadd.f32 %v1076_v19, %v202_v20  ;;  %v212_v24 = vmax.f32 %v208_v21, 0.0 }
 0x123   :  { %v211_v23 = vmax.f32 %v203_v22, 0.0  ;;  %v214_v26 = vadd.f32 %v212_v24, %v1724_v17  ;;  %v416_v24 = vld [vmem:[#allocation5 + $0x178] sm:$0xff] }
 0x124   :  { %1289 = vmatprep.subr.mxu0 %v416_v24 }
 0x125   :  { %v213_v25 = vadd.f32 %v211_v23, %v1721_v4  ;;  %1290 = vmatpush3.msra.mxu0 %v416_v24 }
 0x127   :  { %215 = vadd.xlane.f32.xlu0 %v213_v25 }
 0x12b   :  { %217 = vadd.xlane.f32.xlu0 %v214_v26 }
 0x1b0   :  { %v216_v32 = vpop.xlane.xlu0 %215 }
 0x1b1   :  { %v219_v33 = vmul.f32 0.03125, %v216_v32 }
 0x1b3   :  { %v226_v34 = vmul.f32 %v1736_v31, %v219_v33 }
 0x1b4   :  { %v218_v35 = vpop.xlane.xlu0 %217 }
 0x1b5   :  { %v220_v36 = vmul.f32 0.03125, %v218_v35  ;;  %v1739_v37 = vsub.f32 %v213_v25, %v226_v34  ;;  %v415_v25 = vld [vmem:[#allocation5 + $0x170] sm:$0xff] }
 0x1b6   :  { %1291 = vmatprep.subr.mxu0 %v415_v25 }
 0x1b7   :  { %v227_v38 = vmul.f32 %v1736_v31, %v220_v36  ;;  %v230_v39 = vmul.f32 %v1739_v37, %v1739_v37  ;;  %1292 = vmatpush3.msra.mxu0 %v415_v25 }
 0x1b9   :  { %232 = vadd.xlane.f32.xlu1 %v230_v39  ;;  %v1744_v40 = vsub.f32 %v214_v26, %v227_v38  ;;  %v413_v38 = vld [vmem:[#allocation5 + $0x160] sm:$0xff]  ;;  %v412_v39 = vld [vmem:[#allocation5 + $0x158] sm:$0xff] }
 0x1bb   :  { %v231_v41 = vmul.f32 %v1744_v40, %v1744_v40 }
 0x1bd   :  { %234 = vadd.xlane.f32.xlu1 %v231_v41  ;;  %v410_v41 = vld [vmem:[#allocation5 + $0x148] sm:$0xff] }
 0x242   :  { %v233_v57 = vpop.xlane.xlu1 %232 }
 0x243   :  { %v236_v58 = vmul.f32 0.03125, %v233_v57 }
 0x245   :  { %v238_v59 = vmax.f32 %v236_v58, 0.0 }
 0x246   :  { %v235_v60 = vpop.xlane.xlu1 %234 }
 0x247   :  { %v240_v61 = vadd.f32 1e-05, %v238_v59  ;;  %v237_v62 = vmul.f32 0.03125, %v235_v60 }
 0x249   :  { %1473 = vrsqrt.f32 %v240_v61  ;;  %v239_v63 = vmax.f32 %v237_v62, 0.0 }
 0x24b   :  { %v241_v0 = vadd.f32 1e-05, %v239_v63 }
 0x24d   :  { %1475 = vrsqrt.f32 %v241_v0 }
 0x256   :  { %v1474_v1 = vpop.eup %1473 }
 0x257   :  { %v244_v3 = vmul.f32 %v1474_v1, %v1739_v37  ;;  %v414_v37 = vld [vmem:[#allocation5 + $0x168] sm:$0xff] }
 0x258   :  { %1293 = vmatprep.subr.mxu0 %v414_v37 }
 0x259   :  { %v252_v6 = vmul.f32 %v1751_v2, %v244_v3  ;;  %1294 = vmatpush3.msra.mxu0 %v414_v37  ;;  %v540_v37 = vld [vmem:[#allocation8 + $0x30] sm:$0xff] }
 0x25a   :  { %v1476_v7 = vpop.eup %1475  ;;  %1295 = vmatprep.subr.mxu0 %v413_v38 }
 0x25b   :  { %v260_v8 = vadd.f32 %v1754_v5, %v252_v6  ;;  %v245_v9 = vmul.f32 %v1476_v7, %v1744_v40  ;;  %1296 = vmatpush3.msra.mxu0 %v413_v38  ;;  %v411_v40 = vld [vmem:[#allocation5 + $0x150] sm:$0xff] }
 0x25c   :  { %1297 = vmatprep.subr.mxu0 %v412_v39  ;;  %v1083_v6 = vld [vmem:[%s1869_s2 + $0x2] ss:$0 sm:$0xff]  ;;  %v539_v38 = vld [vmem:[#allocation8 + $0x28] sm:$0xff] }
 0x25d   :  { %1286 = vmatprep.mubr.f32.mxu1 %v260_v8  ;;  %v253_v10 = vmul.f32 %v1751_v2, %v245_v9  ;;  %v1769_v22 = vadd.f32 %v260_v8, %v1721_v4  ;;  %1298 = vmatpush3.msra.mxu0 %v412_v39  ;;  %v538_v39 = vld [vmem:[#allocation8 + $0x20] sm:$0xff] }
 0x25e   :  { %1299 = vmatprep.subr.mxu0 %v411_v40 }
 0x25f   :  { %v261_v11 = vadd.f32 %v1754_v5, %v253_v10  ;;  %1300 = vmatpush3.msra.mxu0 %v411_v40  ;;  %v537_v40 = vld [vmem:[#allocation8 + $0x18] sm:$0xff] }
 0x260   :  { %1301 = vmatprep.subr.mxu0 %v410_v41 }
 0x261   :  { %1287 = vmatmul.mubr.f32.vlgmr.msra.gmra.mxu1 %v261_v11  ;;  %v1765_v19 = vadd.f32 %v261_v11, %v1724_v17  ;;  %1302 = vmatpush3.msra.mxu0 %v410_v41  ;;  %v536_v41 = vld [vmem:[#allocation8 + $0x10] sm:$0xff] }
 0x262   :  { %1303 = vmatprep.subr.mxu0 %v409_v42 }
 0x263   :  { %1304 = vmatpush3.msra.mxu0 %v409_v42  ;;  %v535_v42 = vld [vmem:[#allocation8 + $0x8] sm:$0xff] }
 0x264   :  { %1305 = vmatprep.subr.mxu0 %v408_v43 }
 0x265   :  { %1306 = vmatpush3.msra.mxu0 %v408_v43  ;;  %v534_v43 = vld [vmem:[#allocation8] sm:$0xff] }
 0x266   :  { %1307 = vmatprep.subr.mxu0 %v407_v44 }
 0x267   :  { %1308 = vmatpush3.msra.mxu0 %v407_v44  ;;  %v651_v44 = vld [vmem:[#allocation10 + $0x78] sm:$0xff] }
 0x268   :  { %1309 = vmatprep.subr.mxu0 %v406_v45 }
 0x269   :  { %1310 = vmatpush3.msra.mxu0 %v406_v45  ;;  %v650_v45 = vld [vmem:[#allocation10 + $0x70] sm:$0xff] }
 0x26a   :  { %1311 = vmatprep.subr.mxu0 %v405_v46 }
 0x26b   :  { %1312 = vmatpush3.msra.mxu0 %v405_v46  ;;  %v649_v46 = vld [vmem:[#allocation10 + $0x68] sm:$0xff] }
 0x26c   :  { %1313 = vmatprep.subr.mxu0 %v404_v47 }
 0x26d   :  { %1314 = vmatpush3.msra.mxu0 %v404_v47  ;;  %v648_v47 = vld [vmem:[#allocation10 + $0x60] sm:$0xff] }
 0x26e   :  { %1315 = vmatprep.subr.mxu0 %v403_v48 }
 0x26f   :  { %1316 = vmatpush3.msra.mxu0 %v403_v48  ;;  %v647_v48 = vld [vmem:[#allocation10 + $0x58] sm:$0xff] }
 0x270   :  { %1317 = vmatprep.subr.mxu0 %v402_v49 }
 0x271   :  { %1318 = vmatpush3.msra.mxu0 %v402_v49  ;;  %v646_v49 = vld [vmem:[#allocation10 + $0x50] sm:$0xff] }
 0x272   :  { %1319 = vmatprep.subr.mxu0 %v401_v50 }
 0x273   :  { %1320 = vmatpush3.msra.mxu0 %v401_v50  ;;  %v645_v50 = vld [vmem:[#allocation10 + $0x48] sm:$0xff] }
 0x274   :  { %1359 = vmatprep.subr.mxu0 %v651_v44 }
 0x321   :  { %v1288_v13 = vpop.f32.mrf.mxu1 }
 0x322   :  { %v361_v14 = vadd.f32 %v1288_v13, %v1081_v12 }
 0x323   :  { %v355_v15 = vpop.f32.mrf.mxu1 }
 0x324   :  { %v365_v16 = vmax.f32 %v361_v14, 0.0  ;;  %v356_v18 = vadd.f32 %v1081_v12, %v355_v15 }
 0x326   :  { %v364_v20 = vmax.f32 %v356_v18, 0.0  ;;  %v367_v21 = vadd.f32 %v365_v16, %v1765_v19  ;;  %v549_v18 = vld [vmem:[#allocation8 + $0x78] sm:$0xff] }
 0x327   :  { %1324 = vmatprep.subr.mxu1 %v549_v18 }
 0x328   :  { %370 = vadd.xlane.f32.xlu1 %v367_v21  ;;  %v366_v23 = vadd.f32 %v364_v20, %v1769_v22  ;;  %v548_v20 = vld [vmem:[#allocation8 + $0x70] sm:$0xff]  ;;  %1325 = vmatpush3.msra.mxu1 %v549_v18 }
 0x329   :  { %1326 = vmatprep.subr.mxu1 %v548_v20 }
 0x32a   :  { %368 = vadd.xlane.f32.xlu0 %v366_v23  ;;  %1327 = vmatpush3.msra.mxu1 %v548_v20 }
 0x3b1   :  { %v371_v26 = vpop.xlane.xlu1 %370 }
 0x3b2   :  { %v373_v27 = vmul.f32 0.03125, %v371_v26 }
 0x3b3   :  { %v369_v17 = vpop.xlane.xlu0 %368 }
 0x3b4   :  { %v375_v28 = vmul.f32 %v1736_v31, %v373_v27  ;;  %v372_v32 = vmul.f32 0.03125, %v369_v17 }
 0x3b6   :  { %v374_v33 = vmul.f32 %v1736_v31, %v372_v32  ;;  %v377_v4 = vsub.f32 %v367_v21, %v375_v28  ;;  %v547_v32 = vld [vmem:[#allocation8 + $0x68] sm:$0xff] }
 0x3b7   :  { %1328 = vmatprep.subr.mxu1 %v547_v32 }
 0x3b8   :  { %v379_v34 = vmul.f32 %v377_v4, %v377_v4  ;;  %v376_v35 = vsub.f32 %v366_v23, %v374_v33  ;;  %1329 = vmatpush3.msra.mxu1 %v547_v32  ;;  %v546_v33 = vld [vmem:[#allocation8 + $0x60] sm:$0xff]  ;;  %v801_v32 = vld [vmem:[#allocation10 + $0xf8] sm:$0xff] }
 0x3b9   :  { %1330 = vmatprep.subr.mxu1 %v546_v33 }
 0x3ba   :  { %382 = vadd.xlane.f32.xlu1 %v379_v34  ;;  %v378_v36 = vmul.f32 %v376_v35, %v376_v35  ;;  %1331 = vmatpush3.msra.mxu1 %v546_v33  ;;  %v543_v34 = vld [vmem:[#allocation8 + $0x48] sm:$0xff]  ;;  %v800_v33 = vld [vmem:[#allocation10 + $0xf0] sm:$0xff] }
 0x3bc   :  { %380 = vadd.xlane.f32.xlu0 %v378_v36  ;;  %v541_v36 = vld [vmem:[#allocation8 + $0x38] sm:$0xff] }
 0x443   :  { %v383_v51 = vpop.xlane.xlu1 %382 }
 0x444   :  { %v385_v52 = vmul.f32 0.03125, %v383_v51  ;;  %v644_v51 = vld [vmem:[#allocation10 + $0x40] sm:$0xff] }
 0x445   :  { %v381_v53 = vpop.xlane.xlu0 %380 }
 0x446   :  { %v387_v54 = vmax.f32 %v385_v52, 0.0  ;;  %v384_v55 = vmul.f32 0.03125, %v381_v53  ;;  %v643_v52 = vld [vmem:[#allocation10 + $0x38] sm:$0xff]  ;;  %v642_v53 = vld [vmem:[#allocation10 + $0x30] sm:$0xff] }
 0x448   :  { %v389_v56 = vadd.f32 1e-05, %v387_v54  ;;  %v386_v57 = vmax.f32 %v384_v55, 0.0  ;;  %v641_v54 = vld [vmem:[#allocation10 + $0x28] sm:$0xff]  ;;  %v640_v55 = vld [vmem:[#allocation10 + $0x20] sm:$0xff] }
 0x44a   :  { %1477 = vrsqrt.f32 %v389_v56  ;;  %v388_v58 = vadd.f32 1e-05, %v386_v57 }
 0x44c   :  { %1479 = vrsqrt.f32 %v388_v58 }
 0x457   :  { %v1478_v59 = vpop.eup %1477 }
 0x458   :  { %v393_v60 = vmul.f32 %v1478_v59, %v377_v4  ;;  %v545_v4 = vld [vmem:[#allocation8 + $0x58] sm:$0xff] }
 0x459   :  { %v1480_v61 = vpop.eup %1479  ;;  %1332 = vmatprep.subr.mxu1 %v545_v4 }
 0x45a   :  { %v392_v62 = vmul.f32 %v1480_v61, %v376_v35  ;;  %v395_v63 = vmul.f32 %v1751_v2, %v393_v60  ;;  %1333 = vmatpush3.msra.mxu1 %v545_v4  ;;  %v542_v35 = vld [vmem:[#allocation8 + $0x40] sm:$0xff]  ;;  %v1815_v4 = vsel %vm744_vm1, 1.0, %v1632_v30  ;;  %v797_v30 = vld [vmem:[#allocation10 + $0xd8] sm:$0xff] }
 0x45c   :  { %v394_v0 = vmul.f32 %v1751_v2, %v392_v62  ;;  %v397_v3 = vadd.f32 %v1754_v5, %v395_v63 }
 0x45e   :  { %v396_v1 = vadd.f32 %v1754_v5, %v394_v0  ;;  %v399_v12 = vadd.f32 %v397_v3, %v1765_v19 }
 0x460   :  { %1321 = vmatprep.mubr.f32.mxu0 %v396_v1  ;;  %v398_v15 = vadd.f32 %v396_v1, %v1769_v22 }
 0x461   :  { %1322 = vmatmul.mubr.f32.vlgmr.msra.gmra.mxu0 %v397_v3 }
 0x462   :  { %1360 = vmatpush3.msra.mxu0 %v651_v44  ;;  %v796_v44 = vld [vmem:[#allocation10 + $0xd0] sm:$0xff] }
 0x463   :  { %1361 = vmatprep.subr.mxu0 %v650_v45 }
 0x464   :  { %1362 = vmatpush3.msra.mxu0 %v650_v45  ;;  %v795_v45 = vld [vmem:[#allocation10 + $0xc8] sm:$0xff] }
 0x465   :  { %1363 = vmatprep.subr.mxu0 %v649_v46 }
 0x466   :  { %1364 = vmatpush3.msra.mxu0 %v649_v46  ;;  %v794_v46 = vld [vmem:[#allocation10 + $0xc0] sm:$0xff] }
 0x467   :  { %1365 = vmatprep.subr.mxu0 %v648_v47 }
 0x468   :  { %1366 = vmatpush3.msra.mxu0 %v648_v47  ;;  %v793_v47 = vld [vmem:[#allocation10 + $0xb8] sm:$0xff] }
 0x469   :  { %1367 = vmatprep.subr.mxu0 %v647_v48 }
 0x46a   :  { %1368 = vmatpush3.msra.mxu0 %v647_v48  ;;  %v792_v48 = vld [vmem:[#allocation10 + $0xb0] sm:$0xff] }
 0x46b   :  { %1369 = vmatprep.subr.mxu0 %v646_v49 }
 0x46c   :  { %1370 = vmatpush3.msra.mxu0 %v646_v49  ;;  %v791_v49 = vld [vmem:[#allocation10 + $0xa8] sm:$0xff] }
 0x46d   :  { %1371 = vmatprep.subr.mxu0 %v645_v50 }
 0x46e   :  { %1372 = vmatpush3.msra.mxu0 %v645_v50  ;;  %v790_v50 = vld [vmem:[#allocation10 + $0xa0] sm:$0xff] }
 0x46f   :  { %1373 = vmatprep.subr.mxu0 %v644_v51 }
 0x470   :  { %1374 = vmatpush3.msra.mxu0 %v644_v51  ;;  %v789_v51 = vld [vmem:[#allocation10 + $0x98] sm:$0xff] }
 0x471   :  { %1375 = vmatprep.subr.mxu0 %v643_v52 }
 0x472   :  { %1376 = vmatpush3.msra.mxu0 %v643_v52  ;;  %v788_v52 = vld [vmem:[#allocation10 + $0x90] sm:$0xff] }
 0x473   :  { %1377 = vmatprep.subr.mxu0 %v642_v53 }
 0x474   :  { %1378 = vmatpush3.msra.mxu0 %v642_v53  ;;  %v787_v53 = vld [vmem:[#allocation10 + $0x88] sm:$0xff] }
 0x475   :  { %1379 = vmatprep.subr.mxu0 %v641_v54 }
 0x476   :  { %1380 = vmatpush3.msra.mxu0 %v641_v54  ;;  %v786_v54 = vld [vmem:[#allocation10 + $0x80] sm:$0xff] }
 0x477   :  { %1381 = vmatprep.subr.mxu0 %v640_v55 }
 0x478   :  { %1382 = vmatpush3.msra.mxu0 %v640_v55 }
 0x521   :  { %v1323_v7 = vpop.f32.mrf.mxu0 }
 0x522   :  { %v497_v8 = vadd.f32 %v1323_v7, %v1083_v6 }
 0x523   :  { %v491_v9 = vpop.f32.mrf.mxu0 }
 0x524   :  { %v501_v10 = vmax.f32 %v497_v8, 0.0  ;;  %v492_v11 = vadd.f32 %v1083_v6, %v491_v9 }
 0x526   :  { %v500_v13 = vmax.f32 %v492_v11, 0.0  ;;  %v503_v14 = vadd.f32 %v501_v10, %v399_v12  ;;  %v639_v11 = vld [vmem:[#allocation10 + $0x18] sm:$0xff]  ;;  %v638_v12 = vld [vmem:[#allocation10 + $0x10] sm:$0xff] }
 0x527   :  { %1383 = vmatprep.subr.mxu0 %v639_v11 }
 0x528   :  { %506 = vadd.xlane.f32.xlu1 %v503_v14  ;;  %v502_v16 = vadd.f32 %v500_v13, %v398_v15  ;;  %1384 = vmatpush3.msra.mxu0 %v639_v11  ;;  %v637_v13 = vld [vmem:[#allocation10 + $0x8] sm:$0xff] }
 0x529   :  { %1385 = vmatprep.subr.mxu0 %v638_v12 }
 0x52a   :  { %504 = vadd.xlane.f32.xlu0 %v502_v16  ;;  %1386 = vmatpush3.msra.mxu0 %v638_v12  ;;  %v1090_v12 = vld [vmem:[%s1875_s8 + $0x1] ss:$0 sm:$0xff] }
 0x52b   :  { %1387 = vmatprep.subr.mxu0 %v637_v13 }
 0x52c   :  { %1388 = vmatpush3.msra.mxu0 %v637_v13 }
 0x5b1   :  { %v507_v21 = vpop.xlane.xlu1 %506 }
 0x5b2   :  { %v509_v23 = vmul.f32 0.03125, %v507_v21 }
 0x5b3   :  { %v505_v24 = vpop.xlane.xlu0 %504 }
 0x5b4   :  { %v511_v25 = vmul.f32 %v1736_v31, %v509_v23  ;;  %v508_v26 = vmul.f32 0.03125, %v505_v24  ;;  %v1085_v23 = vld [vmem:[%s1875_s8] ss:$0 sm:$0xff] }
 0x5b6   :  { %v510_v19 = vmul.f32 %v1736_v31, %v508_v26  ;;  %v1785_v27 = vsub.f32 %v503_v14, %v511_v25  ;;  %v544_v31 = vld [vmem:[#allocation8 + $0x50] sm:$0xff]  ;;  %v636_v14 = vld [vmem:[#allocation10] sm:$0xff] }
 0x5b7   :  { %1334 = vmatprep.subr.mxu1 %v544_v31  ;;  %1389 = vmatprep.subr.mxu0 %v636_v14 }
 0x5b8   :  { %v515_v22 = vmul.f32 %v1785_v27, %v1785_v27  ;;  %v1789_v17 = vsub.f32 %v502_v16, %v510_v19  ;;  %1335 = vmatpush3.msra.mxu1 %v544_v31  ;;  %1390 = vmatpush3.msra.mxu0 %v636_v14 }
 0x5b9   :  { %1336 = vmatprep.subr.mxu1 %v543_v34 }
 0x5ba   :  { %518 = vadd.xlane.f32.xlu1 %v515_v22  ;;  %v514_v28 = vmul.f32 %v1789_v17, %v1789_v17  ;;  %1337 = vmatpush3.msra.mxu1 %v543_v34 }
 0x5bb   :  { %1338 = vmatprep.subr.mxu1 %v542_v35 }
 0x5bc   :  { %516 = vadd.xlane.f32.xlu0 %v514_v28  ;;  %1339 = vmatpush3.msra.mxu1 %v542_v35 }
 0x5bd   :  { %1340 = vmatprep.subr.mxu1 %v541_v36 }
 0x5be   :  { %1341 = vmatpush3.msra.mxu1 %v541_v36 }
 0x5bf   :  { %1342 = vmatprep.subr.mxu1 %v540_v37 }
 0x5c0   :  { %1343 = vmatpush3.msra.mxu1 %v540_v37 }
 0x5c1   :  { %1344 = vmatprep.subr.mxu1 %v539_v38 }
 0x5c2   :  { %1345 = vmatpush3.msra.mxu1 %v539_v38 }
 0x5c3   :  { %1346 = vmatprep.subr.mxu1 %v538_v39 }
 0x5c4   :  { %1347 = vmatpush3.msra.mxu1 %v538_v39 }
 0x5c5   :  { %1348 = vmatprep.subr.mxu1 %v537_v40 }
 0x5c6   :  { %1349 = vmatpush3.msra.mxu1 %v537_v40 }
 0x5c7   :  { %1350 = vmatprep.subr.mxu1 %v536_v41 }
 0x5c8   :  { %1351 = vmatpush3.msra.mxu1 %v536_v41 }
 0x5c9   :  { %1352 = vmatprep.subr.mxu1 %v535_v42 }
 0x5ca   :  { %1353 = vmatpush3.msra.mxu1 %v535_v42 }
 0x5cb   :  { %1354 = vmatprep.subr.mxu1 %v534_v43 }
 0x5cc   :  { %1355 = vmatpush3.msra.mxu1 %v534_v43  ;;  %v799_v43 = vld [vmem:[#allocation10 + $0xe8] sm:$0xff] }
 0x5cd   :  { %1394 = vmatprep.subr.mxu1 %v801_v32 }
 0x643   :  { %v519_v56 = vpop.xlane.xlu1 %518 }
 0x644   :  { %v521_v57 = vmul.f32 0.03125, %v519_v56 }
 0x645   :  { %v517_v58 = vpop.xlane.xlu0 %516 }
 0x646   :  { %v523_v59 = vmax.f32 %v521_v57, 0.0  ;;  %v520_v60 = vmul.f32 0.03125, %v517_v58 }
 0x648   :  { %v525_v61 = vadd.f32 1e-05, %v523_v59  ;;  %v522_v62 = vmax.f32 %v520_v60, 0.0 }
 0x64a   :  { %1481 = vrsqrt.f32 %v525_v61  ;;  %v524_v63 = vadd.f32 1e-05, %v522_v62 }
 0x64c   :  { %1483 = vrsqrt.f32 %v524_v63 }
 0x657   :  { %v1482_v0 = vpop.eup %1481 }
 0x658   :  { %v529_v1 = vmul.f32 %v1482_v0, %v1785_v27  ;;  %v1822_v0 = vld [vmem:[%s1876_s9] ss:$0 sm:$0xff] }
 0x659   :  { %v1484_v3 = vpop.eup %1483 }
 0x65a   :  { %v528_v6 = vmul.f32 %v1484_v3, %v1789_v17  ;;  %v531_v7 = vmul.f32 %v1751_v2, %v529_v1 }
 0x65c   :  { %v530_v8 = vmul.f32 %v1751_v2, %v528_v6  ;;  %v533_v10 = vadd.f32 %v1754_v5, %v531_v7  ;;  %v1084_v2 = vld [vmem:[%s1873_s6] ss:$0 sm:$0xff] }
 0x65e   :  { %v532_v9 = vadd.f32 %v1754_v5, %v530_v8  ;;  %v1828_v8 = vld [vmem:[%s1877_s10] ss:$0 sm:$0xff] }
 0x660   :  { %1356 = vmatprep.mubr.f32.mxu1 %v532_v9 }
 0x661   :  { %1357 = vmatmul.mubr.f32.vlgmr.msra.gmra.mxu1 %v533_v10 }
 0x662   :  { %1395 = vmatpush3.msra.mxu1 %v801_v32 }
 0x663   :  { %1396 = vmatprep.subr.mxu1 %v800_v33 }
 0x664   :  { %1397 = vmatpush3.msra.mxu1 %v800_v33 }
 0x665   :  { %1398 = vmatprep.subr.mxu1 %v799_v43 }
 0x666   :  { %1399 = vmatpush3.msra.mxu1 %v799_v43  ;;  %v927_v43 = vld [vmem:[#allocation10 + $0x128] sm:$0xff] }
 0x667   :  { %1400 = vmatprep.subr.mxu1 %v798_v29 }
 0x668   :  { %1401 = vmatpush3.msra.mxu1 %v798_v29  ;;  %v926_v29 = vld [vmem:[#allocation10 + $0x120] sm:$0xff] }
 0x669   :  { %1402 = vmatprep.subr.mxu1 %v797_v30 }
 0x66a   :  { %1403 = vmatpush3.msra.mxu1 %v797_v30  ;;  %v925_v30 = vld [vmem:[#allocation10 + $0x118] sm:$0xff] }
 0x66b   :  { %1404 = vmatprep.subr.mxu1 %v796_v44 }
 0x66c   :  { %1405 = vmatpush3.msra.mxu1 %v796_v44  ;;  %v924_v44 = vld [vmem:[#allocation10 + $0x110] sm:$0xff] }
 0x66d   :  { %1406 = vmatprep.subr.mxu1 %v795_v45 }
 0x66e   :  { %1407 = vmatpush3.msra.mxu1 %v795_v45  ;;  %v923_v45 = vld [vmem:[#allocation10 + $0x108] sm:$0xff] }
 0x66f   :  { %1408 = vmatprep.subr.mxu1 %v794_v46 }
 0x670   :  { %1409 = vmatpush3.msra.mxu1 %v794_v46  ;;  %v922_v46 = vld [vmem:[#allocation10 + $0x100] sm:$0xff] }
 0x671   :  { %1410 = vmatprep.subr.mxu1 %v793_v47 }
 0x672   :  { %1411 = vmatpush3.msra.mxu1 %v793_v47 }
 0x673   :  { %1412 = vmatprep.subr.mxu1 %v792_v48 }
 0x674   :  { %1413 = vmatpush3.msra.mxu1 %v792_v48 }
 0x675   :  { %1414 = vmatprep.subr.mxu1 %v791_v49 }
 0x676   :  { %1415 = vmatpush3.msra.mxu1 %v791_v49 }
 0x677   :  { %1416 = vmatprep.subr.mxu1 %v790_v50 }
 0x678   :  { %1417 = vmatpush3.msra.mxu1 %v790_v50 }
 0x679   :  { %1418 = vmatprep.subr.mxu1 %v789_v51 }
 0x67a   :  { %1419 = vmatpush3.msra.mxu1 %v789_v51 }
 0x67b   :  { %1420 = vmatprep.subr.mxu1 %v788_v52 }
 0x67c   :  { %1421 = vmatpush3.msra.mxu1 %v788_v52 }
 0x67d   :  { %1422 = vmatprep.subr.mxu1 %v787_v53 }
 0x67e   :  { %1423 = vmatpush3.msra.mxu1 %v787_v53 }
 0x67f   :  { %1424 = vmatprep.subr.mxu1 %v786_v54 }
 0x680   :  { %1425 = vmatpush3.msra.mxu1 %v786_v54 }
 0x721   :  { %v1358_v15 = vpop.f32.mrf.mxu1 }
 0x722   :  { %v629_v5 = vadd.f32 %v1358_v15, %v1084_v2 }
 0x723   :  { %v623_v16 = vpop.f32.mrf.mxu1 }
 0x724   :  { %v624_v18 = vadd.f32 %v1084_v2, %v623_v16  ;;  %v1804_v21 = vmax.f32 %v629_v5, 0.0 }
 0x726   :  { %v1802_v20 = vmax.f32 %v624_v18, 0.0 }
 0x728   :  { %1391 = vmatprep.mubr.f32.mxu0 %v1802_v20 }
 0x729   :  { %1392 = vmatmul.mubr.f32.vlgmr.msra.gmra.mxu0 %v1804_v21 }
 0x7e9   :  { %v1393_v24 = vpop.f32.mrf.mxu0 }
 0x7ea   :  { %v731_v25 = vadd.f32 %v1393_v24, %v1085_v23 }
 0x7eb   :  { %v725_v26 = vpop.f32.mrf.mxu0 }
 0x7ec   :  { %v735_v19 = vmax.f32 %v731_v25, 0.0  ;;  %v726_v27 = vadd.f32 %v1085_v23, %v725_v26  ;;  %v937_v26 = vld [vmem:[#allocation10 + $0x178] sm:$0xff] }
 0x7ed   :  { %1429 = vmatprep.subr.mxu0 %v937_v26 }
 0x7ee   :  { %v734_v22 = vmax.f32 %v726_v27, 0.0  ;;  %v737_v17 = vadd.f32 %v735_v19, %v1804_v21  ;;  %v936_v19 = vld [vmem:[#allocation10 + $0x170] sm:$0xff]  ;;  %1430 = vmatpush3.msra.mxu0 %v937_v26 }
 0x7ef   :  { %1431 = vmatprep.subr.mxu0 %v936_v19 }
 0x7f0   :  { %740 = vadd.xlane.f32.xlu1 %v737_v17  ;;  %v736_v28 = vadd.f32 %v734_v22, %v1802_v20  ;;  %1432 = vmatpush3.msra.mxu0 %v936_v19 }
 0x7f2   :  { %738 = vadd.xlane.f32.xlu0 %v736_v28 }
 0x879   :  { %v741_v31 = vpop.xlane.xlu1 %740 }
 0x87a   :  { %v743_v34 = vmul.f32 0.015625, %v741_v31 }
 0x87b   :  { %v739_v35 = vpop.xlane.xlu0 %738 }
 0x87c   :  { %v748_v36 = vmul.f32 %v1815_v4, %v743_v34  ;;  %v742_v37 = vmul.f32 0.015625, %v739_v35  ;;  %v935_v35 = vld [vmem:[#allocation10 + $0x168] sm:$0xff] }
 0x87d   :  { %1433 = vmatprep.subr.mxu0 %v935_v35 }
 0x87e   :  { %v747_v38 = vmul.f32 %v1815_v4, %v742_v37  ;;  %v750_v39 = vsub.f32 %v737_v17, %v748_v36  ;;  %1434 = vmatpush3.msra.mxu0 %v935_v35  ;;  %v934_v36 = vld [vmem:[#allocation10 + $0x160] sm:$0xff]  ;;  %v933_v37 = vld [vmem:[#allocation10 + $0x158] sm:$0xff] }
 0x87f   :  { %1435 = vmatprep.subr.mxu0 %v934_v36 }
 0x880   :  { %v752_v40 = vmul.f32 %v750_v39, %v750_v39  ;;  %v749_v41 = vsub.f32 %v736_v28, %v747_v38  ;;  %1436 = vmatpush3.msra.mxu0 %v934_v36  ;;  %v932_v38 = vld [vmem:[#allocation10 + $0x150] sm:$0xff] }
 0x881   :  { %1437 = vmatprep.subr.mxu0 %v933_v37 }
 0x882   :  { %755 = vadd.xlane.f32.xlu1 %v752_v40  ;;  %v751_v42 = vmul.f32 %v749_v41, %v749_v41  ;;  %1438 = vmatpush3.msra.mxu0 %v933_v37  ;;  %v930_v40 = vld [vmem:[#allocation10 + $0x140] sm:$0xff] }
 0x883   :  { %1439 = vmatprep.subr.mxu0 %v932_v38 }
 0x884   :  { %753 = vadd.xlane.f32.xlu0 %v751_v42  ;;  %1440 = vmatpush3.msra.mxu0 %v932_v38  ;;  %v928_v42 = vld [vmem:[#allocation10 + $0x130] sm:$0xff] }
 0x90b   :  { %v756_v55 = vpop.xlane.xlu1 %755 }
 0x90c   :  { %v758_v56 = vmul.f32 0.015625, %v756_v55 }
 0x90d   :  { %v754_v57 = vpop.xlane.xlu0 %753 }
 0x90e   :  { %v760_v58 = vmax.f32 %v758_v56, 0.0  ;;  %v757_v59 = vmul.f32 0.015625, %v754_v57 }
 0x910   :  { %v762_v60 = vadd.f32 1e-05, %v760_v58  ;;  %v759_v61 = vmax.f32 %v757_v59, 0.0 }
 0x912   :  { %1485 = vrsqrt.f32 %v762_v60  ;;  %v761_v62 = vadd.f32 1e-05, %v759_v61 }
 0x914   :  { %1487 = vrsqrt.f32 %v761_v62 }
 0x91f   :  { %v1486_v63 = vpop.eup %1485 }
 0x920   :  { %v766_v1 = vmul.f32 %v1486_v63, %v750_v39  ;;  %v931_v39 = vld [vmem:[#allocation10 + $0x148] sm:$0xff]  ;;  %v1092_v63 = vld [vmem:[%s1875_s8 + $0x2] ss:$0 sm:$0xff]  ;;  %s1633_s8 = smov [#allocation11]  }
 0x921   :  { %v1488_v3 = vpop.eup %1487  ;;  %1441 = vmatprep.subr.mxu0 %v931_v39  ;;  %s1062_s17 = sshll.u32 %s1633_s8, 4  ;;  %s1063_s17 = int_to_ptr.vmem [resolvable:$true] %s1062_s17 }
 0x922   :  { %v765_v6 = vmul.f32 %v1488_v3, %v749_v41  ;;  %v774_v7 = vmul.f32 %v1822_v0, %v766_v1  ;;  %1442 = vmatpush3.msra.mxu0 %v931_v39  ;;  %v929_v41 = vld [vmem:[#allocation10 + $0x138] sm:$0xff]  ;;  %s1597_s18 = scalar_lea.vmem %s1063_s17, 256  ;;  %p1602_p12 = scmp.lt.s32.totalorder %s1063_s17, %s1063_s17 }
 0x923   :  { %1443 = vmatprep.subr.mxu0 %v930_v40  ;;  %p1598_p11 = scmp.ne.s32.totalorder %s1063_s17, %s1597_s18  ;;  %p1603_p13 = scmp.lt.s32.totalorder %s1597_s18, %s1597_s18 }
 0x924   :  { %v773_v9 = vmul.f32 %v1822_v0, %v765_v6  ;;  %v782_v11 = vadd.f32 %v1828_v8, %v774_v7  ;;  %1444 = vmatpush3.msra.mxu0 %v930_v40 }
 0x925   :  { %1445 = vmatprep.subr.mxu0 %v929_v41  ;;  %p1604_p0 = por %p1603_p13, %p1602_p12 }
 0x926   :  { %v781_v10 = vadd.f32 %v1828_v8, %v773_v9  ;;  %v1837_v16 = vadd.f32 %v782_v11, %v1804_v21  ;;  %1446 = vmatpush3.msra.mxu0 %v929_v41 }
 0x927   :  { %1447 = vmatprep.subr.mxu0 %v928_v42  ;;  %p1605_p1 = pnand %p1604_p0, %p1598_p11 }
 0x928   :  { %1426 = vmatprep.mubr.f32.mxu1 %v781_v10  ;;  %v1841_v24 = vadd.f32 %v781_v10, %v1802_v20  ;;  %1448 = vmatpush3.msra.mxu0 %v928_v42 }
 0x929   :  { %1427 = vmatmul.mubr.f32.vlgmr.msra.gmra.mxu1 %v782_v11  ;;  %1449 = vmatprep.subr.mxu0 %v927_v43 }
 0x92a   :  { %1450 = vmatpush3.msra.mxu0 %v927_v43 }
 0x92b   :  { %1451 = vmatprep.subr.mxu0 %v926_v29 }
 0x92c   :  { %1452 = vmatpush3.msra.mxu0 %v926_v29 }
 0x92d   :  { %1453 = vmatprep.subr.mxu0 %v925_v30 }
 0x92e   :  { %1454 = vmatpush3.msra.mxu0 %v925_v30 }
 0x92f   :  { %1455 = vmatprep.subr.mxu0 %v924_v44 }
 0x930   :  { %1456 = vmatpush3.msra.mxu0 %v924_v44 }
 0x931   :  { %1457 = vmatprep.subr.mxu0 %v923_v45 }
 0x932   :  { %1458 = vmatpush3.msra.mxu0 %v923_v45 }
 0x933   :  { %1459 = vmatprep.subr.mxu0 %v922_v46 }
 0x934   :  { %1460 = vmatpush3.msra.mxu0 %v922_v46 }
 0x9e9   :  { %v1428_v13 = vpop.f32.mrf.mxu1 }
 0x9ea   :  { %v882_v14 = vadd.f32 %v1428_v13, %v1090_v12 }
 0x9eb   :  { %v876_v2 = vpop.f32.mrf.mxu1 }
 0x9ec   :  { %v886_v15 = vmax.f32 %v882_v14, 0.0  ;;  %v877_v5 = vadd.f32 %v1090_v12, %v876_v2 }
 0x9ee   :  { %v885_v18 = vmax.f32 %v877_v5, 0.0  ;;  %v888_v23 = vadd.f32 %v886_v15, %v1837_v16 }
 0x9f0   :  { %891 = vadd.xlane.f32.xlu1 %v888_v23  ;;  %v887_v25 = vadd.f32 %v885_v18, %v1841_v24 }
 0x9f2   :  { %889 = vadd.xlane.f32.xlu0 %v887_v25 }
 0xa79   :  { %v892_v27 = vpop.xlane.xlu1 %891 }
 0xa7a   :  { %v894_v22 = vmul.f32 0.015625, %v892_v27 }
 0xa7b   :  { %v890_v21 = vpop.xlane.xlu0 %889 }
 0xa7c   :  { %v896_v17 = vmul.f32 %v1815_v4, %v894_v22  ;;  %v893_v28 = vmul.f32 0.015625, %v890_v21 }
 0xa7e   :  { %v895_v32 = vmul.f32 %v1815_v4, %v893_v28  ;;  %v898_v20 = vsub.f32 %v888_v23, %v896_v17 }
 0xa80   :  { %v900_v33 = vmul.f32 %v898_v20, %v898_v20  ;;  %v897_v31 = vsub.f32 %v887_v25, %v895_v32 }
 0xa82   :  { %903 = vadd.xlane.f32.xlu1 %v900_v33  ;;  %v899_v34 = vmul.f32 %v897_v31, %v897_v31 }
 0xa84   :  { %901 = vadd.xlane.f32.xlu0 %v899_v34 }
 0xb0b   :  { %v904_v47 = vpop.xlane.xlu1 %903 }
 0xb0c   :  { %v906_v48 = vmul.f32 0.015625, %v904_v47 }
 0xb0d   :  { %v902_v49 = vpop.xlane.xlu0 %901 }
 0xb0e   :  { %v908_v50 = vmax.f32 %v906_v48, 0.0  ;;  %v905_v51 = vmul.f32 0.015625, %v902_v49 }
 0xb10   :  { %v910_v52 = vadd.f32 1e-05, %v908_v50  ;;  %v907_v53 = vmax.f32 %v905_v51, 0.0 }
 0xb12   :  { %1489 = vrsqrt.f32 %v910_v52  ;;  %v909_v54 = vadd.f32 1e-05, %v907_v53 }
 0xb14   :  { %1491 = vrsqrt.f32 %v909_v54 }
 0xb1f   :  { %v1490_v55 = vpop.eup %1489 }
 0xb20   :  { %v914_v56 = vmul.f32 %v1490_v55, %v898_v20 }
 0xb21   :  { %v1492_v57 = vpop.eup %1491 }
 0xb22   :  { %v913_v58 = vmul.f32 %v1492_v57, %v897_v31  ;;  %v916_v59 = vmul.f32 %v1822_v0, %v914_v56 }
 0xb24   :  { %v915_v60 = vmul.f32 %v1822_v0, %v913_v58  ;;  %v918_v62 = vadd.f32 %v1828_v8, %v916_v59 }
 0xb26   :  { %v917_v61 = vadd.f32 %v1828_v8, %v915_v60  ;;  %v920_v10 = vadd.f32 %v918_v62, %v1837_v16 }
 0xb28   :  { %1461 = vmatprep.mubr.f32.mxu0 %v917_v61  ;;  %v919_v13 = vadd.f32 %v917_v61, %v1841_v24 }
 0xb29   :  { %1462 = vmatmul.mubr.f32.vlgmr.msra.gmra.mxu0 %v918_v62 }
 0xbe9   :  { %v1463_v1 = vpop.f32.mrf.mxu0 }
 0xbea   :  { %v1018_v3 = vadd.f32 %v1463_v1, %v1092_v63 }
 0xbeb   :  { %v1012_v6 = vpop.f32.mrf.mxu0 }
 0xbec   :  { %v1022_v7 = vmax.f32 %v1018_v3, 0.0  ;;  %v1013_v9 = vadd.f32 %v1092_v63, %v1012_v6 }
 0xbee   :  { %v1021_v11 = vmax.f32 %v1013_v9, 0.0  ;;  %v1024_v12 = vadd.f32 %v1022_v7, %v920_v10 }
 0xbf0   :  { %1027 = vadd.xlane.f32.xlu1 %v1024_v12  ;;  %v1023_v14 = vadd.f32 %v1021_v11, %v919_v13 }
 0xbf2   :  { %1025 = vadd.xlane.f32.xlu0 %v1023_v14 }
 0xc79   :  { %v1028_v2 = vpop.xlane.xlu1 %1027 }
 0xc7a   :  { %v1030_v15 = vmul.f32 0.015625, %v1028_v2 }
 0xc7b   :  { %v1026_v5 = vpop.xlane.xlu0 %1025 }
 0xc7c   :  { %v1032_v18 = vmul.f32 %v1815_v4, %v1030_v15  ;;  %v1029_v23 = vmul.f32 0.015625, %v1026_v5 }
 0xc7e   :  { %v1031_v25 = vmul.f32 %v1815_v4, %v1029_v23  ;;  %v1034_v26 = vsub.f32 %v1024_v12, %v1032_v18 }
 0xc80   :  { %v1036_v19 = vmul.f32 %v1034_v26, %v1034_v26  ;;  %v1033_v27 = vsub.f32 %v1023_v14, %v1031_v25 }
 0xc82   :  { %1039 = vadd.xlane.f32.xlu1 %v1036_v19  ;;  %v1035_v16 = vmul.f32 %v1033_v27, %v1033_v27 }
 0xc84   :  { %1037 = vadd.xlane.f32.xlu0 %v1035_v16 }
 0xd0b   :  { %v1040_v22 = vpop.xlane.xlu1 %1039 }
 0xd0c   :  { %v1042_v21 = vmul.f32 0.015625, %v1040_v22 }
 0xd0d   :  { %v1038_v24 = vpop.xlane.xlu0 %1037 }
 0xd0e   :  { %v1044_v17 = vmax.f32 %v1042_v21, 0.0  ;;  %v1041_v28 = vmul.f32 0.015625, %v1038_v24 }
 0xd10   :  { %v1046_v32 = vadd.f32 1e-05, %v1044_v17  ;;  %v1043_v20 = vmax.f32 %v1041_v28, 0.0 }
 0xd12   :  { %1493 = vrsqrt.f32 %v1046_v32  ;;  %v1045_v33 = vadd.f32 1e-05, %v1043_v20 }
 0xd14   :  { %1495 = vrsqrt.f32 %v1045_v33 }
 0xd1f   :  { %v1494_v31 = vpop.eup %1493 }
 0xd20   :  { %v1050_v34 = vmul.f32 %v1494_v31, %v1034_v26 }
 0xd21   :  { %v1496_v35 = vpop.eup %1495 }
 0xd22   :  { %v1049_v4 = vmul.f32 %v1496_v35, %v1033_v27  ;;  %v1052_v36 = vmul.f32 %v1822_v0, %v1050_v34 }
 0xd24   :  { %v1051_v37 = vmul.f32 %v1822_v0, %v1049_v4  ;;  %v1054_v38 = vadd.f32 %v1828_v8, %v1052_v36 }
 0xd26   :  { %v1053_v39 = vadd.f32 %v1828_v8, %v1051_v37  ;;  %1056 = vst [vmem:[#allocation11 + $0x8] sm:$0xff] %v1054_v38 }
 0xd28   :  { %1055 = vst [vmem:[#allocation11] sm:$0xff] %v1053_v39 }
 0xd29   :  { %1608 = shalt.err (!%p1605_p1)
}
 0xd2a   :  { %1068 = dma.vmem_to_hbm [thread:$0]  %s1063_s17, 256, %s1878_s11, [#allocation4], %s1627_s22, %s1627_s22, %s1628_s23  }
 0xd2b   :  { %1623 = dma.done.wait [#allocation4], 256  }
 0xd2c   :  { %1624 = vsyncadd [#allocation4], 4294967040 }
 0xd2d   :  { %1072 = vsyncpa [#allocation3], 1 }
 0xd2e   :  { %1073 = vsyncpa [#allocation6], 1 }
 0xd2f   :  { %1074 = vsyncpa [#allocation9], 1 }
 0xd30   :  { %1075 = vsyncpa [#allocation4], 1 }

</bundles_post_ra>
